<compile_context>
chip_gen: v7x
topology: tpu7x:2x2x1
jax: 0.10.0
libtpu: 0.0.40
codegen_flags: <defaults>
</compile_context>

<pallas_src>
import functools

import jax
import jax.numpy as jnp
import numpy as np
from jax.experimental import pallas as pl
from jax.experimental.pallas import tpu as pltpu

# Make the pure-JAX reference use full f32 matmul precision so the comparison
# against the (exact-f32) Pallas kernel is meaningful.
jax.config.update("jax_default_matmul_precision", "highest")


def _attention_kernel(x_ref, wp_ref, bp_ref, wo_ref, bo_ref, o_ref, *,
                      n_heads, d_k, scale):
    # x_ref : (1, C, S)         channels-on-sublanes / sequence-on-lanes
    # wp_ref: (n_heads*3*dk, C) qkv projection weight (PyTorch (out,in) layout)
    # bp_ref: (n_heads*3*dk, 1)
    # wo_ref: (C, n_heads*dk)   output projection weight
    # bo_ref: (C, 1)
    # o_ref : (1, C, S)
    x = x_ref[0]                                                   # (C, S) f32

    # qkv^T = Wp @ x + bp  -> (n_heads*3*dk, S), lane-dense.
    qkv = jnp.dot(wp_ref[...], x, preferred_element_type=jnp.float32) + bp_ref[...]
    wo = wo_ref[...]                                               # (C, H*dk)

    out = None
    for h in range(n_heads):                                       # static unroll
        base = 3 * d_k * h
        q = qkv[base:base + d_k, :]                                # (dk, S_i)
        k = qkv[base + d_k:base + 2 * d_k, :]                      # (dk, S_j)
        v = qkv[base + 2 * d_k:base + 3 * d_k, :]                  # (dk, S_j)

        # s[j, i] = sum_d k[d, j] * q[d, i]   (== attn[i, j] of the reference)
        s = jax.lax.dot_general(
            k, q, (((0,), (0,)), ((), ())),
            preferred_element_type=jnp.float32) * scale            # (S_j, S_i)

        # softmax over the *query* index i (torch softmax(dim=1)) == lane axis.
        s = s - jnp.max(s, axis=1, keepdims=True)
        p = jnp.exp(s)
        p = p * (1.0 / jnp.sum(p, axis=1, keepdims=True))          # (S_j, S_i)

        # res^T[d, i] = sum_j v[d, j] * p[j, i]
        res_h = jnp.dot(v, p, preferred_element_type=jnp.float32)  # (dk, S_i)
        contrib = jnp.dot(wo[:, d_k * h:d_k * (h + 1)], res_h,
                          preferred_element_type=jnp.float32)      # (C, S)
        out = contrib if out is None else out + contrib

    out = out + bo_ref[...] + x                                    # bias + residual
    o_ref[0] = out.astype(o_ref.dtype)


def attention_block_forward(x_nchw, params, *, n_heads, d_k):
    """Fused AttentionBlock forward. x: (B, C, H, W) -> (B, C, H, W)."""
    B, C, H, W = x_nchw.shape
    S = H * W
    hdk = n_heads * d_k
    scale = float(d_k) ** -0.5

    x_cs = x_nchw.reshape(B, C, S).astype(jnp.float32)   # free reshape, lane-dense
    wp = params["w_proj"].astype(jnp.float32)             # (3*hdk, C)
    bp = params["b_proj"].reshape(3 * hdk, 1).astype(jnp.float32)
    wo = params["w_out"].astype(jnp.float32)               # (C, hdk)
    bo = params["b_out"].reshape(C, 1).astype(jnp.float32)

    kernel = functools.partial(_attention_kernel,
                               n_heads=n_heads, d_k=d_k, scale=scale)

    out_cs = pl.pallas_call(
        kernel,
        out_shape=jax.ShapeDtypeStruct((B, C, S), jnp.float32),
        grid=(B,),
        in_specs=[
            pl.BlockSpec((1, C, S), lambda b: (b, 0, 0)),
            pl.BlockSpec((3 * hdk, C), lambda b: (0, 0)),
            pl.BlockSpec((3 * hdk, 1), lambda b: (0, 0)),
            pl.BlockSpec((C, hdk), lambda b: (0, 0)),
            pl.BlockSpec((C, 1), lambda b: (0, 0)),
        ],
        out_specs=pl.BlockSpec((1, C, S), lambda b: (b, 0, 0)),
        compiler_params=pltpu.CompilerParams(
            dimension_semantics=("parallel",)),
    )(x_cs, wp, bp, wo, bo)

    return out_cs.reshape(B, C, H, W)


def init_params(key, n_channels, n_heads, d_k):
    """Mimics PyTorch nn.Linear default init (uniform +-1/sqrt(fan_in))."""
    ks = jax.random.split(key, 4)
    hdk = n_heads * d_k

    bound_p = 1.0 / np.sqrt(n_channels)
    w_proj = jax.random.uniform(ks[0], (3 * hdk, n_channels), jnp.float32,
                                -bound_p, bound_p)
    b_proj = jax.random.uniform(ks[1], (3 * hdk,), jnp.float32, -bound_p, bound_p)

    bound_o = 1.0 / np.sqrt(hdk)
    w_out = jax.random.uniform(ks[2], (n_channels, hdk), jnp.float32,
                               -bound_o, bound_o)
    b_out = jax.random.uniform(ks[3], (n_channels,), jnp.float32, -bound_o, bound_o)
    return dict(w_proj=w_proj, b_proj=b_proj, w_out=w_out, b_out=b_out)


def ref_forward(x, p, n_heads, d_k):
    """Pure-JAX reference, mirroring the PyTorch AttentionBlock.forward exactly."""
    B, C, H, W = x.shape
    S = H * W
    xs = x.reshape(B, C, S).transpose(0, 2, 1)                     # (B, S, C)
    qkv = xs @ p["w_proj"].T + p["b_proj"]                         # (B, S, 3*H*dk)
    qkv = qkv.reshape(B, S, n_heads, 3 * d_k)
    q, k, v = jnp.split(qkv, 3, axis=-1)                           # (B, S, H, dk)
    attn = jnp.einsum('bihd,bjhd->bijh', q, k) * (float(d_k) ** -0.5)
    attn = jax.nn.softmax(attn, axis=1)                            # dim=1 == i
    res = jnp.einsum('bijh,bjhd->bihd', attn, v)
    res = res.reshape(B, S, n_heads * d_k)
    res = res @ p["w_out"].T + p["b_out"]
    res = res + xs
    return res.transpose(0, 2, 1).reshape(B, C, H, W)


if __name__ == "__main__":
    key = jax.random.PRNGKey(0)
    k_x, k_p = jax.random.split(key)

    # Module defaults: n_heads=1, d_k=None -> n_channels, n_groups=1 (norm unused).
    B, C, H, W = 2, 4, 16, 16
    n_heads = 1
    d_k = C

    x = jax.random.normal(k_x, (B, C, H, W), jnp.float32)
    params = init_params(k_p, C, n_heads, d_k)

    out = attention_block_forward(x, params, n_heads=n_heads, d_k=d_k)
    out = jax.block_until_ready(out)
    assert out.shape == (B, C, H, W), out.shape

    ref = jax.block_until_ready(ref_forward(x, params, n_heads, d_k))
    np.testing.assert_allclose(np.asarray(out), np.asarray(ref),
                               rtol=1e-3, atol=1e-3)

    print("KERNEL_OK")
</pallas_src>

<mosaic_0001>
module attributes {stable_mosaic.version = 11 : i64} {
  func.func @_attention_kernel(%arg0: i32, %arg1: memref<1x4x256xf32, #tpu.memory_space<vmem>>, %arg2: memref<12x4xf32, #tpu.memory_space<vmem>>, %arg3: memref<12x1xf32, #tpu.memory_space<vmem>>, %arg4: memref<4x4xf32, #tpu.memory_space<vmem>>, %arg5: memref<4x1xf32, #tpu.memory_space<vmem>>, %arg6: memref<1x4x256xf32, #tpu.memory_space<vmem>>) attributes {dimension_semantics = [#tpu.dimension_semantics<parallel>], iteration_bounds = array<i64: 2>, scalar_prefetch = 0 : i64, scratch_operands = 0 : i64, tpu.core_type = #tpu.core_type<tc>, window_params = [{transform_indices = @transform_0, window_bounds = array<i64: 1, 4, 256>}, {pipeline_mode = #tpu.pipeline_mode<synchronous>, transform_indices = @transform_1, window_bounds = array<i64: 12, 4>}, {pipeline_mode = #tpu.pipeline_mode<synchronous>, transform_indices = @transform_2, window_bounds = array<i64: 12, 1>}, {pipeline_mode = #tpu.pipeline_mode<synchronous>, transform_indices = @transform_3, window_bounds = array<i64: 4, 4>}, {pipeline_mode = #tpu.pipeline_mode<synchronous>, transform_indices = @transform_4, window_bounds = array<i64: 4, 1>}, {transform_indices = @transform_5, window_bounds = array<i64: 1, 4, 256>}]} {
    %c0 = arith.constant 0 : index
    %c0_0 = arith.constant 0 : index
    %c0_1 = arith.constant 0 : index
    %0 = vector.load %arg1[%c0, %c0_0, %c0_1] : memref<1x4x256xf32, #tpu.memory_space<vmem>>, vector<1x4x256xf32>
    %1 = vector.shape_cast %0 : vector<1x4x256xf32> to vector<4x256xf32>
    %c0_2 = arith.constant 0 : index
    %c0_3 = arith.constant 0 : index
    %2 = vector.load %arg2[%c0_2, %c0_3] : memref<12x4xf32, #tpu.memory_space<vmem>>, vector<12x4xf32>
    %cst = arith.constant dense<0.000000e+00> : vector<12x256xf32>
    %3 = tpu.matmul %2, %1, %cst {dimension_numbers = #tpu.dot_dimension_numbers<[1], [0], [0], [1], [0, 0, 1, 1], [], []>, precision = #tpu.contract_precision<fp32>} : vector<12x4xf32>, vector<4x256xf32>, vector<12x256xf32> -> vector<12x256xf32>
    %c0_4 = arith.constant 0 : index
    %c0_5 = arith.constant 0 : index
    %4 = vector.load %arg3[%c0_4, %c0_5] : memref<12x1xf32, #tpu.memory_space<vmem>>, vector<12x1xf32>
    %5 = vector.broadcast %4 : vector<12x1xf32> to vector<12x256xf32>
    %6 = arith.addf %3, %5 : vector<12x256xf32>
    %c0_6 = arith.constant 0 : index
    %c0_7 = arith.constant 0 : index
    %7 = vector.load %arg4[%c0_6, %c0_7] : memref<4x4xf32, #tpu.memory_space<vmem>>, vector<4x4xf32>
    %8 = vector.extract_strided_slice %6 {offsets = [0, 0], sizes = [4, 256], strides = [1, 1]} : vector<12x256xf32> to vector<4x256xf32>
    %9 = vector.extract_strided_slice %6 {offsets = [4, 0], sizes = [4, 256], strides = [1, 1]} : vector<12x256xf32> to vector<4x256xf32>
    %10 = vector.extract_strided_slice %6 {offsets = [8, 0], sizes = [4, 256], strides = [1, 1]} : vector<12x256xf32> to vector<4x256xf32>
    %cst_8 = arith.constant dense<0.000000e+00> : vector<256x256xf32>
    %11 = tpu.matmul %9, %8, %cst_8 {dimension_numbers = #tpu.dot_dimension_numbers<[0], [0], [1], [1], [0, 1, 1, 1], [], []>, precision = #tpu.contract_precision<fp32>} : vector<4x256xf32>, vector<4x256xf32>, vector<256x256xf32> -> vector<256x256xf32>
    %cst_9 = arith.constant 5.000000e-01 : f32
    %12 = vector.broadcast %cst_9 : f32 to vector<256x256xf32>
    %13 = arith.mulf %11, %12 : vector<256x256xf32>
    %cst_10 = arith.constant dense<0xFF800000> : vector<256xf32>
    %14 = vector.multi_reduction <maximumf>, %13, %cst_10 [1] : vector<256x256xf32> to vector<256xf32>
    %15 = vector.shape_cast %14 : vector<256xf32> to vector<256x1xf32>
    %16 = vector.broadcast %15 : vector<256x1xf32> to vector<256x256xf32>
    %17 = arith.subf %13, %16 : vector<256x256xf32>
    %18 = math.exp %17 : vector<256x256xf32>
    %cst_11 = arith.constant dense<0.000000e+00> : vector<256xf32>
    %19 = vector.multi_reduction <add>, %18, %cst_11 [1] : vector<256x256xf32> to vector<256xf32>
    %20 = vector.shape_cast %19 : vector<256xf32> to vector<256x1xf32>
    %cst_12 = arith.constant 1.000000e+00 : f32
    %21 = vector.broadcast %cst_12 : f32 to vector<256x1xf32>
    %22 = arith.divf %21, %20 : vector<256x1xf32>
    %23 = vector.broadcast %22 : vector<256x1xf32> to vector<256x256xf32>
    %24 = arith.mulf %18, %23 : vector<256x256xf32>
    %cst_13 = arith.constant dense<0.000000e+00> : vector<4x256xf32>
    %25 = tpu.matmul %10, %24, %cst_13 {dimension_numbers = #tpu.dot_dimension_numbers<[1], [0], [0], [1], [0, 0, 1, 1], [], []>, precision = #tpu.contract_precision<fp32>} : vector<4x256xf32>, vector<256x256xf32>, vector<4x256xf32> -> vector<4x256xf32>
    %cst_14 = arith.constant dense<0.000000e+00> : vector<4x256xf32>
    %26 = tpu.matmul %7, %25, %cst_14 {dimension_numbers = #tpu.dot_dimension_numbers<[1], [0], [0], [1], [0, 0, 1, 1], [], []>, precision = #tpu.contract_precision<fp32>} : vector<4x4xf32>, vector<4x256xf32>, vector<4x256xf32> -> vector<4x256xf32>
    %c0_15 = arith.constant 0 : index
    %c0_16 = arith.constant 0 : index
    %27 = vector.load %arg5[%c0_15, %c0_16] : memref<4x1xf32, #tpu.memory_space<vmem>>, vector<4x1xf32>
    %28 = vector.broadcast %27 : vector<4x1xf32> to vector<4x256xf32>
    %29 = arith.addf %26, %28 : vector<4x256xf32>
    %30 = arith.addf %29, %1 : vector<4x256xf32>
    %c0_17 = arith.constant 0 : index
    %c0_18 = arith.constant 0 : index
    %c0_19 = arith.constant 0 : index
    %31 = vector.load %arg6[%c0_17, %c0_18, %c0_19] : memref<1x4x256xf32, #tpu.memory_space<vmem>>, vector<1x4x256xf32>
    %32 = vector.shape_cast %31 : vector<1x4x256xf32> to vector<4x256xf32>
    %33 = vector.shape_cast %30 : vector<4x256xf32> to vector<1x4x256xf32>
    tpu.vector_store %arg6[%c0_17, %c0_18, %c0_19], %33 {strides = array<i32>} : memref<1x4x256xf32, #tpu.memory_space<vmem>>, vector<1x4x256xf32>,
    return
  }
  func.func @transform_0(%arg0: i32) -> (i32, i32, i32) {
    %c0_i32 = arith.constant 0 : i32
    %c0_i32_0 = arith.constant 0 : i32
    %c0_i32_1 = arith.constant 0 : i32
    return %arg0, %c0_i32, %c0_i32_0 : i32, i32, i32
  }
  func.func @transform_1(%arg0: i32) -> (i32, i32) {
    %c0_i32 = arith.constant 0 : i32
    %c0_i32_0 = arith.constant 0 : i32
    %c0_i32_1 = arith.constant 0 : i32
    return %c0_i32, %c0_i32_0 : i32, i32
  }
  func.func @transform_2(%arg0: i32) -> (i32, i32) {
    %c0_i32 = arith.constant 0 : i32
    %c0_i32_0 = arith.constant 0 : i32
    %c0_i32_1 = arith.constant 0 : i32
    return %c0_i32, %c0_i32_0 : i32, i32
  }
  func.func @transform_3(%arg0: i32) -> (i32, i32) {
    %c0_i32 = arith.constant 0 : i32
    %c0_i32_0 = arith.constant 0 : i32
    %c0_i32_1 = arith.constant 0 : i32
    return %c0_i32, %c0_i32_0 : i32, i32
  }
  func.func @transform_4(%arg0: i32) -> (i32, i32) {
    %c0_i32 = arith.constant 0 : i32
    %c0_i32_0 = arith.constant 0 : i32
    %c0_i32_1 = arith.constant 0 : i32
    return %c0_i32, %c0_i32_0 : i32, i32
  }
  func.func @transform_5(%arg0: i32) -> (i32, i32, i32) {
    %c0_i32 = arith.constant 0 : i32
    %c0_i32_0 = arith.constant 0 : i32
    %c0_i32_1 = arith.constant 0 : i32
    return %arg0, %c0_i32, %c0_i32_0 : i32, i32, i32
  }
}

</mosaic_0001>

<bundles_post_ra>
// kernel: tpu_custom_call.1
= control target key start
LH: loop header
LB: loop body
LE: loop exit
PB: predicated region body
PF: predicated region fallthrough
CT: control target
= control target key end

     0   :  { %10 = vsyncpa [#allocation3], 0  ;;  %s8999_s0 = inlined_call_operand.vmem [shape: f32[2,4,256], index: 0, kind: input, shape index: {}]   ;;  %s9000_s1 = inlined_call_operand.vmem [shape: f32[12,4], index: 1, kind: input, shape index: {}]   ;;  %s9001_s2 = inlined_call_operand.vmem [shape: f32[12,1], index: 2, kind: input, shape index: {}]   ;;  %s9002_s3 = inlined_call_operand.vmem [shape: f32[4,4], index: 3, kind: input, shape index: {}]   ;;  %s9003_s4 = inlined_call_operand.vmem [shape: f32[4,1], index: 4, kind: input, shape index: {}]   ;;  %s9004_s5 = inlined_call_operand.hbm [shape: f32[2,4,256], index: 5, kind: output, shape index: {}]  }
   0x1   :  { %12 = vsyncpa [#allocation3 + $0x1], 0  ;;  %s6441_s18 = smov 0   ;;  %s6443_s19 = smov 0  }
   0x2   :  { %s6445_s20 = smov 0   ;;  %s6447_s21 = smov 0  }
   0x3 LB: > { %s6462_s22 = sadd.s32 4294967295, %s6406_s21   ;;  %s5343_s23 = sadd.s32 4294967294, %s6406_s21   ;;  %s6406_s21 = sphi %s6447_s21, %s9797_s21   ;;  %s6402_s20 = sphi %s6445_s20, %s9796_s20   ;;  %s6398_s19 = sphi %s6443_s19, %s9795_s19   ;;  %s6394_s18 = sphi %s6441_s18, %s9794_s18  }
   0x4   : > { %s6466_s24 = sadd.s32 1, %s6406_s21   ;;  %s135_s25 = sadd.s32 1, %s6402_s20 }
   0x5   : > { %s132_s26 = ssub.s32 %s6406_s21, %s6466_s24  ;;  %p145_p0 = scmp.ne.s32.totalorder %s6402_s20, %s6398_s19 }
   0x6   : > { %p133_p1 = scmp.eq.s32.totalorder %s132_s26, 0  ;;  %p146_p2 = scmp.eq.s32.totalorder %s6462_s22, 1 }
   0x7   : > { %p151_p3 = scmp.ne.s32.totalorder %s6398_s19, %s6394_s18  ;;  %p152_p4 = scmp.eq.s32.totalorder %s5343_s23, 1 }
   0x8   : > { %s6477_s27 = scalar_select %p133_p1, %s6402_s20, %s135_s25  }
   0x9   : > { %p6479_p5 = por %p146_p2, %p145_p0  ;;  %p6483_p6 = por %p152_p4, %p151_p3 }
   0xa   : > { %p5346_p7 = scmp.ge.s32.totalorder %s6406_s21, 1  ;;  %p190_p8 = scmp.lt.s32.totalorder %s6406_s21, 3 }
   0xc   : > { %p191_p9 = pnand %p5346_p7, %p190_p8 }
   0xe   : > { %194 = sbr.rel (%p191_p9) target bundleno = 2412 (0x96c), region = 40 }
  0x15   : > { %p218_p10 = scmp.lt.s32.totalorder %s6462_s22, 1  ;;  %v224_v0 = vld [vmem:[%s9000_s1] sm:$0xff]  ;;  %vm240_vm0 = vcmask 31744   ;;  %v9027_v1 = vmov 0.0   ;;  %v225_v3 = vld [vmem:[%s9000_s1 + $0x8] sm:$0xf] }
  0x16   : > { %318 = vmatprep.mubr.f32.mxu0 %v9027_v1  ;;  %v242_v2 = vsel %vm240_vm0, %v224_v0, 0  ;;  %v6409_v4 = vmov 0   ;;  %v226_v5 = vld [vmem:[%s9001_s2] sm:$0xff]  ;;  %v245_v7 = vsel %vm240_vm0, %v225_v3, 0  ;;  %1430 = vmatprep.mubr.f32.mxu1 %v9027_v1  ;;  %vm247_vm1 = vcmask 1043456   ;;  %s215_s6 = sand.u32 1, %s6398_s19  }
  0x17   : > { %6148 = vset.pattern.permute.xlu0 %v6409_v4  ;;  %s219_s11 = scalar_select %p218_p10, %s6462_s22, 1  ;;  %v319_v6 = vand.u32 4294901760, %v242_v2  ;;  %v330_v8 = vand.u32 4294901760, %v245_v7 }
  0x18   : > { %230 = vperm.xlu0 %6148, %v226_v5   ;;  %s5347_s7 = sshll.u32 %s215_s6, 3  ;;  %s5356_s8 = sshll.u32 %s6462_s22, 7 }
  0x19   : > { %s5355_s12 = sshll.u32 %s219_s11, 3  ;;  %v320_v9 = vsub.f32 %v242_v2, %v319_v6  ;;  %v331_v10 = vsub.f32 %v245_v7, %v330_v8  ;;  %s217_s9 = scalar_lea.vmem [#allocation2], %s5347_s7 }
  0x1a   : > { %s6508_s15 = scalar_lea.vmem %s8999_s0, %s5355_s12  ;;  %s5284_s10 = sshll.u32 %s217_s9, 4  ;;  %s8959_s10 = int_to_ptr.vmem [resolvable:$true] %s5284_s10 }
  0x1b   : > { %v223_v11 = vld [vmem:[%s6508_s15] sm:$0xff]  ;;  %v321_v12 = vand.u32 4294901760, %v320_v9  ;;  %v332_v15 = vand.u32 4294901760, %v331_v10  ;;  %s8957_s13 = scalar_lea.hbm %s9004_s5, %s5356_s8  ;;  %s5270_s14 = scalar_lea.sflag [#allocation3], %s215_s6 }
  0x1c   : > { %v6511_v13 = vcombine.high %v223_v11, %v223_v11  ;;  %v248_v14 = vsel %vm247_vm1, %v223_v11, 0  ;;  %s6410_s22 = smov [#allocation2]  }
  0x1d   : > { %v254_v16 = vand.u32 4294901760, %v248_v14  ;;  %v322_v17 = vsub.f32 %v320_v9, %v321_v12  ;;  %v333_v22 = vsub.f32 %v331_v10, %v332_v15  ;;  %s6348_s16 = sshll.u32 %s6410_s22, 4  ;;  %s6349_s16 = int_to_ptr.vmem [resolvable:$false] %s6348_s16 }
  0x1e   : > { %9236 = vst [vmem:[#allocation5_spill] sm:$0xff] %v6511_v13  ;;  %v250_v18 = vsel %vm247_vm1, %v6511_v13, 0  ;;  %s6350_s17 = scalar_lea.vmem %s6349_s16, 256  ;;  %p6351_p0 = scmp.lt.s32.totalorder %s8959_s10, %s6349_s16 }
  0x1f   : > { %v252_v19 = vand.u32 4294901760, %v250_v18  ;;  %v348_v20 = vsub.f32 %v248_v14, %v254_v16  ;;  %v323_v21 = vand.u32 4294901760, %v322_v17  ;;  %v334_v25 = vand.u32 4294901760, %v333_v22 }
  0x21   : > { %253 = vmatprep.subr.mxu0 %v252_v19  ;;  %v342_v23 = vsub.f32 %v250_v18, %v252_v19  ;;  %v349_v24 = vand.u32 4294901760, %v348_v20 }
  0x22   : > { %255 = vmatpush1.msra.mxu0 %v254_v16 }
  0x23   : > { %324 = vmatmul.mubr.f32.vlgmr.msra.gmra.mrb[0].mxu0 %v323_v21  ;;  %v343_v26 = vand.u32 4294901760, %v342_v23  ;;  %v350_v27 = vsub.f32 %v348_v20, %v349_v24 }
  0x24   : > { %329 = vmatprep.mubr.f32.mxu0 %v9027_v1 }
  0x25   : > { %v344_v28 = vsub.f32 %v342_v23, %v343_v26  ;;  %v351_v29 = vand.u32 4294901760, %v350_v27 }
  0x27   : > { %335 = vmatmul.mubr.f32.gmra.mrb[2].mxu0 %v334_v25  ;;  %v345_v30 = vand.u32 4294901760, %v344_v28 }
  0x28   : > { %415 = vmatprep.mubr.f32.mxu0 %v9027_v1 }
  0x29   : > { %346 = vmatprep.subr.mxu0 %v345_v30 }
  0x2a   : > { %352 = vmatpush1.msra.mxu0 %v351_v29 }
  0x2b   : > { %417 = vmatmul.mubr.f32.vlgmr.msra.gmra.mrb[0].mxu0 %v319_v6  ;;  %432 = vmatprep.subr.mxu0 %v342_v23 }
  0x2c   : > { %422 = vmatprep.mubr.f32.mxu0 %v9027_v1  ;;  %435 = vmatpush1.msra.mxu0 %v348_v20 }
  0x2d   : > { %516 = vmatprep.subr.mxu0 %v252_v19 }
  0x2f   : > { %424 = vmatmul.mubr.f32.gmra.mrb[2].mxu0 %v330_v8 }
  0x30   : > { %498 = vmatprep.mubr.f32.mxu0 %v9027_v1 }
  0x33   : > { %501 = vmatmul.mubr.f32.vlgmr.msra.gmra.mrb[0].mxu0 %v320_v9 }
  0x34   : > { %506 = vmatprep.mubr.f32.mxu0 %v9027_v1  ;;  %518 = vmatpush1.msra.mxu0 %v254_v16 }
  0x35   : > { %603 = vmatprep.subr.mxu0 %v343_v26 }
  0x37   : > { %509 = vmatmul.mubr.f32.gmra.mrb[2].mxu0 %v331_v10 }
  0x38   : > { %581 = vmatprep.mubr.f32.mxu0 %v9027_v1 }
  0x3b   : > { %585 = vmatmul.mubr.f32.vlgmr.msra.gmra.mrb[0].mxu0 %v321_v12 }
  0x3c   : > { %590 = vmatprep.mubr.f32.mxu0 %v9027_v1  ;;  %607 = vmatpush1.msra.mxu0 %v349_v24 }
  0x3d   : > { %686 = vmatprep.subr.mxu0 %v252_v19 }
  0x3f   : > { %594 = vmatmul.mubr.f32.gmra.mrb[2].mxu0 %v332_v15 }
  0x40   : > { %670 = vmatprep.mubr.f32.mxu0 %v9027_v1 }
  0x43   : > { %672 = vmatmul.mubr.f32.vlgmr.msra.gmra.mrb[0].mxu0 %v319_v6 }
  0x44   : > { %677 = vmatprep.mubr.f32.mxu0 %v9027_v1  ;;  %688 = vmatpush1.msra.mxu0 %v254_v16 }
  0x47   : > { %679 = vmatmul.mubr.f32.gmra.mrb[2].mxu0 %v330_v8 }
  0x48   : > { %751 = vmatprep.mubr.f32.mxu0 %v9027_v1 }
  0x4b   : > { %753 = vmatmul.mubr.f32.vlgmr.msra.gmra.mrb[0].mxu0 %v319_v6 }
  0x4c   : > { %758 = vmatprep.mubr.f32.mxu0 %v9027_v1 }
  0x4f   : > { %760 = vmatmul.mubr.f32.gmra.mrb[2].mxu0 %v330_v8 }
  0x50   : > { %1003 = vmatprep.mubr.f32.mxu0 %v9027_v1 }
  0x97   : > { %v231_v31 = vpop.permute.xlu0 %230 }
 0x11e   : > { %v754_v32 = vpop.f32.mrb[0].mxu0 }
 0x11f   : > { %v5741_v33 = vadd.f32 %v754_v32, %v231_v31  ;;  %v756_v34 = vpop.f32.mrb[1].mxu0 }
 0x120   : > { %v5742_v35 = vadd.f32 %v756_v34, %v231_v31 }
 0x121   : > { %v769_v36 = vrot.slane %v5741_v33, 4  ;;  %v933_v37 = vsel %vm247_vm1, %v5741_v33, 0 }
 0x122   : > { %v6529_v38 = vand.u32 4294901760, %v933_v37  ;;  %v935_v39 = vsel %vm247_vm1, %v5742_v35, 0  ;;  %v6532_v40 = vpop.f32.mrb[2].mxu0  ;;  %v770_v41 = vrot.slane %v5742_v35, 4 }
 0x123   : > { %9237 = vst [vmem:[#allocation6_spill] sm:$0xff] %v6532_v40  ;;  %v6534_v42 = vand.u32 4294901760, %v935_v39  ;;  %v6536_v43 = vpop.f32.mrb[3].mxu0  ;;  %773 = vxpose.xlu0.b32.start.end [1/1] (short) %v769_v36, 128 }
 0x124   : > { %9238 = vst [vmem:[#allocation7_spill] sm:$0xff] %v6536_v43  ;;  %v6539_v44 = vsub.f32 %v933_v37, %v6529_v38  ;;  %805 = vxpose.xlu1.b32.start.end [1/1] (short) %v770_v41, 128  ;;  %v9247_v43 = vmov 0.0  }
 0x125   : > { %v6542_v45 = vsub.f32 %v935_v39, %v6534_v42  ;;  %938 = vmatprep.subr.mxu0 %v6534_v42 }
 0x126   : > { %940 = vmatpush1.msra.mxu0 %v6529_v38  ;;  %v9021_v46 = vand.u32 4294901760, %v6539_v44 }
 0x127   : > { %v9024_v47 = vand.u32 4294901760, %v6542_v45 }
 0x128   : > { %v1365_v48 = vsub.f32 %v6539_v44, %v9021_v46 }
 0x129   : > { %v1359_v49 = vsub.f32 %v6542_v45, %v9024_v47 }
 0x12a   : > { %v1366_v51 = vand.u32 4294901760, %v1365_v48 }
 0x12b   : > { %v1360_v50 = vand.u32 4294901760, %v1359_v49 }
 0x12d   : > { %1361 = vmatprep.subr.mxu1 %v1360_v50 }
 0x12e   : > { %1367 = vmatpush1.msra.mxu1 %v1366_v51 }
 0x12f   : > { %1657 = vmatprep.subr.mxu1 %v6542_v45 }
 0x142   : > { %6149 = vset.pattern.permute.xlu1 %v6409_v4 }
 0x1a3   : > { %v789_v52 = vpop.trf.xlu0 }
 0x1a4   : > { %v838_v53 = vsel %vm240_vm0, %v789_v52, 0  ;;  %v6621_v26 = vpop.trf.xlu1 }
 0x1a5   : > { %v6557_v54 = vand.u32 4294901760, %v838_v53 }
 0x1a7   : > { %v6560_v55 = vsub.f32 %v838_v53, %v6557_v54  ;;  %1432 = vmatmul.mubr.f32.vlgmr.msra.gmra.mrb[0].mxu1 %v6557_v54  ;;  %v790_v56 = vpop.trf.xlu0 }
 0x1a8   : > { %1660 = vmatpush1.msra.mxu1 %v6539_v44  ;;  %v841_v57 = vsel %vm240_vm0, %v790_v56, 0  ;;  %1437 = vmatprep.mubr.f32.mxu1 %v9027_v1  ;;  %v6643_v37 = vpop.trf.xlu1 }
 0x1a9   : > { %v9023_v58 = vand.u32 4294901760, %v6560_v55  ;;  %v6567_v59 = vand.u32 4294901760, %v841_v57  ;;  %1981 = vmatprep.subr.mxu1 %v6534_v42 }
 0x1ab   : > { %v1007_v60 = vsub.f32 %v6560_v55, %v9023_v58  ;;  %v6574_v61 = vsub.f32 %v841_v57, %v6567_v59  ;;  %1439 = vmatmul.mubr.f32.gmra.mrb[2].mxu1 %v6567_v59  ;;  %v791_v62 = vpop.trf.xlu0 }
 0x1ac   : > { %v844_v63 = vsel %vm240_vm0, %v791_v62, 0  ;;  %1444 = vmatprep.mubr.f32.mxu1 %v9027_v1  ;;  %v6664_v62 = vpop.trf.xlu1 }
 0x1ad   : > { %v1008_v0 = vand.u32 4294901760, %v1007_v60  ;;  %v9019_v2 = vand.u32 4294901760, %v6574_v61  ;;  %v6580_v3 = vand.u32 4294901760, %v844_v63 }
 0x1af   : > { %v6583_v4 = vsub.f32 %v844_v63, %v6580_v3  ;;  %1009 = vmatmul.mubr.f32.vlgmr.msra.gmra.mrb[4].mxu0 %v1008_v0  ;;  %1446 = vmatmul.mubr.f32.gmra.mrb[4].mxu1 %v6580_v3  ;;  %v792_v5 = vpop.trf.xlu0  ;;  %v1018_v6 = vsub.f32 %v6574_v61, %v9019_v2 }
 0x1b0   : > { %v847_v7 = vsel %vm240_vm0, %v792_v5, 0  ;;  %1014 = vmatprep.mubr.f32.mxu0 %v9027_v1  ;;  %1451 = vmatprep.mubr.f32.mxu1 %v9027_v1 }
 0x1b1   : > { %v9017_v8 = vand.u32 4294901760, %v6583_v4  ;;  %v6593_v9 = vand.u32 4294901760, %v847_v7  ;;  %v1019_v10 = vand.u32 4294901760, %v1018_v6 }
 0x1b3   : > { %v6596_v11 = vsub.f32 %v847_v7, %v6593_v9  ;;  %1020 = vmatmul.mubr.f32.gmra.mrb[6].mxu0 %v1019_v10  ;;  %1453 = vmatmul.mubr.f32.gmra.mrb[6].mxu1 %v6593_v9  ;;  %v793_v12 = vpop.trf.xlu0  ;;  %v1029_v14 = vsub.f32 %v6583_v4, %v9017_v8 }
 0x1b4   : > { %v850_v15 = vsel %vm240_vm0, %v793_v12, 0  ;;  %1025 = vmatprep.mubr.f32.mxu0 %v9027_v1  ;;  %1458 = vmatprep.mubr.f32.mxu1 %v9027_v1 }
 0x1b5   : > { %v9016_v16 = vand.u32 4294901760, %v6596_v11  ;;  %v6606_v17 = vand.u32 4294901760, %v850_v15  ;;  %v1030_v18 = vand.u32 4294901760, %v1029_v14 }
 0x1b7   : > { %v6609_v19 = vsub.f32 %v850_v15, %v6606_v17  ;;  %1031 = vmatmul.mubr.f32.gmra.mrb[8].mxu0 %v1030_v18  ;;  %1460 = vmatmul.mubr.f32.gmra.mrb[8].mxu1 %v6606_v17  ;;  %v794_v20 = vpop.trf.xlu0  ;;  %v1040_v21 = vsub.f32 %v6596_v11, %v9016_v16 }
 0x1b8   : > { %v853_v22 = vsel %vm240_vm0, %v794_v20, 0  ;;  %1036 = vmatprep.mubr.f32.mxu0 %v9027_v1  ;;  %1465 = vmatprep.mubr.f32.mxu1 %v9027_v1  ;;  %v6686_v20 = vpop.trf.xlu1 }
 0x1b9   : > { %v9014_v23 = vand.u32 4294901760, %v6609_v19  ;;  %v6619_v24 = vand.u32 4294901760, %v853_v22  ;;  %v1041_v25 = vand.u32 4294901760, %v1040_v21 }
 0x1bb   : > { %v6624_v27 = vsub.f32 %v853_v22, %v6619_v24  ;;  %1042 = vmatmul.mubr.f32.gmra.mrb[10].mxu0 %v1041_v25  ;;  %1467 = vmatmul.mubr.f32.gmra.mrb[10].mxu1 %v6619_v24  ;;  %v795_v28 = vpop.trf.xlu0  ;;  %v1051_v29 = vsub.f32 %v6609_v19, %v9014_v23  ;;  %v895_v23 = vsel %vm240_vm0, %v6686_v20, 0 }
 0x1bc   : > { %v856_v30 = vsel %vm240_vm0, %v795_v28, 0  ;;  %1047 = vmatprep.mubr.f32.mxu0 %v9027_v1  ;;  %1472 = vmatprep.mubr.f32.mxu1 %v9027_v1  ;;  %v6804_v16 = vand.u32 4294901760, %v895_v23 }
 0x1bd   : > { %v9013_v31 = vand.u32 4294901760, %v6624_v27  ;;  %v6634_v32 = vand.u32 4294901760, %v856_v30  ;;  %v1052_v33 = vand.u32 4294901760, %v1051_v29 }
 0x1be   : > { %9243 = vst [vmem:[#allocation12_spill] sm:$0xff] %v6804_v16  ;;  %v6819_v2 = vsub.f32 %v895_v23, %v6804_v16 }
 0x1bf   : > { %v6637_v34 = vsub.f32 %v856_v30, %v6634_v32  ;;  %1053 = vmatmul.mubr.f32.gmra.mrb[12].mxu0 %v1052_v33  ;;  %1474 = vmatmul.mubr.f32.gmra.mrb[12].mxu1 %v6634_v32  ;;  %v796_v35 = vpop.trf.xlu0  ;;  %v1062_v36 = vsub.f32 %v6624_v27, %v9013_v31 }
 0x1c0   : > { %v859_v39 = vsel %vm240_vm0, %v796_v35, 0  ;;  %1058 = vmatprep.mubr.f32.mxu0 %v9027_v1  ;;  %1479 = vmatprep.mubr.f32.mxu1 %v9027_v1 }
 0x1c1   : > { %v9011_v41 = vand.u32 4294901760, %v6637_v34  ;;  %v6649_v48 = vand.u32 4294901760, %v859_v39  ;;  %v1063_v49 = vand.u32 4294901760, %v1062_v36 }
 0x1c3   : > { %v6652_v50 = vsub.f32 %v859_v39, %v6649_v48  ;;  %1064 = vmatmul.mubr.f32.gmra.mrb[14].mxu0 %v1063_v49  ;;  %1481 = vmatmul.mubr.f32.gmra.mrb[14].mxu1 %v6649_v48  ;;  %v797_v51 = vpop.trf.xlu0  ;;  %v1073_v52 = vsub.f32 %v6637_v34, %v9011_v41  ;;  %v892_v41 = vsel %vm240_vm0, %v6664_v62, 0 }
 0x1c4   : > { %v862_v53 = vsel %vm240_vm0, %v797_v51, 0  ;;  %1069 = vmatprep.mubr.f32.mxu0 %v9027_v1  ;;  %1486 = vmatprep.mubr.f32.mxu1 %v9027_v1  ;;  %v6707_v51 = vpop.trf.xlu1 }
 0x1c5   : > { %v9010_v56 = vand.u32 4294901760, %v6652_v50  ;;  %v6662_v57 = vand.u32 4294901760, %v862_v53  ;;  %v1074_v60 = vand.u32 4294901760, %v1073_v52 }
 0x1c7   : > { %v6667_v63 = vsub.f32 %v862_v53, %v6662_v57  ;;  %1075 = vmatmul.mubr.f32.gmra.mrb[16].mxu0 %v1074_v60  ;;  %1488 = vmatmul.mubr.f32.gmra.mrb[16].mxu1 %v6662_v57  ;;  %v798_v0 = vpop.trf.xlu0  ;;  %v1084_v5 = vsub.f32 %v6652_v50, %v9010_v56 }
 0x1c8   : > { %v865_v6 = vsel %vm240_vm0, %v798_v0, 0  ;;  %1080 = vmatprep.mubr.f32.mxu0 %v9027_v1  ;;  %1493 = vmatprep.mubr.f32.mxu1 %v9027_v1 }
 0x1c9   : > { %v9009_v7 = vand.u32 4294901760, %v6667_v63  ;;  %v6677_v10 = vand.u32 4294901760, %v865_v6  ;;  %v1085_v12 = vand.u32 4294901760, %v1084_v5 }
 0x1cb   : > { %v6680_v14 = vsub.f32 %v865_v6, %v6677_v10  ;;  %1086 = vmatmul.mubr.f32.gmra.mrb[18].mxu0 %v1085_v12  ;;  %1495 = vmatmul.mubr.f32.gmra.mrb[18].mxu1 %v6677_v10  ;;  %v799_v15 = vpop.trf.xlu0  ;;  %v1095_v18 = vsub.f32 %v6667_v63, %v9009_v7 }
 0x1cc   : > { %v868_v21 = vsel %vm240_vm0, %v799_v15, 0  ;;  %1091 = vmatprep.mubr.f32.mxu0 %v9027_v1  ;;  %1500 = vmatprep.mubr.f32.mxu1 %v9027_v1 }
 0x1cd   : > { %v9007_v22 = vand.u32 4294901760, %v6680_v14  ;;  %v6692_v25 = vand.u32 4294901760, %v868_v21  ;;  %v1096_v28 = vand.u32 4294901760, %v1095_v18 }
 0x1cf   : > { %v6695_v29 = vsub.f32 %v868_v21, %v6692_v25  ;;  %1097 = vmatmul.mubr.f32.gmra.mrb[20].mxu0 %v1096_v28  ;;  %1502 = vmatmul.mubr.f32.gmra.mrb[20].mxu1 %v6692_v25  ;;  %v800_v30 = vpop.trf.xlu0  ;;  %v1106_v33 = vsub.f32 %v6680_v14, %v9007_v22  ;;  %v6729_v28 = vpop.trf.xlu1 }
 0x1d0   : > { %v871_v35 = vsel %vm240_vm0, %v800_v30, 0  ;;  %1102 = vmatprep.mubr.f32.mxu0 %v9027_v1  ;;  %1507 = vmatprep.mubr.f32.mxu1 %v9027_v1 }
 0x1d1   : > { %v9006_v36 = vand.u32 4294901760, %v6695_v29  ;;  %v6705_v39 = vand.u32 4294901760, %v871_v35  ;;  %v1107_v49 = vand.u32 4294901760, %v1106_v33 }
 0x1d3   : > { %v6710_v52 = vsub.f32 %v871_v35, %v6705_v39  ;;  %1108 = vmatmul.mubr.f32.gmra.mrb[22].mxu0 %v1107_v49  ;;  %1509 = vmatmul.mubr.f32.gmra.mrb[22].mxu1 %v6705_v39  ;;  %v801_v53 = vpop.trf.xlu0  ;;  %v1117_v60 = vsub.f32 %v6695_v29, %v9006_v36  ;;  %v827_v36 = vpop.trf.xlu1 }
 0x1d4   : > { %v874_v0 = vsel %vm240_vm0, %v801_v53, 0  ;;  %1113 = vmatprep.mubr.f32.mxu0 %v9027_v1  ;;  %1514 = vmatprep.mubr.f32.mxu1 %v9027_v1  ;;  %v886_v53 = vsel %vm240_vm0, %v6621_v26, 0 }
 0x1d5   : > { %v9005_v5 = vand.u32 4294901760, %v6710_v52  ;;  %v6720_v6 = vand.u32 4294901760, %v874_v0  ;;  %v1118_v12 = vand.u32 4294901760, %v1117_v60 }
 0x1d7   : > { %v6723_v15 = vsub.f32 %v874_v0, %v6720_v6  ;;  %1119 = vmatmul.mubr.f32.gmra.mrb[24].mxu0 %v1118_v12  ;;  %1516 = vmatmul.mubr.f32.gmra.mrb[24].mxu1 %v6720_v6  ;;  %v802_v18 = vpop.trf.xlu0  ;;  %v1128_v21 = vsub.f32 %v6710_v52, %v9005_v5  ;;  %v889_v5 = vsel %vm240_vm0, %v6643_v37, 0 }
 0x1d8   : > { %v877_v30 = vsel %vm240_vm0, %v802_v18, 0  ;;  %1124 = vmatprep.mubr.f32.mxu0 %v9027_v1  ;;  %1521 = vmatprep.mubr.f32.mxu1 %v9027_v1  ;;  %v6769_v37 = vand.u32 4294901760, %v889_v5 }
 0x1d9   : > { %v9008_v33 = vand.u32 4294901760, %v6723_v15  ;;  %v6735_v35 = vand.u32 4294901760, %v877_v30  ;;  %v1129_v49 = vand.u32 4294901760, %v1128_v21  ;;  %v6749_v21 = vand.u32 4294901760, %v886_v53 }
 0x1da   : > { %9240 = vst [vmem:[#allocation9_spill] sm:$0xff] %v6769_v37  ;;  %v6784_v31 = vsub.f32 %v889_v5, %v6769_v37 }
 0x1db   : > { %v6740_v60 = vsub.f32 %v877_v30, %v6735_v35  ;;  %1130 = vmatmul.mubr.f32.gmra.mrb[26].mxu0 %v1129_v49  ;;  %1523 = vmatmul.mubr.f32.gmra.mrb[26].mxu1 %v6735_v35  ;;  %v803_v0 = vpop.trf.xlu0  ;;  %v1139_v12 = vsub.f32 %v6723_v15, %v9008_v33  ;;  %9239 = vst [vmem:[#allocation8_spill] sm:$0xff] %v6749_v21 }
 0x1dc   : > { %v880_v18 = vsel %vm240_vm0, %v803_v0, 0  ;;  %1135 = vmatprep.mubr.f32.mxu0 %v9027_v1  ;;  %1528 = vmatprep.mubr.f32.mxu1 %v9027_v1  ;;  %v6764_v7 = vsub.f32 %v886_v53, %v6749_v21 }
 0x1dd   : > { %v9012_v26 = vand.u32 4294901760, %v6740_v60  ;;  %v6752_v30 = vand.u32 4294901760, %v880_v18  ;;  %v1140_v49 = vand.u32 4294901760, %v1139_v12 }
 0x1df   : > { %v6757_v22 = vsub.f32 %v880_v18, %v6752_v30  ;;  %1141 = vmatmul.mubr.f32.gmra.mrb[28].mxu0 %v1140_v49  ;;  %1530 = vmatmul.mubr.f32.gmra.mrb[28].mxu1 %v6752_v30  ;;  %v804_v0 = vpop.trf.xlu0  ;;  %v1150_v33 = vsub.f32 %v6740_v60, %v9012_v26 }
 0x1e0   : > { %v883_v12 = vsel %vm240_vm0, %v804_v0, 0  ;;  %1146 = vmatprep.mubr.f32.mxu0 %v9027_v1  ;;  %1535 = vmatprep.mubr.f32.mxu1 %v9027_v1  ;;  %v828_v0 = vpop.trf.xlu1 }
 0x1e1   : > { %v9015_v18 = vand.u32 4294901760, %v6757_v22  ;;  %v6772_v49 = vand.u32 4294901760, %v883_v12  ;;  %v1151_v56 = vand.u32 4294901760, %v1150_v33  ;;  %v6788_v33 = vand.u32 4294901760, %v892_v41 }
 0x1e2   : > { %v907_v13 = vsel %vm240_vm0, %v828_v0, 0 }
 0x1e3   : > { %9241 = vst [vmem:[#allocation10_spill] sm:$0xff] %v6772_v49  ;;  %v6777_v26 = vsub.f32 %v883_v12, %v6772_v49  ;;  %1152 = vmatmul.mubr.f32.gmra.mrb[30].mxu0 %v1151_v56  ;;  %1537 = vmatmul.mubr.f32.gmra.mrb[30].mxu1 %v6772_v49  ;;  %v1161_v53 = vsub.f32 %v6757_v22, %v9015_v18  ;;  %9242 = vst [vmem:[#allocation11_spill] sm:$0xff] %v6788_v33  ;;  %v9020_v56 = vand.u32 4294901760, %v6764_v7 }
 0x1e4   : > { %1157 = vmatprep.mubr.f32.mxu0 %v9027_v1  ;;  %1542 = vmatprep.mubr.f32.mxu1 %v9027_v1  ;;  %v6799_v18 = vsub.f32 %v892_v41, %v6788_v33 }
 0x1e5   : > { %v9018_v62 = vand.u32 4294901760, %v6777_v26  ;;  %v1162_v12 = vand.u32 4294901760, %v1161_v53  ;;  %v9022_v53 = vand.u32 4294901760, %v6784_v31  ;;  %v1183_v20 = vsub.f32 %v6764_v7, %v9020_v56 }
 0x1e7   : > { %1163 = vmatmul.mubr.f32.gmra.mrb[32].mxu0 %v1162_v12  ;;  %1544 = vmatmul.mubr.f32.gmra.mrb[32].mxu1 %v6749_v21  ;;  %v1172_v5 = vsub.f32 %v6777_v26, %v9018_v62  ;;  %v829_v12 = vpop.trf.xlu1  ;;  %v898_v62 = vsel %vm240_vm0, %v6707_v51, 0  ;;  %v1194_v41 = vsub.f32 %v6784_v31, %v9022_v53  ;;  %v1184_v46 = vand.u32 4294901760, %v1183_v20 }
 0x1e8   : > { %1168 = vmatprep.mubr.f32.mxu0 %v9027_v1  ;;  %1549 = vmatprep.mubr.f32.mxu1 %v9027_v1  ;;  %v6821_v56 = vand.u32 4294901760, %v898_v62 }
 0x1e9   : > { %v1173_v8 = vand.u32 4294901760, %v1172_v5  ;;  %v9025_v5 = vand.u32 4294901760, %v6799_v18  ;;  %v1195_v53 = vand.u32 4294901760, %v1194_v41 }
 0x1ea   : > { %9244 = vst [vmem:[#allocation13_spill] sm:$0xff] %v6821_v56  ;;  %v6832_v58 = vsub.f32 %v898_v62, %v6821_v56 }
 0x1eb   : > { %1174 = vmatmul.mubr.f32.gmra.mrb[34].mxu0 %v1173_v8  ;;  %1551 = vmatmul.mubr.f32.gmra.mrb[34].mxu1 %v6769_v37  ;;  %v901_v8 = vsel %vm240_vm0, %v6729_v28, 0  ;;  %v830_v51 = vpop.trf.xlu1  ;;  %v1205_v23 = vsub.f32 %v6799_v18, %v9025_v5  ;;  %v904_v28 = vsel %vm240_vm0, %v827_v36, 0 }
 0x1ec   : > { %1179 = vmatprep.mubr.f32.mxu0 %v9027_v1  ;;  %1556 = vmatprep.mubr.f32.mxu1 %v9027_v1  ;;  %v6834_v20 = vand.u32 4294901760, %v901_v8  ;;  %v6841_v41 = vand.u32 4294901760, %v904_v28  ;;  %v9032_v5 = vand.u32 4294901760, %v6832_v58 }
 0x1ed   : > { %v1206_v47 = vand.u32 4294901760, %v1205_v23  ;;  %v6857_v23 = vand.u32 4294901760, %v907_v13 }
 0x1ee   : > { %9245 = vst [vmem:[#allocation14_spill] sm:$0xff] %v6834_v20  ;;  %9246 = vst [vmem:[#allocation15_spill] sm:$0xff] %v6841_v41  ;;  %v6845_v62 = vsub.f32 %v901_v8, %v6834_v20 }
 0x1ef   : > { %1185 = vmatmul.mubr.f32.gmra.mrb[36].mxu0 %v1184_v46  ;;  %1558 = vmatmul.mubr.f32.gmra.mrb[36].mxu1 %v6788_v33  ;;  %v9029_v46 = vand.u32 4294901760, %v6819_v2  ;;  %9248 = vst [vmem:[#allocation16_spill] sm:$0xff] %v6857_v23 }
 0x1f0   : > { %1190 = vmatprep.mubr.f32.mxu0 %v9027_v1  ;;  %1563 = vmatprep.mubr.f32.mxu1 %v9027_v1 }
 0x1f1   : > { %v1216_v36 = vsub.f32 %v6819_v2, %v9029_v46  ;;  %v1227_v46 = vsub.f32 %v6832_v58, %v9032_v5  ;;  %v9250_v5 = vand.u32 4294901760, %v6845_v62 }
 0x1f3   : > { %1196 = vmatmul.mubr.f32.gmra.mrb[38].mxu0 %v1195_v53  ;;  %1565 = vmatmul.mubr.f32.gmra.mrb[38].mxu1 %v6804_v16  ;;  %v831_v53 = vpop.trf.xlu1  ;;  %v1217_v0 = vand.u32 4294901760, %v1216_v36  ;;  %v1228_v8 = vand.u32 4294901760, %v1227_v46 }
 0x1f4   : > { %1201 = vmatprep.mubr.f32.mxu0 %v9027_v1  ;;  %1570 = vmatprep.mubr.f32.mxu1 %v9027_v1  ;;  %v6853_v1 = vsub.f32 %v904_v28, %v6841_v41 }
 0x1f7   : > { %1207 = vmatmul.mubr.f32.gmra.mrb[40].mxu0 %v1206_v47  ;;  %1572 = vmatmul.mubr.f32.gmra.mrb[40].mxu1 %v6821_v56  ;;  %v910_v47 = vsel %vm240_vm0, %v829_v12, 0  ;;  %v832_v28 = vpop.trf.xlu1  ;;  %v6867_v56 = vsub.f32 %v907_v13, %v6857_v23  ;;  %v1238_v12 = vsub.f32 %v6845_v62, %v9250_v5  ;;  %v9251_v13 = vand.u32 4294901760, %v6853_v1 }
 0x1f8   : > { %1212 = vmatprep.mubr.f32.mxu0 %v9247_v43  ;;  %1577 = vmatprep.mubr.f32.mxu1 %v9247_v43  ;;  %v6871_v36 = vand.u32 4294901760, %v910_v47 }
 0x1f9   : > { %v1239_v5 = vand.u32 4294901760, %v1238_v12 }
 0x1fa   : > { %9249 = vst [vmem:[#allocation17_spill] sm:$0xff] %v6871_v36  ;;  %v6885_v46 = vsub.f32 %v910_v47, %v6871_v36 }
 0x1fb   : > { %1218 = vmatmul.mubr.f32.gmra.mrb[42].mxu0 %v1217_v0  ;;  %1579 = vmatmul.mubr.f32.gmra.mrb[42].mxu1 %v6834_v20  ;;  %v913_v0 = vsel %vm240_vm0, %v830_v51, 0  ;;  %v1249_v20 = vsub.f32 %v6853_v1, %v9251_v13  ;;  %v833_v51 = vpop.trf.xlu1 }
 0x1fc   : > { %1223 = vmatprep.mubr.f32.mxu0 %v9247_v43  ;;  %1584 = vmatprep.mubr.f32.mxu1 %v9247_v43  ;;  %v6887_v16 = vand.u32 4294901760, %v913_v0 }
 0x1fd   : > { %v1250_v40 = vand.u32 4294901760, %v1249_v20 }
 0x1fe   : > { %9252 = vst [vmem:[#allocation18_spill] sm:$0xff] %v6887_v16  ;;  %v6898_v33 = vsub.f32 %v913_v0, %v6887_v16 }
 0x1ff   : > { %1229 = vmatmul.mubr.f32.gmra.mrb[44].mxu0 %v1228_v8  ;;  %1586 = vmatmul.mubr.f32.gmra.mrb[44].mxu1 %v6841_v41  ;;  %v916_v8 = vsel %vm240_vm0, %v831_v53, 0  ;;  %v9253_v41 = vand.u32 4294901760, %v6867_v56  ;;  %v919_v53 = vsel %vm240_vm0, %v832_v28, 0 }
 0x200   : > { %1234 = vmatprep.mubr.f32.mxu0 %v9247_v43  ;;  %1591 = vmatprep.mubr.f32.mxu1 %v9247_v43  ;;  %v6900_v12 = vand.u32 4294901760, %v916_v8  ;;  %v6906_v20 = vand.u32 4294901760, %v919_v53  ;;  %v9257_v37 = vand.u32 4294901760, %v6898_v33 }
 0x201   : > { %v1260_v13 = vsub.f32 %v6867_v56, %v9253_v41 }
 0x202   : > { %9254 = vst [vmem:[#allocation19_spill] sm:$0xff] %v6900_v12  ;;  %9255 = vst [vmem:[#allocation20_spill] sm:$0xff] %v6906_v20  ;;  %v6910_v47 = vsub.f32 %v916_v8, %v6900_v12 }
 0x203   : > { %1240 = vmatmul.mubr.f32.gmra.mrb[46].mxu0 %v1239_v5  ;;  %1593 = vmatmul.mubr.f32.gmra.mrb[46].mxu1 %v6857_v23  ;;  %v834_v5 = vpop.trf.xlu1  ;;  %v1261_v0 = vand.u32 4294901760, %v1260_v13  ;;  %v9256_v23 = vand.u32 4294901760, %v6885_v46 }
 0x204   : > { %1245 = vmatprep.mubr.f32.mxu0 %v9247_v43  ;;  %1598 = vmatprep.mubr.f32.mxu1 %v9247_v43 }
 0x205   : > { %v1271_v28 = vsub.f32 %v6885_v46, %v9256_v23  ;;  %v1282_v23 = vsub.f32 %v6898_v33, %v9257_v37  ;;  %v9258_v37 = vand.u32 4294901760, %v6910_v47 }
 0x207   : > { %1251 = vmatmul.mubr.f32.gmra.mrb[48].mxu0 %v1250_v40  ;;  %1600 = vmatmul.mubr.f32.gmra.mrb[48].mxu1 %v6871_v36  ;;  %v922_v40 = vsel %vm240_vm0, %v833_v51, 0  ;;  %v6918_v36 = vsub.f32 %v919_v53, %v6906_v20  ;;  %v1272_v13 = vand.u32 4294901760, %v1271_v28  ;;  %v835_v51 = vpop.trf.xlu1  ;;  %v1293_v21 = vsub.f32 %v6910_v47, %v9258_v37 }
 0x208   : > { %1256 = vmatprep.mubr.f32.mxu0 %v9247_v43  ;;  %1605 = vmatprep.mubr.f32.mxu1 %v9247_v43  ;;  %v6923_v41 = vand.u32 4294901760, %v922_v40 }
 0x209   : > { %v9055_v53 = vand.u32 4294901760, %v6918_v36 }
 0x20a   : > { %v6934_v8 = vsub.f32 %v922_v40, %v6923_v41 }
 0x20b   : > { %1262 = vmatmul.mubr.f32.gmra.mrb[50].mxu0 %v1261_v0  ;;  %1607 = vmatmul.mubr.f32.gmra.mrb[50].mxu1 %v6887_v16  ;;  %v925_v0 = vsel %vm240_vm0, %v834_v5, 0  ;;  %v1283_v16 = vand.u32 4294901760, %v1282_v23  ;;  %v928_v5 = vsel %vm240_vm0, %v835_v51, 0  ;;  %v1304_v40 = vsub.f32 %v6918_v36, %v9055_v53 }
 0x20c   : > { %1267 = vmatprep.mubr.f32.mxu0 %v9247_v43  ;;  %1612 = vmatprep.mubr.f32.mxu1 %v9247_v43  ;;  %v6936_v28 = vand.u32 4294901760, %v925_v0  ;;  %v6952_v37 = vand.u32 4294901760, %v928_v5  ;;  %v1294_v51 = vand.u32 4294901760, %v1293_v21  ;;  %v9259_v49 = vand.u32 4294901760, %v6934_v8 }
 0x20e   : > { %v6960_v23 = vsub.f32 %v928_v5, %v6952_v37  ;;  %v1315_v21 = vsub.f32 %v6934_v8, %v9259_v49 }
 0x20f   : > { %1273 = vmatmul.mubr.f32.gmra.mrb[52].mxu0 %v1272_v13  ;;  %1614 = vmatmul.mubr.f32.gmra.mrb[52].mxu1 %v6900_v12  ;;  %v836_v13 = vpop.trf.xlu1  ;;  %v6950_v12 = vsub.f32 %v925_v0, %v6936_v28 }
 0x210   : > { %1278 = vmatprep.mubr.f32.mxu0 %v9247_v43  ;;  %1619 = vmatprep.mubr.f32.mxu1 %v9247_v43  ;;  %v1316_v5 = vand.u32 4294901760, %v1315_v21 }
 0x211   : > { %v9060_v53 = vand.u32 4294901760, %v6950_v12 }
 0x213   : > { %1284 = vmatmul.mubr.f32.gmra.mrb[54].mxu0 %v1283_v16  ;;  %1621 = vmatmul.mubr.f32.gmra.mrb[54].mxu1 %v6906_v20  ;;  %v931_v16 = vsel %vm240_vm0, %v836_v13, 0  ;;  %v1305_v20 = vand.u32 4294901760, %v1304_v40  ;;  %v9059_v13 = vand.u32 4294901760, %v6960_v23 }
 0x214   : > { %1289 = vmatprep.mubr.f32.mxu0 %v9247_v43  ;;  %1626 = vmatprep.mubr.f32.mxu1 %v9247_v43  ;;  %v6962_v0 = vand.u32 4294901760, %v931_v16 }
 0x216   : > { %v6972_v40 = vsub.f32 %v931_v16, %v6962_v0  ;;  %v1337_v16 = vsub.f32 %v6960_v23, %v9059_v13 }
 0x217   : > { %1295 = vmatmul.mubr.f32.gmra.mrb[56].mxu0 %v1294_v51  ;;  %1628 = vmatmul.mubr.f32.gmra.mrb[56].mxu1 %v6923_v41  ;;  %v1326_v51 = vsub.f32 %v6950_v12, %v9060_v53 }
 0x218   : > { %1300 = vmatprep.mubr.f32.mxu0 %v9247_v43  ;;  %1633 = vmatprep.mubr.f32.mxu1 %v9247_v43  ;;  %v9058_v49 = vand.u32 4294901760, %v6972_v40  ;;  %v1338_v21 = vand.u32 4294901760, %v1337_v16 }
 0x21b   : > { %1306 = vmatmul.mubr.f32.gmra.mrb[58].mxu0 %v1305_v20  ;;  %1635 = vmatmul.mubr.f32.gmra.mrb[58].mxu1 %v6936_v28  ;;  %v1327_v20 = vand.u32 4294901760, %v1326_v51  ;;  %v9260_v51 = vand.u32 4294901760, %v6542_v45 }
 0x21c   : > { %1311 = vmatprep.mubr.f32.mxu0 %v9247_v43  ;;  %1640 = vmatprep.mubr.f32.mxu1 %v9247_v43 }
 0x21f   : > { %1317 = vmatmul.mubr.f32.gmra.mrb[60].mxu0 %v1316_v5  ;;  %1642 = vmatmul.mubr.f32.gmra.mrb[60].mxu1 %v6952_v37  ;;  %v1348_v5 = vsub.f32 %v6972_v40, %v9058_v49 }
 0x220   : > { %1322 = vmatprep.mubr.f32.mxu0 %v9247_v43  ;;  %1647 = vmatprep.mubr.f32.mxu1 %v9247_v43 }
 0x223   : > { %1328 = vmatmul.mubr.f32.gmra.mrb[62].mxu0 %v1327_v20  ;;  %1649 = vmatmul.mubr.f32.gmra.mrb[62].mxu1 %v6962_v0  ;;  %v1349_v20 = vand.u32 4294901760, %v1348_v5 }
 0x224   : > { %1333 = vmatprep.mubr.f32.mxu0 %v9247_v43  ;;  %1723 = vmatprep.mubr.f32.mxu1 %v9247_v43 }
 0x227   : > { %1339 = vmatmul.mubr.f32.gmra.mrb[64].mxu0 %v1338_v21  ;;  %1726 = vmatmul.mubr.f32.vlgmr.msra.gmra.mrb[0].mxu1 %v6560_v55 }
 0x228   : > { %1983 = vmatpush1.msra.mxu1 %v6529_v38  ;;  %1344 = vmatprep.mubr.f32.mxu0 %v9247_v43 }
 0x229   : > { %2338 = vmatprep.subr.mxu1 %v9260_v51  ;;  %1731 = vmatprep.mubr.f32.mxu1 %v9247_v43 }
 0x22b   : > { %1350 = vmatmul.mubr.f32.gmra.mrb[66].mxu0 %v1349_v20  ;;  %1734 = vmatmul.mubr.f32.gmra.mrb[2].mxu1 %v6574_v61 }
 0x22c   : > { %1739 = vmatprep.mubr.f32.mxu1 %v9247_v43 }
 0x22f   : > { %1742 = vmatmul.mubr.f32.gmra.mrb[4].mxu1 %v6583_v4 }
 0x230   : > { %1747 = vmatprep.mubr.f32.mxu1 %v9247_v43 }
 0x233   : > { %1750 = vmatmul.mubr.f32.gmra.mrb[6].mxu1 %v6596_v11 }
 0x234   : > { %1755 = vmatprep.mubr.f32.mxu1 %v9247_v43 }
 0x237   : > { %1758 = vmatmul.mubr.f32.gmra.mrb[8].mxu1 %v6609_v19 }
 0x238   : > { %1763 = vmatprep.mubr.f32.mxu1 %v9247_v43 }
 0x23b   : > { %1766 = vmatmul.mubr.f32.gmra.mrb[10].mxu1 %v6624_v27 }
 0x23c   : > { %1771 = vmatprep.mubr.f32.mxu1 %v9247_v43 }
 0x23f   : > { %1774 = vmatmul.mubr.f32.gmra.mrb[12].mxu1 %v6637_v34 }
 0x240   : > { %1779 = vmatprep.mubr.f32.mxu1 %v9247_v43 }
 0x243   : > { %1782 = vmatmul.mubr.f32.gmra.mrb[14].mxu1 %v6652_v50 }
 0x244   : > { %1787 = vmatprep.mubr.f32.mxu1 %v9247_v43 }
 0x247   : > { %1790 = vmatmul.mubr.f32.gmra.mrb[16].mxu1 %v6667_v63 }
 0x248   : > { %1795 = vmatprep.mubr.f32.mxu1 %v9247_v43 }
 0x24b   : > { %1798 = vmatmul.mubr.f32.gmra.mrb[18].mxu1 %v6680_v14 }
 0x24c   : > { %1803 = vmatprep.mubr.f32.mxu1 %v9247_v43 }
 0x24f   : > { %1806 = vmatmul.mubr.f32.gmra.mrb[20].mxu1 %v6695_v29 }
 0x250   : > { %1811 = vmatprep.mubr.f32.mxu1 %v9247_v43 }
 0x253   : > { %1814 = vmatmul.mubr.f32.gmra.mrb[22].mxu1 %v6710_v52 }
 0x254   : > { %1819 = vmatprep.mubr.f32.mxu1 %v9247_v43 }
 0x257   : > { %1822 = vmatmul.mubr.f32.gmra.mrb[24].mxu1 %v6723_v15 }
 0x258   : > { %1827 = vmatprep.mubr.f32.mxu1 %v9247_v43 }
 0x25b   : > { %1830 = vmatmul.mubr.f32.gmra.mrb[26].mxu1 %v6740_v60 }
 0x25c   : > { %1835 = vmatprep.mubr.f32.mxu1 %v9247_v43 }
 0x25f   : > { %1838 = vmatmul.mubr.f32.gmra.mrb[28].mxu1 %v6757_v22 }
 0x260   : > { %1843 = vmatprep.mubr.f32.mxu1 %v9247_v43 }
 0x263   : > { %1846 = vmatmul.mubr.f32.gmra.mrb[30].mxu1 %v6777_v26 }
 0x264   : > { %1851 = vmatprep.mubr.f32.mxu1 %v9247_v43 }
 0x267   : > { %1854 = vmatmul.mubr.f32.gmra.mrb[32].mxu1 %v6764_v7 }
 0x268   : > { %1859 = vmatprep.mubr.f32.mxu1 %v9247_v43 }
 0x26b   : > { %1862 = vmatmul.mubr.f32.gmra.mrb[34].mxu1 %v6784_v31 }
 0x26c   : > { %1867 = vmatprep.mubr.f32.mxu1 %v9247_v43 }
 0x26f   : > { %1870 = vmatmul.mubr.f32.gmra.mrb[36].mxu1 %v6799_v18 }
 0x270   : > { %1875 = vmatprep.mubr.f32.mxu1 %v9247_v43 }
 0x273   : > { %1878 = vmatmul.mubr.f32.gmra.mrb[38].mxu1 %v6819_v2 }
 0x274   : > { %1883 = vmatprep.mubr.f32.mxu1 %v9247_v43 }
 0x277   : > { %1886 = vmatmul.mubr.f32.gmra.mrb[40].mxu1 %v6832_v58 }
 0x278   : > { %1891 = vmatprep.mubr.f32.mxu1 %v9247_v43 }
 0x27b   : > { %1894 = vmatmul.mubr.f32.gmra.mrb[42].mxu1 %v6845_v62 }
 0x27c   : > { %1899 = vmatprep.mubr.f32.mxu1 %v9247_v43 }
 0x27f   : > { %1902 = vmatmul.mubr.f32.gmra.mrb[44].mxu1 %v6853_v1 }
 0x280   : > { %1907 = vmatprep.mubr.f32.mxu1 %v9247_v43 }
 0x282   : > { %v7040_v45 = vpop.f32.mrb[4].mxu0 }
 0x283   : > { %v7042_v16 = vpop.f32.mrb[5].mxu0  ;;  %1910 = vmatmul.mubr.f32.gmra.mrb[46].mxu1 %v6867_v56 }
 0x284   : > { %1915 = vmatprep.mubr.f32.mxu1 %v9247_v43 }
 0x286   : > { %v7046_v21 = vpop.f32.mrb[6].mxu0 }
 0x287   : > { %9261 = vst [vmem:[#allocation21_spill] sm:$0xff] %v7046_v21  ;;  %v7048_v5 = vpop.f32.mrb[7].mxu0  ;;  %1918 = vmatmul.mubr.f32.gmra.mrb[48].mxu1 %v6885_v46  ;;  %v9280_v21 = vand.u32 4294901760, %v6574_v61 }
 0x288   : > { %9262 = vst [vmem:[#allocation22_spill] sm:$0xff] %v7048_v5  ;;  %1923 = vmatprep.mubr.f32.mxu1 %v9247_v43 }
 0x28a   : > { %v7052_v51 = vpop.f32.mrb[8].mxu0 }
 0x28b   : > { %9263 = vst [vmem:[#allocation23_spill] sm:$0xff] %v7052_v51  ;;  %v7054_v20 = vpop.f32.mrb[9].mxu0  ;;  %1926 = vmatmul.mubr.f32.gmra.mrb[50].mxu1 %v6898_v33 }
 0x28c   : > { %9264 = vst [vmem:[#allocation24_spill] sm:$0xff] %v7054_v20  ;;  %1931 = vmatprep.mubr.f32.mxu1 %v9247_v43 }
 0x28e   : > { %v7058_v49 = vpop.f32.mrb[10].mxu0 }
 0x28f   : > { %9265 = vst [vmem:[#allocation25_spill] sm:$0xff] %v7058_v49  ;;  %v7060_v13 = vpop.f32.mrb[11].mxu0  ;;  %1934 = vmatmul.mubr.f32.gmra.mrb[52].mxu1 %v6910_v47 }
 0x290   : > { %9266 = vst [vmem:[#allocation26_spill] sm:$0xff] %v7060_v13  ;;  %1939 = vmatprep.mubr.f32.mxu1 %v9247_v43 }
 0x292   : > { %v7064_v53 = vpop.f32.mrb[12].mxu0 }
 0x293   : > { %9267 = vst [vmem:[#allocation27_spill] sm:$0xff] %v7064_v53  ;;  %v7066_v5 = vpop.f32.mrb[13].mxu0  ;;  %1942 = vmatmul.mubr.f32.gmra.mrb[54].mxu1 %v6918_v36 }
 0x294   : > { %9268 = vst [vmem:[#allocation28_spill] sm:$0xff] %v7066_v5  ;;  %1947 = vmatprep.mubr.f32.mxu1 %v9247_v43 }
 0x296   : > { %v7070_v20 = vpop.f32.mrb[14].mxu0 }
 0x297   : > { %9269 = vst [vmem:[#allocation29_spill] sm:$0xff] %v7070_v20  ;;  %v7072_v51 = vpop.f32.mrb[15].mxu0  ;;  %1950 = vmatmul.mubr.f32.gmra.mrb[56].mxu1 %v6934_v8 }
 0x298   : > { %9270 = vst [vmem:[#allocation30_spill] sm:$0xff] %v7072_v51  ;;  %1955 = vmatprep.mubr.f32.mxu1 %v9247_v43 }
 0x29a   : > { %v7076_v13 = vpop.f32.mrb[16].mxu0 }
 0x29b   : > { %9271 = vst [vmem:[#allocation31_spill] sm:$0xff] %v7076_v13  ;;  %v7078_v49 = vpop.f32.mrb[17].mxu0  ;;  %1958 = vmatmul.mubr.f32.gmra.mrb[58].mxu1 %v6950_v12 }
 0x29c   : > { %9272 = vst [vmem:[#allocation32_spill] sm:$0xff] %v7078_v49  ;;  %1963 = vmatprep.mubr.f32.mxu1 %v9247_v43 }
 0x29e   : > { %v7082_v5 = vpop.f32.mrb[18].mxu0 }
 0x29f   : > { %9273 = vst [vmem:[#allocation33_spill] sm:$0xff] %v7082_v5  ;;  %v7084_v53 = vpop.f32.mrb[19].mxu0  ;;  %1966 = vmatmul.mubr.f32.gmra.mrb[60].mxu1 %v6960_v23  ;;  %v9278_v5 = vand.u32 4294901760, %v6560_v55 }
 0x2a0   : > { %9274 = vst [vmem:[#allocation34_spill] sm:$0xff] %v7084_v53  ;;  %1971 = vmatprep.mubr.f32.mxu1 %v9247_v43  ;;  %v9279_v53 = vand.u32 4294901760, %v6539_v44  ;;  %v9282_v44 = vand.u32 4294901760, %v6583_v4 }
 0x2a2   : > { %v7088_v51 = vpop.f32.mrb[20].mxu0 }
 0x2a3   : > { %9275 = vst [vmem:[#allocation35_spill] sm:$0xff] %v7088_v51  ;;  %v7090_v20 = vpop.f32.mrb[21].mxu0  ;;  %1974 = vmatmul.mubr.f32.gmra.mrb[62].mxu1 %v6972_v40 }
 0x2a4   : > { %9276 = vst [vmem:[#allocation36_spill] sm:$0xff] %v7090_v20  ;;  %2046 = vmatprep.mubr.f32.mxu1 %v9247_v43 }
 0x2a6   : > { %v7094_v49 = vpop.f32.mrb[22].mxu0 }
 0x2a7   : > { %v7096_v13 = vpop.f32.mrb[23].mxu0  ;;  %2050 = vmatmul.mubr.f32.vlgmr.msra.gmra.mrb[0].mxu1 %v9278_v5  ;;  %v9284_v5 = vand.u32 4294901760, %v6596_v11 }
 0x2a8   : > { %9277 = vst [vmem:[#allocation37_spill] sm:$0xff] %v7096_v13  ;;  %2342 = vmatpush1.msra.mxu1 %v9279_v53  ;;  %2055 = vmatprep.mubr.f32.mxu1 %v9247_v43 }
 0x2a9   : > { %2631 = vmatprep.subr.mxu1 %v6534_v42 }
 0x2aa   : > { %v7104_v51 = vpop.f32.mrb[24].mxu0 }
 0x2ab   : > { %v7106_v20 = vpop.f32.mrb[25].mxu0  ;;  %2059 = vmatmul.mubr.f32.gmra.mrb[2].mxu1 %v9280_v21 }
 0x2ac   : > { %2064 = vmatprep.mubr.f32.mxu1 %v9247_v43 }
 0x2ae   : > { %v7111_v13 = vpop.f32.mrb[26].mxu0 }
 0x2af   : > { %v7113_v55 = vpop.f32.mrb[27].mxu0  ;;  %2068 = vmatmul.mubr.f32.gmra.mrb[4].mxu1 %v9282_v44 }
 0x2b0   : > { %9281 = vst [vmem:[#allocation38_spill] sm:$0xff] %v7113_v55  ;;  %2073 = vmatprep.mubr.f32.mxu1 %v9247_v43  ;;  %v9286_v55 = vand.u32 4294901760, %v6609_v19 }
 0x2b2   : > { %v7118_v53 = vpop.f32.mrb[28].mxu0 }
 0x2b3   : > { %v7120_v42 = vpop.f32.mrb[29].mxu0  ;;  %2077 = vmatmul.mubr.f32.gmra.mrb[6].mxu1 %v9284_v5 }
 0x2b4   : > { %9283 = vst [vmem:[#allocation39_spill] sm:$0xff] %v7120_v42  ;;  %2082 = vmatprep.mubr.f32.mxu1 %v9247_v43  ;;  %v9288_v42 = vand.u32 4294901760, %v6624_v27 }
 0x2b6   : > { %v7125_v61 = vpop.f32.mrb[30].mxu0 }
 0x2b7   : > { %v7127_v21 = vpop.f32.mrb[31].mxu0  ;;  %2086 = vmatmul.mubr.f32.gmra.mrb[8].mxu1 %v9286_v55 }
 0x2b8   : > { %9285 = vst [vmem:[#allocation40_spill] sm:$0xff] %v7127_v21  ;;  %2091 = vmatprep.mubr.f32.mxu1 %v9247_v43  ;;  %v9290_v21 = vand.u32 4294901760, %v6637_v34 }
 0x2ba   : > { %v7132_v4 = vpop.f32.mrb[32].mxu0 }
 0x2bb   : > { %v7134_v44 = vpop.f32.mrb[33].mxu0  ;;  %2095 = vmatmul.mubr.f32.gmra.mrb[10].mxu1 %v9288_v42 }
 0x2bc   : > { %9287 = vst [vmem:[#allocation41_spill] sm:$0xff] %v7134_v44  ;;  %2100 = vmatprep.mubr.f32.mxu1 %v9247_v43  ;;  %v9292_v44 = vand.u32 4294901760, %v6652_v50 }
 0x2be   : > { %v7139_v11 = vpop.f32.mrb[34].mxu0 }
 0x2bf   : > { %v7141_v5 = vpop.f32.mrb[35].mxu0  ;;  %2104 = vmatmul.mubr.f32.gmra.mrb[12].mxu1 %v9290_v21 }
 0x2c0   : > { %9289 = vst [vmem:[#allocation42_spill] sm:$0xff] %v7141_v5  ;;  %2109 = vmatprep.mubr.f32.mxu1 %v9247_v43  ;;  %v9294_v5 = vand.u32 4294901760, %v6667_v63 }
 0x2c2   : > { %v7146_v19 = vpop.f32.mrb[36].mxu0 }
 0x2c3   : > { %v7148_v55 = vpop.f32.mrb[37].mxu0  ;;  %2113 = vmatmul.mubr.f32.gmra.mrb[14].mxu1 %v9292_v44 }
 0x2c4   : > { %9291 = vst [vmem:[#allocation43_spill] sm:$0xff] %v7148_v55  ;;  %2118 = vmatprep.mubr.f32.mxu1 %v9247_v43  ;;  %v9296_v55 = vand.u32 4294901760, %v6680_v14 }
 0x2c6   : > { %v7153_v27 = vpop.f32.mrb[38].mxu0 }
 0x2c7   : > { %v7155_v42 = vpop.f32.mrb[39].mxu0  ;;  %2122 = vmatmul.mubr.f32.gmra.mrb[16].mxu1 %v9294_v5 }
 0x2c8   : > { %9293 = vst [vmem:[#allocation44_spill] sm:$0xff] %v7155_v42  ;;  %2127 = vmatprep.mubr.f32.mxu1 %v9247_v43  ;;  %v9298_v42 = vand.u32 4294901760, %v6695_v29 }
 0x2ca   : > { %v7160_v34 = vpop.f32.mrb[40].mxu0 }
 0x2cb   : > { %v7162_v21 = vpop.f32.mrb[41].mxu0  ;;  %2131 = vmatmul.mubr.f32.gmra.mrb[18].mxu1 %v9296_v55 }
 0x2cc   : > { %9295 = vst [vmem:[#allocation45_spill] sm:$0xff] %v7162_v21  ;;  %2136 = vmatprep.mubr.f32.mxu1 %v9247_v43  ;;  %v9300_v21 = vand.u32 4294901760, %v6710_v52 }
 0x2ce   : > { %v7167_v50 = vpop.f32.mrb[42].mxu0 }
 0x2cf   : > { %v7169_v44 = vpop.f32.mrb[43].mxu0  ;;  %2140 = vmatmul.mubr.f32.gmra.mrb[20].mxu1 %v9298_v42 }
 0x2d0   : > { %9297 = vst [vmem:[#allocation46_spill] sm:$0xff] %v7169_v44  ;;  %2145 = vmatprep.mubr.f32.mxu1 %v9247_v43  ;;  %v9302_v44 = vand.u32 4294901760, %v6723_v15 }
 0x2d2   : > { %v7174_v63 = vpop.f32.mrb[44].mxu0 }
 0x2d3   : > { %v7176_v5 = vpop.f32.mrb[45].mxu0  ;;  %2149 = vmatmul.mubr.f32.gmra.mrb[22].mxu1 %v9300_v21 }
 0x2d4   : > { %9299 = vst [vmem:[#allocation47_spill] sm:$0xff] %v7176_v5  ;;  %2154 = vmatprep.mubr.f32.mxu1 %v9247_v43  ;;  %v9304_v5 = vand.u32 4294901760, %v6740_v60 }
 0x2d6   : > { %v7181_v14 = vpop.f32.mrb[46].mxu0 }
 0x2d7   : > { %v7183_v55 = vpop.f32.mrb[47].mxu0  ;;  %2158 = vmatmul.mubr.f32.gmra.mrb[24].mxu1 %v9302_v44 }
 0x2d8   : > { %9301 = vst [vmem:[#allocation48_spill] sm:$0xff] %v7183_v55  ;;  %2163 = vmatprep.mubr.f32.mxu1 %v9247_v43  ;;  %v9306_v55 = vand.u32 4294901760, %v6757_v22 }
 0x2da   : > { %v7188_v29 = vpop.f32.mrb[48].mxu0 }
 0x2db   : > { %v7190_v42 = vpop.f32.mrb[49].mxu0  ;;  %2167 = vmatmul.mubr.f32.gmra.mrb[26].mxu1 %v9304_v5 }
 0x2dc   : > { %9303 = vst [vmem:[#allocation49_spill] sm:$0xff] %v7190_v42  ;;  %2172 = vmatprep.mubr.f32.mxu1 %v9247_v43  ;;  %v9308_v42 = vand.u32 4294901760, %v6777_v26 }
 0x2de   : > { %v7195_v52 = vpop.f32.mrb[50].mxu0 }
 0x2df   : > { %v7197_v21 = vpop.f32.mrb[51].mxu0  ;;  %2176 = vmatmul.mubr.f32.gmra.mrb[28].mxu1 %v9306_v55 }
 0x2e0   : > { %9305 = vst [vmem:[#allocation50_spill] sm:$0xff] %v7197_v21  ;;  %2181 = vmatprep.mubr.f32.mxu1 %v9247_v43  ;;  %v9310_v21 = vand.u32 4294901760, %v6764_v7 }
 0x2e2   : > { %v7202_v15 = vpop.f32.mrb[52].mxu0 }
 0x2e3   : > { %v7204_v44 = vpop.f32.mrb[53].mxu0  ;;  %2185 = vmatmul.mubr.f32.gmra.mrb[30].mxu1 %v9308_v42 }
 0x2e4   : > { %9307 = vst [vmem:[#allocation51_spill] sm:$0xff] %v7204_v44  ;;  %2190 = vmatprep.mubr.f32.mxu1 %v9247_v43  ;;  %v9312_v44 = vand.u32 4294901760, %v6784_v31 }
 0x2e6   : > { %v7209_v60 = vpop.f32.mrb[54].mxu0 }
 0x2e7   : > { %v7211_v5 = vpop.f32.mrb[55].mxu0  ;;  %2194 = vmatmul.mubr.f32.gmra.mrb[32].mxu1 %v9310_v21 }
 0x2e8   : > { %9309 = vst [vmem:[#allocation52_spill] sm:$0xff] %v7211_v5  ;;  %2199 = vmatprep.mubr.f32.mxu1 %v9247_v43  ;;  %v9314_v5 = vand.u32 4294901760, %v6799_v18 }
 0x2ea   : > { %v7216_v22 = vpop.f32.mrb[56].mxu0 }
 0x2eb   : > { %v7218_v55 = vpop.f32.mrb[57].mxu0  ;;  %2203 = vmatmul.mubr.f32.gmra.mrb[34].mxu1 %v9312_v44 }
 0x2ec   : > { %9311 = vst [vmem:[#allocation53_spill] sm:$0xff] %v7218_v55  ;;  %2208 = vmatprep.mubr.f32.mxu1 %v9247_v43  ;;  %v9316_v55 = vand.u32 4294901760, %v6819_v2 }
 0x2ee   : > { %v7223_v26 = vpop.f32.mrb[58].mxu0 }
 0x2ef   : > { %v7225_v42 = vpop.f32.mrb[59].mxu0  ;;  %2212 = vmatmul.mubr.f32.gmra.mrb[36].mxu1 %v9314_v5 }
 0x2f0   : > { %9313 = vst [vmem:[#allocation54_spill] sm:$0xff] %v7225_v42  ;;  %2217 = vmatprep.mubr.f32.mxu1 %v9247_v43  ;;  %v9318_v42 = vand.u32 4294901760, %v6832_v58  ;;  %v9321_v58 = vand.u32 4294901760, %v6867_v56  ;;  %v9325_v56 = vand.u32 4294901760, %v6918_v36  ;;  %v9329_v36 = vand.u32 4294901760, %v6972_v40  ;;  %v9334_v40 = vld [vmem:[#allocation12_spill] sm:$0xff] }
 0x2f2   : > { %v7230_v7 = vpop.f32.mrb[60].mxu0 }
 0x2f3   : > { %v7232_v21 = vpop.f32.mrb[61].mxu0  ;;  %2221 = vmatmul.mubr.f32.gmra.mrb[38].mxu1 %v9316_v55 }
 0x2f4   : > { %9315 = vst [vmem:[#allocation55_spill] sm:$0xff] %v7232_v21  ;;  %2226 = vmatprep.mubr.f32.mxu1 %v9247_v43  ;;  %v9319_v21 = vand.u32 4294901760, %v6845_v62  ;;  %v9323_v62 = vand.u32 4294901760, %v6898_v33  ;;  %v9327_v33 = vand.u32 4294901760, %v6950_v12  ;;  %v9331_v12 = vld [vmem:[#allocation8_spill] sm:$0xff] }
 0x2f6   : > { %v7237_v31 = vpop.f32.mrb[62].mxu0 }
 0x2f7   : > { %v7239_v44 = vpop.f32.mrb[63].mxu0  ;;  %2230 = vmatmul.mubr.f32.gmra.mrb[40].mxu1 %v9318_v42  ;;  %v9322_v42 = vand.u32 4294901760, %v6885_v46  ;;  %v9326_v46 = vand.u32 4294901760, %v6934_v8  ;;  %v9332_v8 = vld [vmem:[#allocation9_spill] sm:$0xff] }
 0x2f8   : > { %9317 = vst [vmem:[#allocation56_spill] sm:$0xff] %v7239_v44  ;;  %2235 = vmatprep.mubr.f32.mxu1 %v9247_v43  ;;  %v9320_v44 = vand.u32 4294901760, %v6853_v1  ;;  %v9324_v1 = vand.u32 4294901760, %v6910_v47  ;;  %v9328_v47 = vand.u32 4294901760, %v6960_v23  ;;  %v9333_v23 = vld [vmem:[#allocation11_spill] sm:$0xff] }
 0x2fa   : > { %v7244_v18 = vpop.f32.mrb[64].mxu0 }
 0x2fb   : > { %v7246_v5 = vpop.f32.mrb[65].mxu0  ;;  %2239 = vmatmul.mubr.f32.gmra.mrb[42].mxu1 %v9319_v21  ;;  %v9335_v21 = vld [vmem:[#allocation13_spill] sm:$0xff] }
 0x2fc   : > { %2244 = vmatprep.mubr.f32.mxu1 %v9247_v43 }
 0x2fe   : > { %v7251_v2 = vpop.f32.mrb[66].mxu0 }
 0x2ff   : > { %v7253_v55 = vpop.f32.mrb[67].mxu0  ;;  %2248 = vmatmul.mubr.f32.gmra.mrb[44].mxu1 %v9320_v44  ;;  %v9336_v44 = vld [vmem:[#allocation14_spill] sm:$0xff] }
 0x300   : > { %2253 = vmatprep.mubr.f32.mxu1 %v9247_v43 }
 0x303   : > { %2257 = vmatmul.mubr.f32.gmra.mrb[46].mxu1 %v9321_v58  ;;  %v9337_v58 = vld [vmem:[#allocation15_spill] sm:$0xff] }
 0x304   : > { %2262 = vmatprep.mubr.f32.mxu1 %v9247_v43 }
 0x307   : > { %2266 = vmatmul.mubr.f32.gmra.mrb[48].mxu1 %v9322_v42  ;;  %v9338_v42 = vld [vmem:[#allocation16_spill] sm:$0xff] }
 0x308   : > { %2271 = vmatprep.mubr.f32.mxu1 %v9247_v43 }
 0x30b   : > { %2275 = vmatmul.mubr.f32.gmra.mrb[50].mxu1 %v9323_v62  ;;  %v9339_v62 = vld [vmem:[#allocation17_spill] sm:$0xff] }
 0x30c   : > { %2280 = vmatprep.mubr.f32.mxu1 %v9247_v43 }
 0x30f   : > { %2284 = vmatmul.mubr.f32.gmra.mrb[52].mxu1 %v9324_v1  ;;  %v9340_v1 = vld [vmem:[#allocation18_spill] sm:$0xff] }
 0x310   : > { %2289 = vmatprep.mubr.f32.mxu1 %v9247_v43 }
 0x313   : > { %2293 = vmatmul.mubr.f32.gmra.mrb[54].mxu1 %v9325_v56  ;;  %v9341_v56 = vld [vmem:[#allocation19_spill] sm:$0xff] }
 0x314   : > { %2298 = vmatprep.mubr.f32.mxu1 %v9247_v43 }
 0x317   : > { %2302 = vmatmul.mubr.f32.gmra.mrb[56].mxu1 %v9326_v46  ;;  %v9342_v46 = vld [vmem:[#allocation20_spill] sm:$0xff] }
 0x318   : > { %2307 = vmatprep.mubr.f32.mxu1 %v9247_v43 }
 0x31b   : > { %2311 = vmatmul.mubr.f32.gmra.mrb[58].mxu1 %v9327_v33 }
 0x31c   : > { %2316 = vmatprep.mubr.f32.mxu1 %v9247_v43 }
 0x31f   : > { %2320 = vmatmul.mubr.f32.gmra.mrb[60].mxu1 %v9328_v47 }
 0x320   : > { %2325 = vmatprep.mubr.f32.mxu1 %v9247_v43 }
 0x323   : > { %2329 = vmatmul.mubr.f32.gmra.mrb[62].mxu1 %v9329_v36 }
 0x324   : > { %2405 = vmatprep.mubr.f32.mxu1 %v9247_v43 }
 0x327   : > { %2407 = vmatmul.mubr.f32.vlgmr.msra.gmra.mrb[0].mxu1 %v6557_v54 }
 0x328   : > { %2633 = vmatpush1.msra.mxu1 %v6529_v38  ;;  %2412 = vmatprep.mubr.f32.mxu1 %v9247_v43  ;;  %v9330_v38 = vld [vmem:[#allocation10_spill] sm:$0xff] }
 0x32b   : > { %2414 = vmatmul.mubr.f32.gmra.mrb[2].mxu1 %v6567_v59 }
 0x32c   : > { %2419 = vmatprep.mubr.f32.mxu1 %v9247_v43 }
 0x32f   : > { %2421 = vmatmul.mubr.f32.gmra.mrb[4].mxu1 %v6580_v3 }
 0x330   : > { %2426 = vmatprep.mubr.f32.mxu1 %v9247_v43 }
 0x333   : > { %2428 = vmatmul.mubr.f32.gmra.mrb[6].mxu1 %v6593_v9 }
 0x334   : > { %2433 = vmatprep.mubr.f32.mxu1 %v9247_v43 }
 0x337   : > { %2435 = vmatmul.mubr.f32.gmra.mrb[8].mxu1 %v6606_v17 }
 0x338   : > { %2440 = vmatprep.mubr.f32.mxu1 %v9247_v43 }
 0x33b   : > { %2442 = vmatmul.mubr.f32.gmra.mrb[10].mxu1 %v6619_v24 }
 0x33c   : > { %2447 = vmatprep.mubr.f32.mxu1 %v9247_v43 }
 0x33f   : > { %2449 = vmatmul.mubr.f32.gmra.mrb[12].mxu1 %v6634_v32 }
 0x340   : > { %2454 = vmatprep.mubr.f32.mxu1 %v9247_v43 }
 0x343   : > { %2456 = vmatmul.mubr.f32.gmra.mrb[14].mxu1 %v6649_v48 }
 0x344   : > { %2461 = vmatprep.mubr.f32.mxu1 %v9247_v43 }
 0x347   : > { %2463 = vmatmul.mubr.f32.gmra.mrb[16].mxu1 %v6662_v57 }
 0x348   : > { %2468 = vmatprep.mubr.f32.mxu1 %v9247_v43 }
 0x34b   : > { %2470 = vmatmul.mubr.f32.gmra.mrb[18].mxu1 %v6677_v10 }
 0x34c   : > { %2475 = vmatprep.mubr.f32.mxu1 %v9247_v43 }
 0x34f   : > { %2477 = vmatmul.mubr.f32.gmra.mrb[20].mxu1 %v6692_v25 }
 0x350   : > { %2482 = vmatprep.mubr.f32.mxu1 %v9247_v43 }
 0x353   : > { %2484 = vmatmul.mubr.f32.gmra.mrb[22].mxu1 %v6705_v39 }
 0x354   : > { %2489 = vmatprep.mubr.f32.mxu1 %v9247_v43 }
 0x357   : > { %2491 = vmatmul.mubr.f32.gmra.mrb[24].mxu1 %v6720_v6 }
 0x358   : > { %2496 = vmatprep.mubr.f32.mxu1 %v9247_v43 }
 0x35b   : > { %2498 = vmatmul.mubr.f32.gmra.mrb[26].mxu1 %v6735_v35 }
 0x35c   : > { %2503 = vmatprep.mubr.f32.mxu1 %v9247_v43 }
 0x35f   : > { %2505 = vmatmul.mubr.f32.gmra.mrb[28].mxu1 %v6752_v30 }
 0x360   : > { %2510 = vmatprep.mubr.f32.mxu1 %v9247_v43 }
 0x363   : > { %2512 = vmatmul.mubr.f32.gmra.mrb[30].mxu1 %v9330_v38 }
 0x364   : > { %2517 = vmatprep.mubr.f32.mxu1 %v9247_v43 }
 0x367   : > { %2519 = vmatmul.mubr.f32.gmra.mrb[32].mxu1 %v9331_v12 }
 0x368   : > { %2524 = vmatprep.mubr.f32.mxu1 %v9247_v43 }
 0x36b   : > { %2526 = vmatmul.mubr.f32.gmra.mrb[34].mxu1 %v9332_v8 }
 0x36c   : > { %2531 = vmatprep.mubr.f32.mxu1 %v9247_v43 }
 0x36f   : > { %2533 = vmatmul.mubr.f32.gmra.mrb[36].mxu1 %v9333_v23 }
 0x370   : > { %2538 = vmatprep.mubr.f32.mxu1 %v9247_v43 }
 0x373   : > { %2540 = vmatmul.mubr.f32.gmra.mrb[38].mxu1 %v9334_v40 }
 0x374   : > { %2545 = vmatprep.mubr.f32.mxu1 %v9247_v43 }
 0x377   : > { %2547 = vmatmul.mubr.f32.gmra.mrb[40].mxu1 %v9335_v21 }
 0x378   : > { %2552 = vmatprep.mubr.f32.mxu1 %v9247_v43 }
 0x37b   : > { %2554 = vmatmul.mubr.f32.gmra.mrb[42].mxu1 %v9336_v44 }
 0x37c   : > { %2559 = vmatprep.mubr.f32.mxu1 %v9247_v43 }
 0x37f   : > { %2561 = vmatmul.mubr.f32.gmra.mrb[44].mxu1 %v9337_v58 }
 0x380   : > { %2566 = vmatprep.mubr.f32.mxu1 %v9247_v43 }
 0x383   : > { %2568 = vmatmul.mubr.f32.gmra.mrb[46].mxu1 %v9338_v42 }
 0x384   : > { %2573 = vmatprep.mubr.f32.mxu1 %v9247_v43 }
 0x387   : > { %2575 = vmatmul.mubr.f32.gmra.mrb[48].mxu1 %v9339_v62 }
 0x388   : > { %2580 = vmatprep.mubr.f32.mxu1 %v9247_v43 }
 0x38b   : > { %2582 = vmatmul.mubr.f32.gmra.mrb[50].mxu1 %v9340_v1 }
 0x38c   : > { %2587 = vmatprep.mubr.f32.mxu1 %v9247_v43 }
 0x38f   : > { %2589 = vmatmul.mubr.f32.gmra.mrb[52].mxu1 %v9341_v56 }
 0x390   : > { %2594 = vmatprep.mubr.f32.mxu1 %v9247_v43 }
 0x393   : > { %2596 = vmatmul.mubr.f32.gmra.mrb[54].mxu1 %v9342_v46 }
 0x394   : > { %2601 = vmatprep.mubr.f32.mxu1 %v9247_v43 }
 0x397   : > { %2603 = vmatmul.mubr.f32.gmra.mrb[56].mxu1 %v6923_v41 }
 0x398   : > { %2608 = vmatprep.mubr.f32.mxu1 %v9247_v43 }
 0x39b   : > { %2610 = vmatmul.mubr.f32.gmra.mrb[58].mxu1 %v6936_v28 }
 0x39c   : > { %2615 = vmatprep.mubr.f32.mxu1 %v9247_v43 }
 0x39f   : > { %2617 = vmatmul.mubr.f32.gmra.mrb[60].mxu1 %v6952_v37 }
 0x3a0   : > { %2622 = vmatprep.mubr.f32.mxu1 %v9247_v43 }
 0x3a3   : > { %2624 = vmatmul.mubr.f32.gmra.mrb[62].mxu1 %v6962_v0 }
 0x3a4   : > { %2696 = vmatprep.mubr.f32.mxu1 %v9247_v43 }
 0x3a7   : > { %2698 = vmatmul.mubr.f32.vlgmr.msra.gmra.mrb[0].mxu1 %v6557_v54 }
 0x3a8   : > { %2703 = vmatprep.mubr.f32.mxu1 %v9247_v43 }
 0x3ab   : > { %2705 = vmatmul.mubr.f32.gmra.mrb[2].mxu1 %v6567_v59 }
 0x3ac   : > { %2710 = vmatprep.mubr.f32.mxu1 %v9247_v43 }
 0x3af   : > { %2712 = vmatmul.mubr.f32.gmra.mrb[4].mxu1 %v6580_v3 }
 0x3b0   : > { %2717 = vmatprep.mubr.f32.mxu1 %v9247_v43 }
 0x3b3   : > { %2719 = vmatmul.mubr.f32.gmra.mrb[6].mxu1 %v6593_v9 }
 0x3b4   : > { %2724 = vmatprep.mubr.f32.mxu1 %v9247_v43 }
 0x3b7   : > { %2726 = vmatmul.mubr.f32.gmra.mrb[8].mxu1 %v6606_v17 }
 0x3b8   : > { %2731 = vmatprep.mubr.f32.mxu1 %v9247_v43 }
 0x3bb   : > { %2733 = vmatmul.mubr.f32.gmra.mrb[10].mxu1 %v6619_v24 }
 0x3bc   : > { %2738 = vmatprep.mubr.f32.mxu1 %v9247_v43 }
 0x3bf   : > { %2740 = vmatmul.mubr.f32.gmra.mrb[12].mxu1 %v6634_v32 }
 0x3c0   : > { %2745 = vmatprep.mubr.f32.mxu1 %v9247_v43 }
 0x3c3   : > { %2747 = vmatmul.mubr.f32.gmra.mrb[14].mxu1 %v6649_v48  ;;  %v9343_v48 = vld [vmem:[#allocation21_spill] sm:$0xff] }
 0x3c4   : > { %2752 = vmatprep.mubr.f32.mxu1 %v9247_v43 }
 0x3c7   : > { %2754 = vmatmul.mubr.f32.gmra.mrb[16].mxu1 %v6662_v57 }
 0x3c8   : > { %2759 = vmatprep.mubr.f32.mxu1 %v9247_v43 }
 0x3cb   : > { %2761 = vmatmul.mubr.f32.gmra.mrb[18].mxu1 %v6677_v10 }
 0x3cc   : > { %2766 = vmatprep.mubr.f32.mxu1 %v9247_v43 }
 0x3cf   : > { %2768 = vmatmul.mubr.f32.gmra.mrb[20].mxu1 %v6692_v25  ;;  %v9344_v25 = vld [vmem:[#allocation22_spill] sm:$0xff] }
 0x3d0   : > { %2773 = vmatprep.mubr.f32.mxu1 %v9247_v43 }
 0x3d3   : > { %2775 = vmatmul.mubr.f32.gmra.mrb[22].mxu1 %v6705_v39 }
 0x3d4   : > { %2780 = vmatprep.mubr.f32.mxu1 %v9247_v43 }
 0x3d7   : > { %2782 = vmatmul.mubr.f32.gmra.mrb[24].mxu1 %v6720_v6 }
 0x3d8   : > { %2787 = vmatprep.mubr.f32.mxu1 %v9247_v43 }
 0x3db   : > { %2789 = vmatmul.mubr.f32.gmra.mrb[26].mxu1 %v6735_v35 }
 0x3dc   : > { %2794 = vmatprep.mubr.f32.mxu1 %v9247_v43 }
 0x3df   : > { %2796 = vmatmul.mubr.f32.gmra.mrb[28].mxu1 %v6752_v30 }
 0x3e0   : > { %2801 = vmatprep.mubr.f32.mxu1 %v9247_v43 }
 0x3e3   : > { %2803 = vmatmul.mubr.f32.gmra.mrb[30].mxu1 %v9330_v38 }
 0x3e4   : > { %2808 = vmatprep.mubr.f32.mxu1 %v9247_v43 }
 0x3e7   : > { %2810 = vmatmul.mubr.f32.gmra.mrb[32].mxu1 %v9331_v12  ;;  %v9347_v12 = vld [vmem:[#allocation25_spill] sm:$0xff] }
 0x3e8   : > { %2815 = vmatprep.mubr.f32.mxu1 %v9247_v43 }
 0x3eb   : > { %2817 = vmatmul.mubr.f32.gmra.mrb[34].mxu1 %v9332_v8 }
 0x3ec   : > { %2822 = vmatprep.mubr.f32.mxu1 %v9247_v43 }
 0x3ef   : > { %2824 = vmatmul.mubr.f32.gmra.mrb[36].mxu1 %v9333_v23 }
 0x3f0   : > { %2829 = vmatprep.mubr.f32.mxu1 %v9247_v43 }
 0x3f3   : > { %2831 = vmatmul.mubr.f32.gmra.mrb[38].mxu1 %v9334_v40  ;;  %v9348_v40 = vld [vmem:[#allocation26_spill] sm:$0xff] }
 0x3f4   : > { %2836 = vmatprep.mubr.f32.mxu1 %v9247_v43 }
 0x3f7   : > { %2838 = vmatmul.mubr.f32.gmra.mrb[40].mxu1 %v9335_v21 }
 0x3f8   : > { %2843 = vmatprep.mubr.f32.mxu1 %v9247_v43 }
 0x3fb   : > { %2845 = vmatmul.mubr.f32.gmra.mrb[42].mxu1 %v9336_v44 }
 0x3fc   : > { %2850 = vmatprep.mubr.f32.mxu1 %v9247_v43 }
 0x3ff   : > { %2852 = vmatmul.mubr.f32.gmra.mrb[44].mxu1 %v9337_v58 }
 0x400   : > { %2857 = vmatprep.mubr.f32.mxu1 %v9247_v43 }
 0x403   : > { %2859 = vmatmul.mubr.f32.gmra.mrb[46].mxu1 %v9338_v42 }
 0x404   : > { %2864 = vmatprep.mubr.f32.mxu1 %v9247_v43 }
 0x407   : > { %2866 = vmatmul.mubr.f32.gmra.mrb[48].mxu1 %v9339_v62 }
 0x408   : > { %2871 = vmatprep.mubr.f32.mxu1 %v9247_v43 }
 0x40b   : > { %2873 = vmatmul.mubr.f32.gmra.mrb[50].mxu1 %v9340_v1  ;;  %v9349_v1 = vld [vmem:[#allocation27_spill] sm:$0xff] }
 0x40c   : > { %2878 = vmatprep.mubr.f32.mxu1 %v9247_v43 }
 0x40f   : > { %2880 = vmatmul.mubr.f32.gmra.mrb[52].mxu1 %v9341_v56 }
 0x410   : > { %2885 = vmatprep.mubr.f32.mxu1 %v9247_v43 }
 0x413   : > { %2887 = vmatmul.mubr.f32.gmra.mrb[54].mxu1 %v9342_v46 }
 0x414   : > { %2892 = vmatprep.mubr.f32.mxu1 %v9247_v43 }
 0x417   : > { %2894 = vmatmul.mubr.f32.gmra.mrb[56].mxu1 %v6923_v41 }
 0x418   : > { %2899 = vmatprep.mubr.f32.mxu1 %v9247_v43 }
 0x41b   : > { %2901 = vmatmul.mubr.f32.gmra.mrb[58].mxu1 %v6936_v28  ;;  %v9345_v28 = vld [vmem:[#allocation23_spill] sm:$0xff] }
 0x41c   : > { %2906 = vmatprep.mubr.f32.mxu1 %v9247_v43 }
 0x41f   : > { %2908 = vmatmul.mubr.f32.gmra.mrb[60].mxu1 %v6952_v37 }
 0x420   : > { %2913 = vmatprep.mubr.f32.mxu1 %v9247_v43 }
 0x423   : > { %2915 = vmatmul.mubr.f32.gmra.mrb[62].mxu1 %v6962_v0 }
 0x47a   : > { %v2699_v54 = vpop.f32.mrb[0].mxu1 }
 0x47b   : > { %v5745_v59 = vadd.f32 %v2699_v54, %v7040_v45  ;;  %v2701_v3 = vpop.f32.mrb[1].mxu1  ;;  %v9346_v45 = vld [vmem:[#allocation24_spill] sm:$0xff] }
 0x47c   : > { %v5746_v9 = vadd.f32 %v2701_v3, %v7042_v16  ;;  %v9350_v54 = vld [vmem:[#allocation28_spill] sm:$0xff] }
 0x47d   : > { %v7415_v17 = vmul.f32 0.5, %v5745_v59 }
 0x47e   : > { %v7417_v24 = vmul.f32 0.5, %v5746_v9  ;;  %v2706_v32 = vpop.f32.mrb[2].mxu1 }
 0x47f   : > { %v5747_v57 = vadd.f32 %v2706_v32, %v9343_v48  ;;  %v2708_v10 = vpop.f32.mrb[3].mxu1 }
 0x480   : > { %v5748_v39 = vadd.f32 %v2708_v10, %v9344_v25  ;;  %v2985_v6 = vmax.f32 %v7415_v17, %v7417_v24 }
 0x481   : > { %v7423_v35 = vmul.f32 0.5, %v5747_v57  ;;  %v9351_v57 = vld [vmem:[#allocation29_spill] sm:$0xff] }
 0x482   : > { %v7425_v30 = vmul.f32 0.5, %v5748_v39  ;;  %v2713_v41 = vpop.f32.mrb[4].mxu1  ;;  %2986 = vmax.xlane.f32.xlu1 %v2985_v6  ;;  %v9352_v39 = vld [vmem:[#allocation30_spill] sm:$0xff] }
 0x483   : > { %v5749_v37 = vadd.f32 %v2713_v41, %v9345_v28  ;;  %v2715_v0 = vpop.f32.mrb[5].mxu1 }
 0x484   : > { %v5750_v16 = vadd.f32 %v2715_v0, %v9346_v45  ;;  %v2988_v33 = vmax.f32 %v7423_v35, %v7425_v30  ;;  %v9353_v45 = vld [vmem:[#allocation31_spill] sm:$0xff] }
 0x485   : > { %v7431_v47 = vmul.f32 0.5, %v5749_v37 }
 0x486   : > { %v7433_v36 = vmul.f32 0.5, %v5750_v16  ;;  %v2720_v38 = vpop.f32.mrb[6].mxu1  ;;  %2989 = vmax.xlane.f32.xlu0 %v2988_v33 }
 0x487   : > { %v5751_v8 = vadd.f32 %v2720_v38, %v9347_v12  ;;  %v2722_v23 = vpop.f32.mrb[7].mxu1  ;;  %v9354_v38 = vld [vmem:[#allocation32_spill] sm:$0xff] }
 0x488   : > { %v5752_v21 = vadd.f32 %v2722_v23, %v9348_v40  ;;  %v2991_v44 = vmax.f32 %v7431_v47, %v7433_v36 }
 0x489   : > { %v7439_v58 = vmul.f32 0.5, %v5751_v8 }
 0x48a   : > { %v7441_v42 = vmul.f32 0.5, %v5752_v21  ;;  %v2727_v62 = vpop.f32.mrb[8].mxu1  ;;  %2992 = vmax.xlane.f32.xlu1 %v2991_v44  ;;  %v9355_v44 = vld [vmem:[#allocation33_spill] sm:$0xff] }
 0x48b   : > { %v5753_v56 = vadd.f32 %v2727_v62, %v9349_v1  ;;  %v2729_v46 = vpop.f32.mrb[9].mxu1 }
 0x48c   : > { %v5754_v59 = vadd.f32 %v2729_v46, %v9350_v54  ;;  %v2994_v3 = vmax.f32 %v7439_v58, %v7441_v42 }
 0x48d   : > { %v7447_v9 = vmul.f32 0.5, %v5753_v56  ;;  %v9356_v56 = vld [vmem:[#allocation34_spill] sm:$0xff] }
 0x48e   : > { %v7449_v32 = vmul.f32 0.5, %v5754_v59  ;;  %v2734_v48 = vpop.f32.mrb[10].mxu1  ;;  %2995 = vmax.xlane.f32.xlu1 %v2994_v3 }
 0x48f   : > { %v5755_v10 = vadd.f32 %v2734_v48, %v9351_v57  ;;  %v2736_v25 = vpop.f32.mrb[11].mxu1  ;;  %v9357_v57 = vld [vmem:[#allocation35_spill] sm:$0xff] }
 0x490   : > { %v5756_v6 = vadd.f32 %v2736_v25, %v9352_v39  ;;  %v2997_v41 = vmax.f32 %v7447_v9, %v7449_v32  ;;  %v9358_v39 = vld [vmem:[#allocation36_spill] sm:$0xff] }
 0x491   : > { %v7455_v28 = vmul.f32 0.5, %v5755_v10 }
 0x492   : > { %v7457_v37 = vmul.f32 0.5, %v5756_v6  ;;  %v2741_v0 = vpop.f32.mrb[12].mxu1  ;;  %2998 = vmax.xlane.f32.xlu1 %v2997_v41 }
 0x493   : > { %v5757_v16 = vadd.f32 %v2741_v0, %v9353_v45  ;;  %v2743_v33 = vpop.f32.mrb[13].mxu1 }
 0x494   : > { %v5758_v12 = vadd.f32 %v2743_v33, %v9354_v38  ;;  %v3000_v8 = vmax.f32 %v7455_v28, %v7457_v37 }
 0x495   : > { %v7463_v23 = vmul.f32 0.5, %v5757_v16 }
 0x496   : > { %v7465_v40 = vmul.f32 0.5, %v5758_v12  ;;  %v2748_v21 = vpop.f32.mrb[14].mxu1  ;;  %3001 = vmax.xlane.f32.xlu1 %v3000_v8  ;;  %v9359_v12 = vld [vmem:[#allocation37_spill] sm:$0xff] }
 0x497   : > { %v5759_v62 = vadd.f32 %v2748_v21, %v9355_v44  ;;  %v2750_v1 = vpop.f32.mrb[15].mxu1 }
 0x498   : > { %v5760_v46 = vadd.f32 %v2750_v1, %v9356_v56  ;;  %v3003_v54 = vmax.f32 %v7463_v23, %v7465_v40 }
 0x499   : > { %v7471_v59 = vmul.f32 0.5, %v5759_v62 }
 0x49a   : > { %v7473_v3 = vmul.f32 0.5, %v5760_v46  ;;  %v2755_v48 = vpop.f32.mrb[16].mxu1  ;;  %3004 = vmax.xlane.f32.xlu1 %v3003_v54 }
 0x49b   : > { %v5761_v10 = vadd.f32 %v2755_v48, %v9357_v57  ;;  %v2757_v25 = vpop.f32.mrb[17].mxu1 }
 0x49c   : > { %v5762_v6 = vadd.f32 %v2757_v25, %v9358_v39  ;;  %v3006_v41 = vmax.f32 %v7471_v59, %v7473_v3 }
 0x49d   : > { %v7479_v0 = vmul.f32 0.5, %v5761_v10 }
 0x49e   : > { %v7481_v45 = vmul.f32 0.5, %v5762_v6  ;;  %v2762_v16 = vpop.f32.mrb[18].mxu1  ;;  %3007 = vmax.xlane.f32.xlu1 %v3006_v41  ;;  %v9360_v6 = vld [vmem:[#allocation38_spill] sm:$0xff] }
 0x49f   : > { %v5763_v33 = vadd.f32 %v2762_v16, %v7094_v49  ;;  %v2764_v38 = vpop.f32.mrb[19].mxu1 }
 0x4a0   : > { %v5764_v8 = vadd.f32 %v2764_v38, %v9359_v12  ;;  %v3009_v21 = vmax.f32 %v7479_v0, %v7481_v45 }
 0x4a1   : > { %v7487_v44 = vmul.f32 0.5, %v5763_v33 }
 0x4a2   : > { %v7489_v62 = vmul.f32 0.5, %v5764_v8  ;;  %v2769_v1 = vpop.f32.mrb[20].mxu1  ;;  %3010 = vmax.xlane.f32.xlu1 %v3009_v21  ;;  %v9361_v8 = vld [vmem:[#allocation39_spill] sm:$0xff] }
 0x4a3   : > { %v5765_v56 = vadd.f32 %v2769_v1, %v7104_v51  ;;  %v2771_v46 = vpop.f32.mrb[21].mxu1 }
 0x4a4   : > { %v5766_v54 = vadd.f32 %v2771_v46, %v7106_v20  ;;  %v3012_v49 = vmax.f32 %v7487_v44, %v7489_v62 }
 0x4a5   : > { %v7495_v48 = vmul.f32 0.5, %v5765_v56 }
 0x4a6   : > { %v7497_v57 = vmul.f32 0.5, %v5766_v54  ;;  %v2776_v10 = vpop.f32.mrb[22].mxu1  ;;  %3013 = vmax.xlane.f32.xlu1 %v3012_v49 }
 0x4a7   : > { %v5767_v25 = vadd.f32 %v2776_v10, %v7111_v13  ;;  %v2778_v39 = vpop.f32.mrb[23].mxu1  ;;  %v9362_v10 = vld [vmem:[#allocation40_spill] sm:$0xff] }
 0x4a8   : > { %v5768_v41 = vadd.f32 %v2778_v39, %v9360_v6  ;;  %v3015_v51 = vmax.f32 %v7495_v48, %v7497_v57 }
 0x4a9   : > { %v7503_v16 = vmul.f32 0.5, %v5767_v25 }
 0x4aa   : > { %v7505_v20 = vmul.f32 0.5, %v5768_v41  ;;  %v2783_v33 = vpop.f32.mrb[24].mxu1  ;;  %3016 = vmax.xlane.f32.xlu1 %v3015_v51 }
 0x4ab   : > { %v5769_v38 = vadd.f32 %v2783_v33, %v7118_v53  ;;  %v2785_v12 = vpop.f32.mrb[25].mxu1 }
 0x4ac   : > { %v5770_v21 = vadd.f32 %v2785_v12, %v9361_v8  ;;  %v3018_v13 = vmax.f32 %v7503_v16, %v7505_v20 }
 0x4ad   : > { %v7511_v1 = vmul.f32 0.5, %v5769_v38  ;;  %v9363_v38 = vld [vmem:[#allocation41_spill] sm:$0xff] }
 0x4ae   : > { %v7513_v56 = vmul.f32 0.5, %v5770_v21  ;;  %v2790_v46 = vpop.f32.mrb[26].mxu1  ;;  %3019 = vmax.xlane.f32.xlu0 %v3018_v13 }
 0x4af   : > { %v5771_v54 = vadd.f32 %v2790_v46, %v7125_v61  ;;  %v2792_v49 = vpop.f32.mrb[27].mxu1 }
 0x4b0   : > { %v5772_v25 = vadd.f32 %v2792_v49, %v9362_v10  ;;  %v3021_v53 = vmax.f32 %v7511_v1, %v7513_v56  ;;  %v9364_v49 = vld [vmem:[#allocation42_spill] sm:$0xff] }
 0x4b1   : > { %v7519_v39 = vmul.f32 0.5, %v5771_v54 }
 0x4b2   : > { %v7521_v6 = vmul.f32 0.5, %v5772_v25  ;;  %v2797_v41 = vpop.f32.mrb[28].mxu1  ;;  %3022 = vmax.xlane.f32.xlu1 %v3021_v53 }
 0x4b3   : > { %v5773_v51 = vadd.f32 %v2797_v41, %v7132_v4  ;;  %v2799_v33 = vpop.f32.mrb[29].mxu1 }
 0x4b4   : > { %v5774_v12 = vadd.f32 %v2799_v33, %v9363_v38  ;;  %v3024_v61 = vmax.f32 %v7519_v39, %v7521_v6  ;;  %v9366_v38 = vld [vmem:[#allocation43_spill] sm:$0xff] }
 0x4b5   : > { %v7527_v8 = vmul.f32 0.5, %v5773_v51 }
 0x4b6   : > { %v7529_v21 = vmul.f32 0.5, %v5774_v12  ;;  %v2804_v13 = vpop.f32.mrb[30].mxu1  ;;  %3025 = vmax.xlane.f32.xlu0 %v3024_v61 }
 0x4b7   : > { %v5775_v46 = vadd.f32 %v2804_v13, %v7139_v11  ;;  %v2806_v54 = vpop.f32.mrb[31].mxu1 }
 0x4b8   : > { %v5776_v10 = vadd.f32 %v2806_v54, %v9364_v49  ;;  %v3027_v4 = vmax.f32 %v7527_v8, %v7529_v21 }
 0x4b9   : > { %v7535_v25 = vmul.f32 0.5, %v5775_v46 }
 0x4ba   : > { %v7537_v53 = vmul.f32 0.5, %v5776_v10  ;;  %v2811_v41 = vpop.f32.mrb[32].mxu1  ;;  %3028 = vmax.xlane.f32.xlu1 %v3027_v4  ;;  %v9368_v10 = vld [vmem:[#allocation44_spill] sm:$0xff] }
 0x4bb   : > { %v5777_v51 = vadd.f32 %v2811_v41, %v7146_v19  ;;  %v2813_v33 = vpop.f32.mrb[33].mxu1 }
 0x4bc   : > { %9365 = vst [vmem:[#allocation10_spill] sm:$0xff] %v7537_v53  ;;  %v5778_v12 = vadd.f32 %v2813_v33, %v9366_v38  ;;  %v3030_v11 = vmax.f32 %v7535_v25, %v7537_v53 }
 0x4bd   : > { %v7543_v61 = vmul.f32 0.5, %v5777_v51 }
 0x4be   : > { %v7545_v13 = vmul.f32 0.5, %v5778_v12  ;;  %v2818_v54 = vpop.f32.mrb[34].mxu1  ;;  %3031 = vmax.xlane.f32.xlu0 %v3030_v11  ;;  %v9370_v12 = vld [vmem:[#allocation45_spill] sm:$0xff] }
 0x4bf   : > { %v5779_v46 = vadd.f32 %v2818_v54, %v7153_v27  ;;  %v2820_v49 = vpop.f32.mrb[35].mxu1 }
 0x4c0   : > { %9367 = vst [vmem:[#allocation8_spill] sm:$0xff] %v7545_v13  ;;  %v5780_v43 = vadd.f32 %v2820_v49, %v9368_v10  ;;  %v3033_v19 = vmax.f32 %v7543_v61, %v7545_v13  ;;  %v9372_v10 = vld [vmem:[#allocation46_spill] sm:$0xff] }
 0x4c1   : > { %v7551_v4 = vmul.f32 0.5, %v5779_v46 }
 0x4c2   : > { %v7553_v41 = vmul.f32 0.5, %v5780_v43  ;;  %v2825_v33 = vpop.f32.mrb[36].mxu1  ;;  %3034 = vmax.xlane.f32.xlu1 %v3033_v19 }
 0x4c3   : > { %v5781_v51 = vadd.f32 %v2825_v33, %v7160_v34  ;;  %v2827_v38 = vpop.f32.mrb[37].mxu1 }
 0x4c4   : > { %9369 = vst [vmem:[#allocation9_spill] sm:$0xff] %v7553_v41  ;;  %v5782_v53 = vadd.f32 %v2827_v38, %v9370_v12  ;;  %v3036_v27 = vmax.f32 %v7551_v4, %v7553_v41  ;;  %v9374_v12 = vld [vmem:[#allocation47_spill] sm:$0xff] }
 0x4c5   : > { %v7559_v11 = vmul.f32 0.5, %v5781_v51 }
 0x4c6   : > { %v7561_v54 = vmul.f32 0.5, %v5782_v53  ;;  %v2832_v49 = vpop.f32.mrb[38].mxu1  ;;  %3037 = vmax.xlane.f32.xlu0 %v3036_v27 }
 0x4c7   : > { %v5783_v46 = vadd.f32 %v2832_v49, %v7167_v50  ;;  %v2834_v43 = vpop.f32.mrb[39].mxu1 }
 0x4c8   : > { %9371 = vst [vmem:[#allocation11_spill] sm:$0xff] %v7561_v54  ;;  %v5784_v13 = vadd.f32 %v2834_v43, %v9372_v10  ;;  %v3039_v34 = vmax.f32 %v7559_v11, %v7561_v54  ;;  %v9376_v10 = vld [vmem:[#allocation48_spill] sm:$0xff] }
 0x4c9   : > { %v7567_v19 = vmul.f32 0.5, %v5783_v46 }
 0x4ca   : > { %v7569_v33 = vmul.f32 0.5, %v5784_v13  ;;  %v2839_v38 = vpop.f32.mrb[40].mxu1  ;;  %3040 = vmax.xlane.f32.xlu1 %v3039_v34 }
 0x4cb   : > { %v5785_v51 = vadd.f32 %v2839_v38, %v7174_v63  ;;  %v2841_v53 = vpop.f32.mrb[41].mxu1 }
 0x4cc   : > { %9373 = vst [vmem:[#allocation12_spill] sm:$0xff] %v7569_v33  ;;  %v5786_v41 = vadd.f32 %v2841_v53, %v9374_v12  ;;  %v3042_v50 = vmax.f32 %v7567_v19, %v7569_v33  ;;  %v9378_v12 = vld [vmem:[#allocation49_spill] sm:$0xff] }
 0x4cd   : > { %v7575_v27 = vmul.f32 0.5, %v5785_v51 }
 0x4ce   : > { %v7577_v49 = vmul.f32 0.5, %v5786_v41  ;;  %v2846_v43 = vpop.f32.mrb[42].mxu1  ;;  %3043 = vmax.xlane.f32.xlu0 %v3042_v50 }
 0x4cf   : > { %v5787_v46 = vadd.f32 %v2846_v43, %v7181_v14  ;;  %v2848_v13 = vpop.f32.mrb[43].mxu1 }
 0x4d0   : > { %9375 = vst [vmem:[#allocation13_spill] sm:$0xff] %v7577_v49  ;;  %v5788_v54 = vadd.f32 %v2848_v13, %v9376_v10  ;;  %v3045_v63 = vmax.f32 %v7575_v27, %v7577_v49  ;;  %v9380_v10 = vld [vmem:[#allocation50_spill] sm:$0xff] }
 0x4d1   : > { %v7583_v34 = vmul.f32 0.5, %v5787_v46 }
 0x4d2   : > { %v7585_v38 = vmul.f32 0.5, %v5788_v54  ;;  %v2853_v53 = vpop.f32.mrb[44].mxu1  ;;  %3046 = vmax.xlane.f32.xlu1 %v3045_v63 }
 0x4d3   : > { %v5789_v51 = vadd.f32 %v2853_v53, %v7188_v29  ;;  %v2855_v41 = vpop.f32.mrb[45].mxu1 }
 0x4d4   : > { %9377 = vst [vmem:[#allocation14_spill] sm:$0xff] %v7585_v38  ;;  %v5790_v33 = vadd.f32 %v2855_v41, %v9378_v12  ;;  %v3048_v14 = vmax.f32 %v7583_v34, %v7585_v38  ;;  %v9382_v12 = vld [vmem:[#allocation51_spill] sm:$0xff] }
 0x4d5   : > { %v7591_v50 = vmul.f32 0.5, %v5789_v51 }
 0x4d6   : > { %v7593_v43 = vmul.f32 0.5, %v5790_v33  ;;  %v2860_v13 = vpop.f32.mrb[46].mxu1  ;;  %3049 = vmax.xlane.f32.xlu0 %v3048_v14 }
 0x4d7   : > { %v5791_v46 = vadd.f32 %v2860_v13, %v7195_v52  ;;  %v2862_v54 = vpop.f32.mrb[47].mxu1 }
 0x4d8   : > { %9379 = vst [vmem:[#allocation15_spill] sm:$0xff] %v7593_v43  ;;  %v5792_v49 = vadd.f32 %v2862_v54, %v9380_v10  ;;  %v3051_v29 = vmax.f32 %v7591_v50, %v7593_v43  ;;  %v9384_v10 = vld [vmem:[#allocation52_spill] sm:$0xff] }
 0x4d9   : > { %v7599_v63 = vmul.f32 0.5, %v5791_v46 }
 0x4da   : > { %v7601_v53 = vmul.f32 0.5, %v5792_v49  ;;  %v2867_v41 = vpop.f32.mrb[48].mxu1  ;;  %3052 = vmax.xlane.f32.xlu1 %v3051_v29 }
 0x4db   : > { %v5793_v51 = vadd.f32 %v2867_v41, %v7202_v15  ;;  %v2869_v33 = vpop.f32.mrb[49].mxu1 }
 0x4dc   : > { %9381 = vst [vmem:[#allocation16_spill] sm:$0xff] %v7601_v53  ;;  %v5794_v38 = vadd.f32 %v2869_v33, %v9382_v12  ;;  %v3054_v52 = vmax.f32 %v7599_v63, %v7601_v53  ;;  %v9386_v12 = vld [vmem:[#allocation53_spill] sm:$0xff] }
 0x4dd   : > { %v7607_v14 = vmul.f32 0.5, %v5793_v51 }
 0x4de   : > { %v7609_v13 = vmul.f32 0.5, %v5794_v38  ;;  %v2874_v54 = vpop.f32.mrb[50].mxu1  ;;  %3055 = vmax.xlane.f32.xlu0 %v3054_v52 }
 0x4df   : > { %v5795_v46 = vadd.f32 %v2874_v54, %v7209_v60  ;;  %v2876_v49 = vpop.f32.mrb[51].mxu1 }
 0x4e0   : > { %9383 = vst [vmem:[#allocation17_spill] sm:$0xff] %v7609_v13  ;;  %v5796_v43 = vadd.f32 %v2876_v49, %v9384_v10  ;;  %v3057_v15 = vmax.f32 %v7607_v14, %v7609_v13  ;;  %v9388_v10 = vld [vmem:[#allocation54_spill] sm:$0xff] }
 0x4e1   : > { %v7615_v29 = vmul.f32 0.5, %v5795_v46 }
 0x4e2   : > { %v7617_v41 = vmul.f32 0.5, %v5796_v43  ;;  %v2881_v33 = vpop.f32.mrb[52].mxu1  ;;  %3058 = vmax.xlane.f32.xlu1 %v3057_v15 }
 0x4e3   : > { %v5797_v51 = vadd.f32 %v2881_v33, %v7216_v22  ;;  %v2883_v38 = vpop.f32.mrb[53].mxu1 }
 0x4e4   : > { %9385 = vst [vmem:[#allocation18_spill] sm:$0xff] %v7617_v41  ;;  %v5798_v53 = vadd.f32 %v2883_v38, %v9386_v12  ;;  %v3060_v60 = vmax.f32 %v7615_v29, %v7617_v41  ;;  %v9389_v12 = vld [vmem:[#allocation55_spill] sm:$0xff] }
 0x4e5   : > { %v7623_v52 = vmul.f32 0.5, %v5797_v51 }
 0x4e6   : > { %v7625_v54 = vmul.f32 0.5, %v5798_v53  ;;  %v2888_v49 = vpop.f32.mrb[54].mxu1  ;;  %3061 = vmax.xlane.f32.xlu0 %v3060_v60 }
 0x4e7   : > { %v5799_v46 = vadd.f32 %v2888_v49, %v7223_v26  ;;  %v2890_v43 = vpop.f32.mrb[55].mxu1 }
 0x4e8   : > { %9387 = vst [vmem:[#allocation19_spill] sm:$0xff] %v7625_v54  ;;  %v5800_v13 = vadd.f32 %v2890_v43, %v9388_v10  ;;  %v3063_v22 = vmax.f32 %v7623_v52, %v7625_v54  ;;  %v9390_v10 = vld [vmem:[#allocation56_spill] sm:$0xff] }
 0x4e9   : > { %v7631_v15 = vmul.f32 0.5, %v5799_v46 }
 0x4ea   : > { %v7633_v33 = vmul.f32 0.5, %v5800_v13  ;;  %v2895_v38 = vpop.f32.mrb[56].mxu1  ;;  %3064 = vmax.xlane.f32.xlu1 %v3063_v22 }
 0x4eb   : > { %v5801_v51 = vadd.f32 %v2895_v38, %v7230_v7  ;;  %v2897_v53 = vpop.f32.mrb[57].mxu1 }
 0x4ec   : > { %v5802_v41 = vadd.f32 %v2897_v53, %v9389_v12  ;;  %v3066_v26 = vmax.f32 %v7631_v15, %v7633_v33 }
 0x4ed   : > { %v7639_v60 = vmul.f32 0.5, %v5801_v51 }
 0x4ee   : > { %v7641_v49 = vmul.f32 0.5, %v5802_v41  ;;  %v2902_v43 = vpop.f32.mrb[58].mxu1  ;;  %3067 = vmax.xlane.f32.xlu0 %v3066_v26 }
 0x4ef   : > { %v5803_v46 = vadd.f32 %v2902_v43, %v7237_v31  ;;  %v2904_v13 = vpop.f32.mrb[59].mxu1 }
 0x4f0   : > { %v5804_v54 = vadd.f32 %v2904_v13, %v9390_v10  ;;  %v3069_v7 = vmax.f32 %v7639_v60, %v7641_v49 }
 0x4f1   : > { %v7647_v22 = vmul.f32 0.5, %v5803_v46 }
 0x4f2   : > { %v7649_v38 = vmul.f32 0.5, %v5804_v54  ;;  %v2909_v53 = vpop.f32.mrb[60].mxu1  ;;  %3070 = vmax.xlane.f32.xlu1 %v3069_v7 }
 0x4f3   : > { %v5805_v51 = vadd.f32 %v2909_v53, %v7244_v18  ;;  %v2911_v41 = vpop.f32.mrb[61].mxu1 }
 0x4f4   : > { %v5806_v12 = vadd.f32 %v2911_v41, %v7246_v5  ;;  %v3072_v31 = vmax.f32 %v7647_v22, %v7649_v38 }
 0x4f5   : > { %v7655_v26 = vmul.f32 0.5, %v5805_v51 }
 0x4f6   : > { %v7657_v43 = vmul.f32 0.5, %v5806_v12  ;;  %v2916_v13 = vpop.f32.mrb[62].mxu1  ;;  %3073 = vmax.xlane.f32.xlu0 %v3072_v31 }
 0x4f7   : > { %v5807_v46 = vadd.f32 %v2916_v13, %v7251_v2  ;;  %v2918_v54 = vpop.f32.mrb[63].mxu1 }
 0x4f8   : > { %v5808_v10 = vadd.f32 %v2918_v54, %v7253_v55  ;;  %v3075_v18 = vmax.f32 %v7655_v26, %v7657_v43 }
 0x4f9   : > { %v7663_v7 = vmul.f32 0.5, %v5807_v46 }
 0x4fa   : > { %v7665_v5 = vmul.f32 0.5, %v5808_v10  ;;  %3076 = vmax.xlane.f32.xlu1 %v3075_v18 }
 0x4fc   : > { %9391 = vst [vmem:[#allocation20_spill] sm:$0xff] %v7665_v5  ;;  %v3078_v53 = vmax.f32 %v7663_v7, %v7665_v5 }
 0x4fe   : > { %3079 = vmax.xlane.f32.xlu0 %v3078_v53 }
 0x50f   : > { %v2987_v51 = vpop.xlane.xlu1 %2986 }
 0x510   : > { %v3081_v41 = vsub.f32 %v7415_v17, %v2987_v51  ;;  %v3082_v2 = vsub.f32 %v7417_v24, %v2987_v51 }
 0x512   : > { %v3145_v12 = vmul.f32 1.442695, %v3081_v41  ;;  %v3147_v31 = vmul.f32 1.442695, %v3082_v2 }
 0x513   : > { %v2990_v55 = vpop.xlane.xlu0 %2989 }
 0x514   : > { %6151 = vpow2.f32 %v3145_v12  ;;  %v3083_v13 = vsub.f32 %v7423_v35, %v2990_v55  ;;  %v3084_v46 = vsub.f32 %v7425_v30, %v2990_v55 }
 0x515   : > { %6153 = vpow2.f32 %v3147_v31 }
 0x516   : > { %v3149_v54 = vmul.f32 1.442695, %v3083_v13  ;;  %v3151_v10 = vmul.f32 1.442695, %v3084_v46 }
 0x517   : > { %v2993_v18 = vpop.xlane.xlu1 %2992 }
 0x518   : > { %6155 = vpow2.f32 %v3149_v54  ;;  %v3085_v53 = vsub.f32 %v7431_v47, %v2993_v18  ;;  %v3086_v5 = vsub.f32 %v7433_v36, %v2993_v18 }
 0x519   : > { %6157 = vpow2.f32 %v3151_v10 }
 0x51a   : > { %v3153_v17 = vmul.f32 1.442695, %v3085_v53  ;;  %v3155_v24 = vmul.f32 1.442695, %v3086_v5 }
 0x51b   : > { %v2996_v51 = vpop.xlane.xlu1 %2995 }
 0x51c   : > { %6159 = vpow2.f32 %v3153_v17  ;;  %v3087_v41 = vsub.f32 %v7439_v58, %v2996_v51  ;;  %v3088_v35 = vsub.f32 %v7441_v42, %v2996_v51 }
 0x51d   : > { %6161 = vpow2.f32 %v3155_v24 }
 0x51e   : > { %v7677_v30 = vpop.eup %6151  ;;  %v3157_v2 = vmul.f32 1.442695, %v3087_v41  ;;  %v3159_v12 = vmul.f32 1.442695, %v3088_v35 }
 0x51f   : > { %v7679_v31 = vpop.eup %6153  ;;  %v2999_v55 = vpop.xlane.xlu1 %2998 }
 0x520   : > { %6163 = vpow2.f32 %v3157_v2  ;;  %v3089_v47 = vsub.f32 %v7447_v9, %v2999_v55  ;;  %v3090_v36 = vsub.f32 %v7449_v32, %v2999_v55  ;;  %v3273_v5 = vadd.f32 %v7679_v31, %v7677_v30 }
 0x521   : > { %6165 = vpow2.f32 %v3159_v12 }
 0x522   : > { %v7685_v58 = vpop.eup %6155  ;;  %v3161_v42 = vmul.f32 1.442695, %v3089_v47  ;;  %v3163_v13 = vmul.f32 1.442695, %v3090_v36  ;;  %3274 = vadd.xlane.f32.xlu1 %v3273_v5 }
 0x523   : > { %v7687_v46 = vpop.eup %6157  ;;  %v3002_v54 = vpop.xlane.xlu1 %3001 }
 0x524   : > { %6167 = vpow2.f32 %v3161_v42  ;;  %v3091_v10 = vsub.f32 %v7455_v28, %v3002_v54  ;;  %v3092_v18 = vsub.f32 %v7457_v37, %v3002_v54  ;;  %v3276_v9 = vadd.f32 %v7687_v46, %v7685_v58 }
 0x525   : > { %6169 = vpow2.f32 %v3163_v13 }
 0x526   : > { %v7693_v32 = vpop.eup %6159  ;;  %v3165_v53 = vmul.f32 1.442695, %v3091_v10  ;;  %v3167_v17 = vmul.f32 1.442695, %v3092_v18  ;;  %3277 = vadd.xlane.f32.xlu0 %v3276_v9 }
 0x527   : > { %v7695_v24 = vpop.eup %6161  ;;  %v3005_v51 = vpop.xlane.xlu1 %3004 }
 0x528   : > { %6171 = vpow2.f32 %v3165_v53  ;;  %v3093_v41 = vsub.f32 %v7463_v23, %v3005_v51  ;;  %v3094_v35 = vsub.f32 %v7465_v40, %v3005_v51  ;;  %v3279_v28 = vadd.f32 %v7695_v24, %v7693_v32 }
 0x529   : > { %6173 = vpow2.f32 %v3167_v17 }
 0x52a   : > { %v7701_v37 = vpop.eup %6163  ;;  %v3169_v2 = vmul.f32 1.442695, %v3093_v41  ;;  %v3171_v12 = vmul.f32 1.442695, %v3094_v35  ;;  %3280 = vadd.xlane.f32.xlu1 %v3279_v28 }
 0x52b   : > { %v7703_v55 = vpop.eup %6165  ;;  %v3008_v47 = vpop.xlane.xlu1 %3007 }
 0x52c   : > { %6175 = vpow2.f32 %v3169_v2  ;;  %v3095_v36 = vsub.f32 %v7471_v59, %v3008_v47  ;;  %v3096_v5 = vsub.f32 %v7473_v3, %v3008_v47  ;;  %v3282_v23 = vadd.f32 %v7703_v55, %v7701_v37 }
 0x52d   : > { %6177 = vpow2.f32 %v3171_v12 }
 0x52e   : > { %v7709_v40 = vpop.eup %6167  ;;  %v3173_v42 = vmul.f32 1.442695, %v3095_v36  ;;  %v3175_v13 = vmul.f32 1.442695, %v3096_v5  ;;  %3283 = vadd.xlane.f32.xlu0 %v3282_v23 }
 0x52f   : > { %v7711_v54 = vpop.eup %6169  ;;  %v3011_v10 = vpop.xlane.xlu1 %3010 }
 0x530   : > { %6179 = vpow2.f32 %v3173_v42  ;;  %v3097_v18 = vsub.f32 %v7479_v0, %v3011_v10  ;;  %v3098_v9 = vsub.f32 %v7481_v45, %v3011_v10  ;;  %v3285_v59 = vadd.f32 %v7711_v54, %v7709_v40 }
 0x531   : > { %6181 = vpow2.f32 %v3175_v13 }
 0x532   : > { %v7717_v3 = vpop.eup %6171  ;;  %v3177_v53 = vmul.f32 1.442695, %v3097_v18  ;;  %v3179_v17 = vmul.f32 1.442695, %v3098_v9  ;;  %3286 = vadd.xlane.f32.xlu1 %v3285_v59 }
 0x533   : > { %v7719_v51 = vpop.eup %6173  ;;  %v3014_v41 = vpop.xlane.xlu1 %3013 }
 0x534   : > { %6183 = vpow2.f32 %v3177_v53  ;;  %v3099_v35 = vsub.f32 %v7487_v44, %v3014_v41  ;;  %v3100_v28 = vsub.f32 %v7489_v62, %v3014_v41  ;;  %v3288_v0 = vadd.f32 %v7719_v51, %v7717_v3 }
 0x535   : > { %6185 = vpow2.f32 %v3179_v17 }
 0x536   : > { %v7725_v45 = vpop.eup %6175  ;;  %v3181_v2 = vmul.f32 1.442695, %v3099_v35  ;;  %v3183_v12 = vmul.f32 1.442695, %v3100_v28  ;;  %3289 = vadd.xlane.f32.xlu0 %v3288_v0 }
 0x537   : > { %v7727_v47 = vpop.eup %6177  ;;  %v3017_v36 = vpop.xlane.xlu1 %3016 }
 0x538   : > { %6187 = vpow2.f32 %v3181_v2  ;;  %v3101_v5 = vsub.f32 %v7495_v48, %v3017_v36  ;;  %v3102_v23 = vsub.f32 %v7497_v57, %v3017_v36  ;;  %v3291_v44 = vadd.f32 %v7727_v47, %v7725_v45 }
 0x539   : > { %6189 = vpow2.f32 %v3183_v12 }
 0x53a   : > { %v7733_v62 = vpop.eup %6179  ;;  %v3185_v42 = vmul.f32 1.442695, %v3101_v5  ;;  %v3187_v13 = vmul.f32 1.442695, %v3102_v23  ;;  %3292 = vadd.xlane.f32.xlu1 %v3291_v44 }
 0x53b   : > { %v7735_v10 = vpop.eup %6181  ;;  %v3020_v18 = vpop.xlane.xlu0 %3019 }
 0x53c   : > { %6191 = vpow2.f32 %v3185_v42  ;;  %v3103_v9 = vsub.f32 %v7503_v16, %v3020_v18  ;;  %v3104_v59 = vsub.f32 %v7505_v20, %v3020_v18  ;;  %v3294_v48 = vadd.f32 %v7735_v10, %v7733_v62 }
 0x53d   : > { %6193 = vpow2.f32 %v3187_v13 }
 0x53e   : > { %v7741_v57 = vpop.eup %6183  ;;  %v3189_v53 = vmul.f32 1.442695, %v3103_v9  ;;  %v3191_v17 = vmul.f32 1.442695, %v3104_v59  ;;  %3295 = vadd.xlane.f32.xlu0 %v3294_v48 }
 0x53f   : > { %v7743_v41 = vpop.eup %6185  ;;  %v3023_v35 = vpop.xlane.xlu1 %3022 }
 0x540   : > { %6195 = vpow2.f32 %v3189_v53  ;;  %v3105_v28 = vsub.f32 %v7511_v1, %v3023_v35  ;;  %v3106_v0 = vsub.f32 %v7513_v56, %v3023_v35  ;;  %v3297_v16 = vadd.f32 %v7743_v41, %v7741_v57 }
 0x541   : > { %6197 = vpow2.f32 %v3191_v17 }
 0x542   : > { %v7749_v20 = vpop.eup %6187  ;;  %v3193_v2 = vmul.f32 1.442695, %v3105_v28  ;;  %v3195_v12 = vmul.f32 1.442695, %v3106_v0  ;;  %3298 = vadd.xlane.f32.xlu1 %v3297_v16  ;;  %v9392_v16 = vld [vmem:[#allocation10_spill] sm:$0xff] }
 0x543   : > { %v7751_v36 = vpop.eup %6189  ;;  %v3026_v5 = vpop.xlane.xlu0 %3025 }
 0x544   : > { %6199 = vpow2.f32 %v3193_v2  ;;  %v3107_v23 = vsub.f32 %v7519_v39, %v3026_v5  ;;  %v3108_v44 = vsub.f32 %v7521_v6, %v3026_v5  ;;  %v3300_v1 = vadd.f32 %v7751_v36, %v7749_v20 }
 0x545   : > { %6201 = vpow2.f32 %v3195_v12 }
 0x546   : > { %v7757_v56 = vpop.eup %6191  ;;  %v3197_v42 = vmul.f32 1.442695, %v3107_v23  ;;  %v3199_v13 = vmul.f32 1.442695, %v3108_v44  ;;  %3301 = vadd.xlane.f32.xlu0 %v3300_v1 }
 0x547   : > { %v7759_v18 = vpop.eup %6193  ;;  %v3029_v9 = vpop.xlane.xlu1 %3028 }
 0x548   : > { %6203 = vpow2.f32 %v3197_v42  ;;  %v3109_v59 = vsub.f32 %v7527_v8, %v3029_v9  ;;  %v3110_v48 = vsub.f32 %v7529_v21, %v3029_v9  ;;  %v3303_v39 = vadd.f32 %v7759_v18, %v7757_v56  ;;  %v9393_v42 = vld [vmem:[#allocation8_spill] sm:$0xff] }
 0x549   : > { %6205 = vpow2.f32 %v3199_v13 }
 0x54a   : > { %v7765_v6 = vpop.eup %6195  ;;  %v3201_v53 = vmul.f32 1.442695, %v3109_v59  ;;  %v3203_v17 = vmul.f32 1.442695, %v3110_v48  ;;  %3304 = vadd.xlane.f32.xlu1 %v3303_v39 }
 0x54b   : > { %v7767_v35 = vpop.eup %6197  ;;  %v3032_v28 = vpop.xlane.xlu0 %3031 }
 0x54c   : > { %6207 = vpow2.f32 %v3201_v53  ;;  %v3111_v0 = vsub.f32 %v7535_v25, %v3032_v28  ;;  %v3112_v2 = vsub.f32 %v9392_v16, %v3032_v28  ;;  %v3306_v8 = vadd.f32 %v7767_v35, %v7765_v6  ;;  %v9394_v28 = vld [vmem:[#allocation9_spill] sm:$0xff] }
 0x54d   : > { %6209 = vpow2.f32 %v3203_v17 }
 0x54e   : > { %v7773_v21 = vpop.eup %6199  ;;  %v3205_v12 = vmul.f32 1.442695, %v3111_v0  ;;  %v3207_v5 = vmul.f32 1.442695, %v3112_v2  ;;  %3307 = vadd.xlane.f32.xlu0 %v3306_v8 }
 0x54f   : > { %v7775_v23 = vpop.eup %6201  ;;  %v3035_v44 = vpop.xlane.xlu1 %3034 }
 0x550   : > { %6211 = vpow2.f32 %v3205_v12  ;;  %v3113_v1 = vsub.f32 %v7543_v61, %v3035_v44  ;;  %v3114_v13 = vsub.f32 %v9393_v42, %v3035_v44  ;;  %v3309_v25 = vadd.f32 %v7775_v23, %v7773_v21 }
 0x551   : > { %6213 = vpow2.f32 %v3207_v5 }
 0x552   : > { %v7781_v9 = vpop.eup %6203  ;;  %v3209_v59 = vmul.f32 1.442695, %v3113_v1  ;;  %v3211_v48 = vmul.f32 1.442695, %v3114_v13  ;;  %3310 = vadd.xlane.f32.xlu1 %v3309_v25  ;;  %v9395_v1 = vld [vmem:[#allocation11_spill] sm:$0xff] }
 0x553   : > { %v7783_v39 = vpop.eup %6205  ;;  %v3038_v53 = vpop.xlane.xlu0 %3037 }
 0x554   : > { %6215 = vpow2.f32 %v3209_v59  ;;  %v3115_v17 = vsub.f32 %v7551_v4, %v3038_v53  ;;  %v3116_v0 = vsub.f32 %v9394_v28, %v3038_v53  ;;  %v3312_v61 = vadd.f32 %v7783_v39, %v7781_v9  ;;  %v9396_v28 = vld [vmem:[#allocation12_spill] sm:$0xff] }
 0x555   : > { %6217 = vpow2.f32 %v3211_v48 }
 0x556   : > { %v7789_v16 = vpop.eup %6207  ;;  %v3213_v2 = vmul.f32 1.442695, %v3115_v17  ;;  %v3215_v8 = vmul.f32 1.442695, %v3116_v0  ;;  %3313 = vadd.xlane.f32.xlu0 %v3312_v61 }
 0x557   : > { %v7791_v12 = vpop.eup %6209  ;;  %v3041_v5 = vpop.xlane.xlu1 %3040 }
 0x558   : > { %6219 = vpow2.f32 %v3213_v2  ;;  %v3117_v44 = vsub.f32 %v7559_v11, %v3041_v5  ;;  %v3118_v42 = vsub.f32 %v9395_v1, %v3041_v5  ;;  %v3315_v4 = vadd.f32 %v7791_v12, %v7789_v16 }
 0x559   : > { %6221 = vpow2.f32 %v3215_v8 }
 0x55a   : > { %v7797_v13 = vpop.eup %6211  ;;  %v3217_v25 = vmul.f32 1.442695, %v3117_v44  ;;  %v3219_v59 = vmul.f32 1.442695, %v3118_v42  ;;  %3316 = vadd.xlane.f32.xlu1 %v3315_v4  ;;  %v9398_v42 = vld [vmem:[#allocation13_spill] sm:$0xff] }
 0x55b   : > { %v7799_v48 = vpop.eup %6213  ;;  %v3044_v53 = vpop.xlane.xlu0 %3043 }
 0x55c   : > { %6223 = vpow2.f32 %v3217_v25  ;;  %v3119_v17 = vsub.f32 %v7567_v19, %v3044_v53  ;;  %v3120_v0 = vsub.f32 %v9396_v28, %v3044_v53  ;;  %v3318_v11 = vadd.f32 %v7799_v48, %v7797_v13 }
 0x55d   : > { %6225 = vpow2.f32 %v3219_v59 }
 0x55e   : > { %v7805_v61 = vpop.eup %6215  ;;  %v3221_v2 = vmul.f32 1.442695, %v3119_v17  ;;  %v3223_v8 = vmul.f32 1.442695, %v3120_v0  ;;  %3319 = vadd.xlane.f32.xlu0 %v3318_v11  ;;  %v9400_v11 = vld [vmem:[#allocation14_spill] sm:$0xff] }
 0x55f   : > { %9397 = vst [vmem:[#allocation21_spill] sm:$0xff] %v7805_v61  ;;  %v7807_v5 = vpop.eup %6217  ;;  %v3047_v44 = vpop.xlane.xlu1 %3046 }
 0x560   : > { %6227 = vpow2.f32 %v3221_v2  ;;  %v3121_v1 = vsub.f32 %v7575_v27, %v3047_v44  ;;  %v3122_v4 = vsub.f32 %v9398_v42, %v3047_v44  ;;  %v3321_v19 = vadd.f32 %v7807_v5, %v7805_v61 }
 0x561   : > { %6229 = vpow2.f32 %v3223_v8 }
 0x562   : > { %v7813_v25 = vpop.eup %6219  ;;  %v3225_v59 = vmul.f32 1.442695, %v3121_v1  ;;  %v3227_v53 = vmul.f32 1.442695, %v3122_v4  ;;  %3322 = vadd.xlane.f32.xlu1 %v3321_v19 }
 0x563   : > { %9399 = vst [vmem:[#allocation22_spill] sm:$0xff] %v7813_v25  ;;  %v7815_v17 = vpop.eup %6221  ;;  %v3050_v28 = vpop.xlane.xlu0 %3049 }
 0x564   : > { %6231 = vpow2.f32 %v3225_v59  ;;  %v3123_v0 = vsub.f32 %v7583_v34, %v3050_v28  ;;  %v3124_v2 = vsub.f32 %v9400_v11, %v3050_v28  ;;  %v3324_v27 = vadd.f32 %v7815_v17, %v7813_v25  ;;  %v9402_v59 = vld [vmem:[#allocation15_spill] sm:$0xff] }
 0x565   : > { %6233 = vpow2.f32 %v3227_v53 }
 0x566   : > { %v7821_v44 = vpop.eup %6223  ;;  %v3229_v8 = vmul.f32 1.442695, %v3123_v0  ;;  %v3231_v42 = vmul.f32 1.442695, %v3124_v2  ;;  %3325 = vadd.xlane.f32.xlu0 %v3324_v27 }
 0x567   : > { %9401 = vst [vmem:[#allocation23_spill] sm:$0xff] %v7821_v44  ;;  %v7823_v1 = vpop.eup %6225  ;;  %v3053_v4 = vpop.xlane.xlu1 %3052 }
 0x568   : > { %6235 = vpow2.f32 %v3229_v8  ;;  %v3125_v19 = vsub.f32 %v7591_v50, %v3053_v4  ;;  %v3126_v61 = vsub.f32 %v9402_v59, %v3053_v4  ;;  %v3327_v34 = vadd.f32 %v7823_v1, %v7821_v44  ;;  %v9404_v8 = vld [vmem:[#allocation16_spill] sm:$0xff] }
 0x569   : > { %6237 = vpow2.f32 %v3231_v42 }
 0x56a   : > { %v7829_v28 = vpop.eup %6227  ;;  %v3233_v53 = vmul.f32 1.442695, %v3125_v19  ;;  %v3235_v11 = vmul.f32 1.442695, %v3126_v61  ;;  %3328 = vadd.xlane.f32.xlu1 %v3327_v34 }
 0x56b   : > { %9403 = vst [vmem:[#allocation24_spill] sm:$0xff] %v7829_v28  ;;  %v7831_v0 = vpop.eup %6229  ;;  %v3056_v2 = vpop.xlane.xlu0 %3055 }
 0x56c   : > { %6239 = vpow2.f32 %v3233_v53  ;;  %v3127_v27 = vsub.f32 %v7599_v63, %v3056_v2  ;;  %v3128_v25 = vsub.f32 %v9404_v8, %v3056_v2  ;;  %v3330_v50 = vadd.f32 %v7831_v0, %v7829_v28  ;;  %v9406_v53 = vld [vmem:[#allocation17_spill] sm:$0xff] }
 0x56d   : > { %6241 = vpow2.f32 %v3235_v11 }
 0x56e   : > { %v7837_v4 = vpop.eup %6231  ;;  %v3237_v42 = vmul.f32 1.442695, %v3127_v27  ;;  %v3239_v59 = vmul.f32 1.442695, %v3128_v25  ;;  %3331 = vadd.xlane.f32.xlu0 %v3330_v50 }
 0x56f   : > { %9405 = vst [vmem:[#allocation25_spill] sm:$0xff] %v7837_v4  ;;  %v7839_v19 = vpop.eup %6233  ;;  %v3059_v61 = vpop.xlane.xlu1 %3058 }
 0x570   : > { %6243 = vpow2.f32 %v3237_v42  ;;  %v3129_v34 = vsub.f32 %v7607_v14, %v3059_v61  ;;  %v3130_v44 = vsub.f32 %v9406_v53, %v3059_v61  ;;  %v3333_v63 = vadd.f32 %v7839_v19, %v7837_v4  ;;  %v9407_v42 = vld [vmem:[#allocation18_spill] sm:$0xff] }
 0x571   : > { %6245 = vpow2.f32 %v3239_v59 }
 0x572   : > { %v7845_v2 = vpop.eup %6235  ;;  %v3241_v11 = vmul.f32 1.442695, %v3129_v34  ;;  %v3243_v8 = vmul.f32 1.442695, %v3130_v44  ;;  %3334 = vadd.xlane.f32.xlu1 %v3333_v63 }
 0x573   : > { %v7847_v27 = vpop.eup %6237  ;;  %v3062_v25 = vpop.xlane.xlu0 %3061 }
 0x574   : > { %6247 = vpow2.f32 %v3241_v11  ;;  %v3131_v50 = vsub.f32 %v7615_v29, %v3062_v25  ;;  %v3132_v28 = vsub.f32 %v9407_v42, %v3062_v25  ;;  %v3336_v14 = vadd.f32 %v7847_v27, %v7845_v2  ;;  %v9408_v11 = vld [vmem:[#allocation19_spill] sm:$0xff] }
 0x575   : > { %6249 = vpow2.f32 %v3243_v8 }
 0x576   : > { %v7853_v61 = vpop.eup %6239  ;;  %v3245_v59 = vmul.f32 1.442695, %v3131_v50  ;;  %v3247_v53 = vmul.f32 1.442695, %v3132_v28  ;;  %3337 = vadd.xlane.f32.xlu0 %v3336_v14 }
 0x577   : > { %v7855_v34 = vpop.eup %6241  ;;  %v3065_v44 = vpop.xlane.xlu1 %3064 }
 0x578   : > { %6251 = vpow2.f32 %v3245_v59  ;;  %v3133_v63 = vsub.f32 %v7623_v52, %v3065_v44  ;;  %v3134_v4 = vsub.f32 %v9408_v11, %v3065_v44  ;;  %v3339_v29 = vadd.f32 %v7855_v34, %v7853_v61 }
 0x579   : > { %6253 = vpow2.f32 %v3247_v53 }
 0x57a   : > { %v7861_v25 = vpop.eup %6243  ;;  %v3249_v8 = vmul.f32 1.442695, %v3133_v63  ;;  %v3251_v42 = vmul.f32 1.442695, %v3134_v4  ;;  %3340 = vadd.xlane.f32.xlu1 %v3339_v29 }
 0x57b   : > { %v7863_v50 = vpop.eup %6245  ;;  %v3068_v28 = vpop.xlane.xlu0 %3067 }
 0x57c   : > { %6255 = vpow2.f32 %v3249_v8  ;;  %v3135_v14 = vsub.f32 %v7631_v15, %v3068_v28  ;;  %v3136_v59 = vsub.f32 %v7633_v33, %v3068_v28  ;;  %v3342_v52 = vadd.f32 %v7863_v50, %v7861_v25 }
 0x57d   : > { %6257 = vpow2.f32 %v3251_v42 }
 0x57e   : > { %v7869_v44 = vpop.eup %6247  ;;  %v3253_v53 = vmul.f32 1.442695, %v3135_v14  ;;  %v3255_v11 = vmul.f32 1.442695, %v3136_v59  ;;  %3343 = vadd.xlane.f32.xlu0 %v3342_v52 }
 0x57f   : > { %9409 = vst [vmem:[#allocation26_spill] sm:$0xff] %v7869_v44  ;;  %v7871_v63 = vpop.eup %6249  ;;  %v3071_v4 = vpop.xlane.xlu1 %3070 }
 0x580   : > { %9410 = vst [vmem:[#allocation27_spill] sm:$0xff] %v7871_v63  ;;  %6259 = vpow2.f32 %v3253_v53  ;;  %v3137_v29 = vsub.f32 %v7639_v60, %v3071_v4  ;;  %v3138_v8 = vsub.f32 %v7641_v49, %v3071_v4  ;;  %v3345_v15 = vadd.f32 %v7871_v63, %v7869_v44 }
 0x581   : > { %6261 = vpow2.f32 %v3255_v11 }
 0x582   : > { %v7877_v33 = vpop.eup %6251  ;;  %v3257_v42 = vmul.f32 1.442695, %v3137_v29  ;;  %v3259_v28 = vmul.f32 1.442695, %v3138_v8  ;;  %3346 = vadd.xlane.f32.xlu1 %v3345_v15 }
 0x583   : > { %9411 = vst [vmem:[#allocation28_spill] sm:$0xff] %v7877_v33  ;;  %v7879_v14 = vpop.eup %6253  ;;  %v3074_v59 = vpop.xlane.xlu0 %3073 }
 0x584   : > { %9412 = vst [vmem:[#allocation29_spill] sm:$0xff] %v7879_v14  ;;  %6263 = vpow2.f32 %v3257_v42  ;;  %v3139_v52 = vsub.f32 %v7647_v22, %v3074_v59  ;;  %v3140_v53 = vsub.f32 %v7649_v38, %v3074_v59  ;;  %v3348_v60 = vadd.f32 %v7879_v14, %v7877_v33 }
 0x585   : > { %6265 = vpow2.f32 %v3259_v28 }
 0x586   : > { %v7885_v49 = vpop.eup %6255  ;;  %v3261_v11 = vmul.f32 1.442695, %v3139_v52  ;;  %v3263_v4 = vmul.f32 1.442695, %v3140_v53  ;;  %3349 = vadd.xlane.f32.xlu0 %v3348_v60 }
 0x587   : > { %9413 = vst [vmem:[#allocation30_spill] sm:$0xff] %v7885_v49  ;;  %v7887_v29 = vpop.eup %6257  ;;  %v3077_v8 = vpop.xlane.xlu1 %3076 }
 0x588   : > { %9414 = vst [vmem:[#allocation31_spill] sm:$0xff] %v7887_v29  ;;  %6267 = vpow2.f32 %v3261_v11  ;;  %v3141_v15 = vsub.f32 %v7655_v26, %v3077_v8  ;;  %v3142_v42 = vsub.f32 %v7657_v43, %v3077_v8  ;;  %v3351_v22 = vadd.f32 %v7887_v29, %v7885_v49  ;;  %v9417_v11 = vld [vmem:[#allocation20_spill] sm:$0xff] }
 0x589   : > { %6269 = vpow2.f32 %v3263_v4 }
 0x58a   : > { %v7893_v38 = vpop.eup %6259  ;;  %v3265_v28 = vmul.f32 1.442695, %v3141_v15  ;;  %v3267_v59 = vmul.f32 1.442695, %v3142_v42  ;;  %3352 = vadd.xlane.f32.xlu1 %v3351_v22 }
 0x58b   : > { %9415 = vst [vmem:[#allocation32_spill] sm:$0xff] %v7893_v38  ;;  %v7895_v52 = vpop.eup %6261  ;;  %v3080_v53 = vpop.xlane.xlu0 %3079 }
 0x58c   : > { %9416 = vst [vmem:[#allocation33_spill] sm:$0xff] %v7895_v52  ;;  %6271 = vpow2.f32 %v3265_v28  ;;  %v3143_v60 = vsub.f32 %v7663_v7, %v3080_v53  ;;  %v3144_v33 = vsub.f32 %v9417_v11, %v3080_v53  ;;  %v3354_v26 = vadd.f32 %v7895_v52, %v7893_v38 }
 0x58d   : > { %6273 = vpow2.f32 %v3267_v59 }
 0x58e   : > { %v7901_v43 = vpop.eup %6263  ;;  %v3269_v4 = vmul.f32 1.442695, %v3143_v60  ;;  %v3271_v8 = vmul.f32 1.442695, %v3144_v33  ;;  %3355 = vadd.xlane.f32.xlu0 %v3354_v26 }
 0x58f   : > { %9418 = vst [vmem:[#allocation34_spill] sm:$0xff] %v7901_v43  ;;  %v7903_v15 = vpop.eup %6265 }
 0x590   : > { %9419 = vst [vmem:[#allocation35_spill] sm:$0xff] %v7903_v15  ;;  %6275 = vpow2.f32 %v3269_v4  ;;  %v3357_v42 = vadd.f32 %v7903_v15, %v7901_v43  ;;  %v227_v4 = vld [vmem:[%s9001_s2 + $0x8] sm:$0xf] }
 0x591   : > { %6277 = vpow2.f32 %v3271_v8 }
 0x592   : > { %v7907_v22 = vpop.eup %6267  ;;  %3358 = vadd.xlane.f32.xlu1 %v3357_v42  ;;  %v4781_v42 = vld [vmem:[%s9003_s4] sm:$0xf] }
 0x593   : > { %9420 = vst [vmem:[#allocation36_spill] sm:$0xff] %v7907_v22  ;;  %v7909_v7 = vpop.eup %6269 }
 0x594   : > { %9421 = vst [vmem:[#allocation37_spill] sm:$0xff] %v7909_v7  ;;  %v3360_v28 = vadd.f32 %v7909_v7, %v7907_v22 }
 0x596   : > { %v7913_v59 = vpop.eup %6271  ;;  %3361 = vadd.xlane.f32.xlu0 %v3360_v28 }
 0x597   : > { %9422 = vst [vmem:[#allocation38_spill] sm:$0xff] %v7913_v59  ;;  %v7915_v33 = vpop.eup %6273 }
 0x598   : > { %9423 = vst [vmem:[#allocation39_spill] sm:$0xff] %v7915_v33  ;;  %v3363_v53 = vadd.f32 %v7915_v33, %v7913_v59 }
 0x59a   : > { %v7919_v60 = vpop.eup %6275  ;;  %3364 = vadd.xlane.f32.xlu1 %v3363_v53 }
 0x59b   : > { %9424 = vst [vmem:[#allocation40_spill] sm:$0xff] %v7919_v60  ;;  %v7921_v11 = vpop.eup %6277 }
 0x59c   : > { %9425 = vst [vmem:[#allocation41_spill] sm:$0xff] %v7921_v11  ;;  %v3366_v26 = vadd.f32 %v7921_v11, %v7919_v60 }
 0x59e   : > { %3367 = vadd.xlane.f32.xlu0 %v3366_v26 }
 0x5ab   : > { %235 = vperm.xlu1 %6149, %v227_v4  }
 0x5af   : > { %v3275_v8 = vpop.xlane.xlu1 %3274 }
 0x5b0   : > { %6279 = vrcp.f32 %v3275_v8 }
 0x5b3   : > { %v3278_v28 = vpop.xlane.xlu0 %3277 }
 0x5b4   : > { %6281 = vrcp.f32 %v3278_v28  ;;  %4784 = vperm.xlu0 %6148, %v4781_v42  }
 0x5b7   : > { %v3281_v53 = vpop.xlane.xlu1 %3280 }
 0x5b8   : > { %6283 = vrcp.f32 %v3281_v53 }
 0x5ba   : > { %v6280_v59 = vpop.eup %6279 }
 0x5bb   : > { %v3284_v33 = vpop.xlane.xlu0 %3283  ;;  %v3434_v26 = vmul.f32 %v6280_v59, %v7679_v31  ;;  %v3433_v60 = vmul.f32 %v6280_v59, %v7677_v30 }
 0x5bc   : > { %6285 = vrcp.f32 %v3284_v33 }
 0x5bd   : > { %v3497_v11 = vand.u32 4294901760, %v3434_v26  ;;  %v3499_v4 = vand.u32 4294901760, %v3433_v60 }
 0x5be   : > { %v6282_v22 = vpop.eup %6281 }
 0x5bf   : > { %v3287_v8 = vpop.xlane.xlu1 %3286  ;;  %v3436_v7 = vmul.f32 %v6282_v22, %v7687_v46  ;;  %v7934_v43 = vsub.f32 %v3434_v26, %v3497_v11  ;;  %v3435_v28 = vmul.f32 %v6282_v22, %v7685_v58  ;;  %v7937_v42 = vsub.f32 %v3433_v60, %v3499_v4 }
 0x5c0   : > { %6287 = vrcp.f32 %v3287_v8 }
 0x5c1   : > { %9426 = vst [vmem:[#allocation42_spill] sm:$0xff] %v7934_v43  ;;  %9427 = vst [vmem:[#allocation43_spill] sm:$0xff] %v7937_v42  ;;  %v3501_v53 = vand.u32 4294901760, %v3436_v7  ;;  %v3503_v15 = vand.u32 4294901760, %v3435_v28  ;;  %v3644_v31 = vand.u32 4294901760, %v7934_v43  ;;  %v3650_v30 = vand.u32 4294901760, %v7937_v42 }
 0x5c2   : > { %v6284_v59 = vpop.eup %6283 }
 0x5c3   : > { %v3290_v33 = vpop.xlane.xlu0 %3289  ;;  %v7941_v38 = vpack.c.bf16 %v3501_v53, %v3497_v11  ;;  %v7943_v52 = vsub.f32 %v3436_v7, %v3501_v53  ;;  %v7945_v46 = vpack.c.bf16 %v3503_v15, %v3499_v4  ;;  %v7947_v26 = vsub.f32 %v3435_v28, %v3503_v15 }
 0x5c4   : > { %6289 = vrcp.f32 %v3290_v33  ;;  %v3438_v58 = vmul.f32 %v6284_v59, %v7695_v24  ;;  %v3437_v22 = vmul.f32 %v6284_v59, %v7693_v32  ;;  %v3645_v60 = vsub.f32 %v7934_v43, %v3644_v31 }
 0x5c5   : > { %9428 = vst [vmem:[#allocation44_spill] sm:$0xff] %v7941_v38  ;;  %9429 = vst [vmem:[#allocation45_spill] sm:$0xff] %v7943_v52  ;;  %5358 = vmatprep.subr.bf16.mxu0 %v7941_v38  ;;  %v3656_v8 = vand.u32 4294901760, %v7943_v52  ;;  %v3651_v11 = vsub.f32 %v7937_v42, %v3650_v30  ;;  %v3662_v7 = vand.u32 4294901760, %v7947_v26 }
 0x5c6   : > { %9430 = vst [vmem:[#allocation46_spill] sm:$0xff] %v7945_v46  ;;  %9431 = vst [vmem:[#allocation47_spill] sm:$0xff] %v7947_v26  ;;  %v6286_v15 = vpop.eup %6285  ;;  %5360 = vmatpush1.bf16.msra.mxu0 %v7945_v46  ;;  %v3505_v28 = vand.u32 4294901760, %v3438_v58  ;;  %v3507_v24 = vand.u32 4294901760, %v3437_v22  ;;  %v3646_v53 = vand.u32 4294901760, %v3645_v60 }
 0x5c7   : > { %v3293_v59 = vpop.xlane.xlu1 %3292  ;;  %v3440_v33 = vmul.f32 %v6286_v15, %v7703_v55  ;;  %v3439_v38 = vmul.f32 %v6286_v15, %v7701_v37  ;;  %v3657_v49 = vsub.f32 %v7943_v52, %v3656_v8  ;;  %v3652_v29 = vand.u32 4294901760, %v3651_v11 }
 0x5c8   : > { %6291 = vrcp.f32 %v3293_v59  ;;  %v7964_v14 = vsub.f32 %v3438_v58, %v3505_v28  ;;  %v7966_v4 = vsub.f32 %v3437_v22, %v3507_v24  ;;  %v3663_v46 = vsub.f32 %v7947_v26, %v3662_v7 }
 0x5c9   : > { %v3509_v43 = vand.u32 4294901760, %v3440_v33  ;;  %v3511_v60 = vand.u32 4294901760, %v3439_v38  ;;  %v3658_v44 = vand.u32 4294901760, %v3657_v49  ;;  %v7969_v63 = vpack.c.bf16 %v3656_v8, %v3644_v31 }
 0x5ca   : > { %9432 = vst [vmem:[#allocation48_spill] sm:$0xff] %v7964_v14  ;;  %9433 = vst [vmem:[#allocation49_spill] sm:$0xff] %v7966_v4  ;;  %v6288_v32 = vpop.eup %6287  ;;  %v3664_v42 = vand.u32 4294901760, %v3663_v46  ;;  %v3668_v55 = vand.u32 4294901760, %v7964_v14  ;;  %v9103_v37 = vand.u32 4294901760, %v7966_v4  ;;  %v7973_v15 = vpack.c.bf16 %v3662_v7, %v3650_v30 }
 0x5cb   : > { %9434 = vst [vmem:[#allocation50_spill] sm:$0xff] %v7969_v63  ;;  %v3296_v11 = vpop.xlane.xlu0 %3295  ;;  %v7975_v58 = vpack.c.bf16 %v3509_v43, %v3505_v28  ;;  %v7977_v22 = vsub.f32 %v3440_v33, %v3509_v43  ;;  %v7979_v59 = vpack.c.bf16 %v3511_v60, %v3507_v24  ;;  %v7981_v26 = vsub.f32 %v3439_v38, %v3511_v60 }
 0x5cc   : > { %9435 = vst [vmem:[#allocation51_spill] sm:$0xff] %v7973_v15  ;;  %6293 = vrcp.f32 %v3296_v11  ;;  %v3442_v49 = vmul.f32 %v6288_v32, %v7711_v54  ;;  %v3441_v31 = vmul.f32 %v6288_v32, %v7709_v40  ;;  %v7985_v46 = vpack.c.bf16 %v3658_v44, %v3646_v53 }
 0x5cd   : > { %9436 = vst [vmem:[#allocation52_spill] sm:$0xff] %v7975_v58  ;;  %9437 = vst [vmem:[#allocation53_spill] sm:$0xff] %v7977_v22  ;;  %5362 = vmatprep.subr.bf16.mxu0 %v7975_v58  ;;  %v7988_v30 = vpack.c.bf16 %v3664_v42, %v3652_v29  ;;  %v3669_v8 = vsub.f32 %v7964_v14, %v3668_v55  ;;  %v3680_v43 = vand.u32 4294901760, %v7977_v22  ;;  %v9442_v63 = vand.u32 4294901760, %v7981_v26 }
 0x5ce   : > { %9438 = vst [vmem:[#allocation54_spill] sm:$0xff] %v7979_v59  ;;  %9439 = vst [vmem:[#allocation55_spill] sm:$0xff] %v7981_v26  ;;  %v3675_v38 = vsub.f32 %v7966_v4, %v9103_v37  ;;  %v6290_v7 = vpop.eup %6289  ;;  %5364 = vmatpush1.bf16.msra.mxu0 %v7979_v59  ;;  %v3513_v54 = vand.u32 4294901760, %v3442_v49  ;;  %v3515_v28 = vand.u32 4294901760, %v3441_v31 }
 0x5cf   : > { %v3299_v29 = vpop.xlane.xlu1 %3298  ;;  %v3444_v42 = vmul.f32 %v6290_v7, %v7719_v51  ;;  %v3443_v24 = vmul.f32 %v6290_v7, %v7717_v3  ;;  %v3670_v53 = vand.u32 4294901760, %v3669_v8  ;;  %v3681_v32 = vsub.f32 %v7977_v22, %v3680_v43 }
 0x5d0   : > { %6295 = vrcp.f32 %v3299_v29  ;;  %v8002_v33 = vsub.f32 %v3442_v49, %v3513_v54  ;;  %v8004_v60 = vsub.f32 %v3441_v31, %v3515_v28  ;;  %v3676_v11 = vand.u32 4294901760, %v3675_v38 }
 0x5d1   : > { %v3517_v37 = vand.u32 4294901760, %v3444_v42  ;;  %v3519_v15 = vand.u32 4294901760, %v3443_v24  ;;  %v3682_v40 = vand.u32 4294901760, %v3681_v32  ;;  %v3687_v44 = vsub.f32 %v7981_v26, %v9442_v63 }
 0x5d2   : > { %9440 = vst [vmem:[#allocation56_spill] sm:$0xff] %v8002_v33  ;;  %9441 = vst [vmem:[#allocation10_spill] sm:$0xff] %v8004_v60  ;;  %v6292_v59 = vpop.eup %6291  ;;  %v8013_v49 = vpack.c.bf16 %v3680_v43, %v3668_v55  ;;  %v9448_v43 = vand.u32 4294901760, %v8002_v33 }
 0x5d3   : > { %v3302_v31 = vpop.xlane.xlu0 %3301  ;;  %v8015_v7 = vpack.c.bf16 %v3517_v37, %v3513_v54  ;;  %v8017_v38 = vsub.f32 %v3444_v42, %v3517_v37  ;;  %v8019_v29 = vpack.c.bf16 %v3519_v15, %v3515_v28  ;;  %v8021_v32 = vsub.f32 %v3443_v24, %v3519_v15 }
 0x5d4   : > { %9443 = vst [vmem:[#allocation8_spill] sm:$0xff] %v8013_v49  ;;  %6297 = vrcp.f32 %v3302_v31  ;;  %v3446_v63 = vmul.f32 %v6292_v59, %v7727_v47  ;;  %v3445_v51 = vmul.f32 %v6292_v59, %v7725_v45  ;;  %v8025_v3 = vpack.c.bf16 %v3682_v40, %v3670_v53 }
 0x5d5   : > { %9444 = vst [vmem:[#allocation9_spill] sm:$0xff] %v8015_v7  ;;  %9445 = vst [vmem:[#allocation11_spill] sm:$0xff] %v8017_v38  ;;  %5366 = vmatprep.subr.bf16.mxu0 %v8015_v7  ;;  %v3688_v55 = vand.u32 4294901760, %v3687_v44  ;;  %v3693_v54 = vsub.f32 %v8002_v33, %v9448_v43  ;;  %v9110_v37 = vand.u32 4294901760, %v8017_v38  ;;  %v9449_v28 = vand.u32 4294901760, %v8004_v60  ;;  %v9551_v33 = vld [vmem:[#allocation31_spill] sm:$0xff] }
 0x5d6   : > { %9446 = vst [vmem:[#allocation12_spill] sm:$0xff] %v8019_v29  ;;  %9447 = vst [vmem:[#allocation13_spill] sm:$0xff] %v8021_v32  ;;  %v6294_v42 = vpop.eup %6293  ;;  %5368 = vmatpush1.bf16.msra.mxu0 %v8019_v29  ;;  %v3521_v47 = vand.u32 4294901760, %v3446_v63  ;;  %v3523_v45 = vand.u32 4294901760, %v3445_v51  ;;  %v9452_v7 = vand.u32 4294901760, %v8021_v32 }
 0x5d7   : > { %v3699_v15 = vsub.f32 %v8004_v60, %v9449_v28  ;;  %v3305_v44 = vpop.xlane.xlu1 %3304  ;;  %v3448_v24 = vmul.f32 %v6294_v42, %v7735_v10  ;;  %v3447_v53 = vmul.f32 %v6294_v42, %v7733_v62  ;;  %v8041_v31 = vpack.c.bf16 %v3688_v55, %v3676_v11 }
 0x5d8   : > { %v3694_v43 = vand.u32 4294901760, %v3693_v54  ;;  %6299 = vrcp.f32 %v3305_v44  ;;  %v8043_v28 = vsub.f32 %v3446_v63, %v3521_v47  ;;  %v8045_v8 = vsub.f32 %v3445_v51, %v3523_v45 }
 0x5d9   : > { %v3705_v59 = vsub.f32 %v8017_v38, %v9110_v37  ;;  %v3525_v49 = vand.u32 4294901760, %v3448_v24  ;;  %v3527_v29 = vand.u32 4294901760, %v3447_v53  ;;  %v3700_v40 = vand.u32 4294901760, %v3699_v15  ;;  %v9552_v38 = vld [vmem:[#allocation30_spill] sm:$0xff] }
 0x5da   : > { %9450 = vst [vmem:[#allocation14_spill] sm:$0xff] %v8043_v28  ;;  %9451 = vst [vmem:[#allocation15_spill] sm:$0xff] %v8045_v8  ;;  %v3711_v10 = vsub.f32 %v8021_v32, %v9452_v7  ;;  %v6296_v62 = vpop.eup %6295  ;;  %v9457_v51 = vand.u32 4294901760, %v8043_v28 }
 0x5db   : > { %v3706_v11 = vand.u32 4294901760, %v3705_v59  ;;  %v3308_v54 = vpop.xlane.xlu0 %3307  ;;  %v8057_v42 = vpack.c.bf16 %v3525_v49, %v3521_v47  ;;  %v8059_v44 = vsub.f32 %v3448_v24, %v3525_v49  ;;  %v8061_v37 = vpack.c.bf16 %v3527_v29, %v3523_v45 }
 0x5dc   : > { %v8063_v15 = vsub.f32 %v3447_v53, %v3527_v29  ;;  %6301 = vrcp.f32 %v3308_v54  ;;  %v3450_v7 = vmul.f32 %v6296_v62, %v7743_v41  ;;  %v3449_v59 = vmul.f32 %v6296_v62, %v7741_v57 }
 0x5dd   : > { %9453 = vst [vmem:[#allocation16_spill] sm:$0xff] %v8057_v42  ;;  %9454 = vst [vmem:[#allocation17_spill] sm:$0xff] %v8059_v44  ;;  %v8067_v55 = vpack.c.bf16 %v3706_v11, %v3694_v43  ;;  %5370 = vmatprep.subr.bf16.mxu0 %v8057_v42  ;;  %v3712_v63 = vand.u32 4294901760, %v3711_v10  ;;  %v3717_v47 = vsub.f32 %v8043_v28, %v9457_v51  ;;  %v9458_v45 = vand.u32 4294901760, %v8045_v8 }
 0x5de   : > { %9455 = vst [vmem:[#allocation18_spill] sm:$0xff] %v8061_v37  ;;  %9456 = vst [vmem:[#allocation19_spill] sm:$0xff] %v8063_v15  ;;  %v6298_v24 = vpop.eup %6297  ;;  %5372 = vmatpush1.bf16.msra.mxu0 %v8061_v37  ;;  %v3529_v41 = vand.u32 4294901760, %v3450_v7  ;;  %v3531_v57 = vand.u32 4294901760, %v3449_v59  ;;  %v9461_v37 = vand.u32 4294901760, %v8059_v44  ;;  %v9462_v28 = vand.u32 4294901760, %v8063_v15 }
 0x5df   : > { %v3723_v29 = vsub.f32 %v8045_v8, %v9458_v45  ;;  %v3311_v10 = vpop.xlane.xlu1 %3310  ;;  %v3452_v62 = vmul.f32 %v6298_v24, %v7751_v36  ;;  %v3451_v11 = vmul.f32 %v6298_v24, %v7749_v20  ;;  %v8083_v51 = vpack.c.bf16 %v3712_v63, %v3700_v40 }
 0x5e0   : > { %v3718_v54 = vand.u32 4294901760, %v3717_v47  ;;  %6303 = vrcp.f32 %v3311_v10  ;;  %v8085_v45 = vsub.f32 %v3450_v7, %v3529_v41  ;;  %v8087_v49 = vsub.f32 %v3449_v59, %v3531_v57 }
 0x5e1   : > { %v3729_v53 = vsub.f32 %v8059_v44, %v9461_v37  ;;  %v3533_v42 = vand.u32 4294901760, %v3452_v62  ;;  %v3535_v58 = vand.u32 4294901760, %v3451_v11  ;;  %v3724_v43 = vand.u32 4294901760, %v3723_v29 }
 0x5e2   : > { %9459 = vst [vmem:[#allocation20_spill] sm:$0xff] %v8085_v45  ;;  %9460 = vst [vmem:[#allocation57_spill] sm:$0xff] %v8087_v49  ;;  %v3735_v36 = vsub.f32 %v8063_v15, %v9462_v28  ;;  %v6300_v20 = vpop.eup %6299  ;;  %v9467_v59 = vand.u32 4294901760, %v8085_v45 }
 0x5e3   : > { %v3730_v40 = vand.u32 4294901760, %v3729_v53  ;;  %v3314_v47 = vpop.xlane.xlu0 %3313  ;;  %v8099_v24 = vpack.c.bf16 %v3533_v42, %v3529_v41  ;;  %v8101_v37 = vsub.f32 %v3452_v62, %v3533_v42  ;;  %v8103_v10 = vpack.c.bf16 %v3535_v58, %v3531_v57 }
 0x5e4   : > { %v8105_v29 = vsub.f32 %v3451_v11, %v3535_v58  ;;  %6305 = vrcp.f32 %v3314_v47  ;;  %v3454_v28 = vmul.f32 %v6300_v20, %v7759_v18  ;;  %v3453_v53 = vmul.f32 %v6300_v20, %v7757_v56 }
 0x5e5   : > { %9463 = vst [vmem:[#allocation58_spill] sm:$0xff] %v8099_v24  ;;  %9464 = vst [vmem:[#allocation59_spill] sm:$0xff] %v8101_v37  ;;  %v8109_v63 = vpack.c.bf16 %v3730_v40, %v3718_v54  ;;  %5374 = vmatprep.subr.bf16.mxu0 %v8099_v24  ;;  %v3736_v7 = vand.u32 4294901760, %v3735_v36  ;;  %v3741_v41 = vsub.f32 %v8085_v45, %v9467_v59  ;;  %v9468_v57 = vand.u32 4294901760, %v8087_v49 }
 0x5e6   : > { %9465 = vst [vmem:[#allocation60_spill] sm:$0xff] %v8103_v10  ;;  %9466 = vst [vmem:[#allocation61_spill] sm:$0xff] %v8105_v29  ;;  %v6302_v62 = vpop.eup %6301  ;;  %5376 = vmatpush1.bf16.msra.mxu0 %v8103_v10  ;;  %v3537_v18 = vand.u32 4294901760, %v3454_v28  ;;  %v3539_v56 = vand.u32 4294901760, %v3453_v53  ;;  %v9471_v10 = vand.u32 4294901760, %v8101_v37  ;;  %v9472_v45 = vand.u32 4294901760, %v8105_v29 }
 0x5e7   : > { %v3747_v58 = vsub.f32 %v8087_v49, %v9468_v57  ;;  %v3317_v36 = vpop.xlane.xlu1 %3316  ;;  %v3456_v20 = vmul.f32 %v6302_v62, %v7767_v35  ;;  %v3455_v40 = vmul.f32 %v6302_v62, %v7765_v6  ;;  %v8125_v59 = vpack.c.bf16 %v3736_v7, %v3724_v43 }
 0x5e8   : > { %v3742_v47 = vand.u32 4294901760, %v3741_v41  ;;  %6307 = vrcp.f32 %v3317_v36  ;;  %v8127_v57 = vsub.f32 %v3454_v28, %v3537_v18  ;;  %v8129_v42 = vsub.f32 %v3453_v53, %v3539_v56 }
 0x5e9   : > { %v3753_v11 = vsub.f32 %v8101_v37, %v9471_v10  ;;  %v3541_v24 = vand.u32 4294901760, %v3456_v20  ;;  %v3543_v8 = vand.u32 4294901760, %v3455_v40  ;;  %v3748_v54 = vand.u32 4294901760, %v3747_v58 }
 0x5ea   : > { %9469 = vst [vmem:[#allocation62_spill] sm:$0xff] %v8127_v57  ;;  %9470 = vst [vmem:[#allocation63_spill] sm:$0xff] %v8129_v42  ;;  %v3759_v35 = vsub.f32 %v8105_v29, %v9472_v45  ;;  %v6304_v6 = vpop.eup %6303  ;;  %v9477_v53 = vand.u32 4294901760, %v8127_v57 }
 0x5eb   : > { %v3754_v43 = vand.u32 4294901760, %v3753_v11  ;;  %v3320_v41 = vpop.xlane.xlu0 %3319  ;;  %v8141_v62 = vpack.c.bf16 %v3541_v24, %v3537_v18  ;;  %v8143_v10 = vsub.f32 %v3456_v20, %v3541_v24  ;;  %v8145_v36 = vpack.c.bf16 %v3543_v8, %v3539_v56 }
 0x5ec   : > { %v8147_v58 = vsub.f32 %v3455_v40, %v3543_v8  ;;  %6309 = vrcp.f32 %v3320_v41  ;;  %v3458_v45 = vmul.f32 %v6304_v6, %v7775_v23  ;;  %v3457_v11 = vmul.f32 %v6304_v6, %v7773_v21 }
 0x5ed   : > { %9473 = vst [vmem:[#allocation64_spill] sm:$0xff] %v8141_v62  ;;  %9474 = vst [vmem:[#allocation65_spill] sm:$0xff] %v8143_v10  ;;  %v8151_v7 = vpack.c.bf16 %v3754_v43, %v3742_v47  ;;  %5378 = vmatprep.subr.bf16.mxu0 %v8141_v62  ;;  %v3760_v28 = vand.u32 4294901760, %v3759_v35  ;;  %v3765_v18 = vsub.f32 %v8127_v57, %v9477_v53  ;;  %v9478_v56 = vand.u32 4294901760, %v8129_v42 }
 0x5ee   : > { %9475 = vst [vmem:[#allocation66_spill] sm:$0xff] %v8145_v36  ;;  %9476 = vst [vmem:[#allocation67_spill] sm:$0xff] %v8147_v58  ;;  %v6306_v20 = vpop.eup %6305  ;;  %5380 = vmatpush1.bf16.msra.mxu0 %v8145_v36  ;;  %v3545_v23 = vand.u32 4294901760, %v3458_v45  ;;  %v3547_v21 = vand.u32 4294901760, %v3457_v11  ;;  %v9481_v36 = vand.u32 4294901760, %v8143_v10  ;;  %v9482_v57 = vand.u32 4294901760, %v8147_v58 }
 0x5ef   : > { %v3771_v8 = vsub.f32 %v8129_v42, %v9478_v56  ;;  %v3323_v35 = vpop.xlane.xlu1 %3322  ;;  %v3460_v6 = vmul.f32 %v6306_v20, %v7783_v39  ;;  %v3459_v43 = vmul.f32 %v6306_v20, %v7781_v9  ;;  %v8167_v53 = vpack.c.bf16 %v3760_v28, %v3748_v54 }
 0x5f0   : > { %v3766_v41 = vand.u32 4294901760, %v3765_v18  ;;  %6311 = vrcp.f32 %v3323_v35  ;;  %v8169_v56 = vsub.f32 %v3458_v45, %v3545_v23  ;;  %v8171_v24 = vsub.f32 %v3457_v11, %v3547_v21 }
 0x5f1   : > { %v3777_v40 = vsub.f32 %v8143_v10, %v9481_v36  ;;  %v3549_v62 = vand.u32 4294901760, %v3460_v6  ;;  %v3551_v49 = vand.u32 4294901760, %v3459_v43  ;;  %v3772_v47 = vand.u32 4294901760, %v3771_v8 }
 0x5f2   : > { %9479 = vst [vmem:[#allocation68_spill] sm:$0xff] %v8169_v56  ;;  %9480 = vst [vmem:[#allocation69_spill] sm:$0xff] %v8171_v24  ;;  %v3783_v39 = vsub.f32 %v8147_v58, %v9482_v57  ;;  %v6308_v9 = vpop.eup %6307  ;;  %v9487_v11 = vand.u32 4294901760, %v8169_v56 }
 0x5f3   : > { %v3778_v54 = vand.u32 4294901760, %v3777_v40  ;;  %v3326_v18 = vpop.xlane.xlu0 %3325  ;;  %v8183_v20 = vpack.c.bf16 %v3549_v62, %v3545_v23  ;;  %v8185_v36 = vsub.f32 %v3460_v6, %v3549_v62  ;;  %v8187_v35 = vpack.c.bf16 %v3551_v49, %v3547_v21 }
 0x5f4   : > { %v8189_v8 = vsub.f32 %v3459_v43, %v3551_v49  ;;  %6313 = vrcp.f32 %v3326_v18  ;;  %v3462_v57 = vmul.f32 %v6308_v9, %v7791_v12  ;;  %v3461_v40 = vmul.f32 %v6308_v9, %v7789_v16 }
 0x5f5   : > { %9483 = vst [vmem:[#allocation70_spill] sm:$0xff] %v8183_v20  ;;  %9484 = vst [vmem:[#allocation71_spill] sm:$0xff] %v8185_v36  ;;  %v8193_v28 = vpack.c.bf16 %v3778_v54, %v3766_v41  ;;  %5382 = vmatprep.subr.bf16.mxu0 %v8183_v20  ;;  %v3784_v45 = vand.u32 4294901760, %v3783_v39  ;;  %v3789_v23 = vsub.f32 %v8169_v56, %v9487_v11  ;;  %v9488_v21 = vand.u32 4294901760, %v8171_v24 }
 0x5f6   : > { %9485 = vst [vmem:[#allocation72_spill] sm:$0xff] %v8187_v35  ;;  %9486 = vst [vmem:[#allocation73_spill] sm:$0xff] %v8189_v8  ;;  %v6310_v6 = vpop.eup %6309  ;;  %5384 = vmatpush1.bf16.msra.mxu0 %v8187_v35  ;;  %v3553_v12 = vand.u32 4294901760, %v3462_v57  ;;  %v3555_v16 = vand.u32 4294901760, %v3461_v40  ;;  %v9492_v35 = vand.u32 4294901760, %v8185_v36  ;;  %v9493_v56 = vand.u32 4294901760, %v8189_v8 }
 0x5f7   : > { %v3795_v49 = vsub.f32 %v8171_v24, %v9488_v21  ;;  %v3329_v39 = vpop.xlane.xlu1 %3328  ;;  %v3464_v9 = vmul.f32 %v6310_v6, %v7799_v48  ;;  %v3463_v54 = vmul.f32 %v6310_v6, %v7797_v13  ;;  %v8209_v11 = vpack.c.bf16 %v3784_v45, %v3772_v47 }
 0x5f8   : > { %v3790_v18 = vand.u32 4294901760, %v3789_v23  ;;  %6315 = vrcp.f32 %v3329_v39  ;;  %v8211_v21 = vsub.f32 %v3462_v57, %v3553_v12  ;;  %v8213_v62 = vsub.f32 %v3461_v40, %v3555_v16 }
 0x5f9   : > { %9489 = vst [vmem:[#allocation74_spill] sm:$0xff] %v8209_v11  ;;  %v3801_v43 = vsub.f32 %v8185_v36, %v9492_v35  ;;  %v3557_v20 = vand.u32 4294901760, %v3464_v9  ;;  %v3559_v42 = vand.u32 4294901760, %v3463_v54  ;;  %v3796_v41 = vand.u32 4294901760, %v3795_v49 }
 0x5fa   : > { %9490 = vst [vmem:[#allocation75_spill] sm:$0xff] %v8211_v21  ;;  %9491 = vst [vmem:[#allocation76_spill] sm:$0xff] %v8213_v62  ;;  %v3807_v48 = vsub.f32 %v8189_v8, %v9493_v56  ;;  %v6312_v13 = vpop.eup %6311  ;;  %v9500_v40 = vand.u32 4294901760, %v8211_v21 }
 0x5fb   : > { %v3802_v47 = vand.u32 4294901760, %v3801_v43  ;;  %v3332_v23 = vpop.xlane.xlu0 %3331  ;;  %v8225_v6 = vpack.c.bf16 %v3557_v20, %v3553_v12  ;;  %v8227_v35 = vsub.f32 %v3464_v9, %v3557_v20  ;;  %v8229_v39 = vpack.c.bf16 %v3559_v42, %v3555_v16  ;;  %v9498_v43 = vld [vmem:[#allocation21_spill] sm:$0xff] }
 0x5fc   : > { %v8231_v49 = vsub.f32 %v3463_v54, %v3559_v42  ;;  %6317 = vrcp.f32 %v3332_v23  ;;  %v3466_v56 = vmul.f32 %v6312_v13, %v7807_v5  ;;  %v3465_v36 = vmul.f32 %v6312_v13, %v9498_v43 }
 0x5fd   : > { %9494 = vst [vmem:[#allocation77_spill] sm:$0xff] %v8225_v6  ;;  %9495 = vst [vmem:[#allocation78_spill] sm:$0xff] %v8227_v35  ;;  %v8235_v45 = vpack.c.bf16 %v3802_v47, %v3790_v18  ;;  %5386 = vmatprep.subr.bf16.mxu0 %v8225_v6  ;;  %v3808_v57 = vand.u32 4294901760, %v3807_v48  ;;  %v3813_v12 = vsub.f32 %v8211_v21, %v9500_v40  ;;  %v9501_v16 = vand.u32 4294901760, %v8213_v62  ;;  %v9502_v40 = vld [vmem:[#allocation22_spill] sm:$0xff] }
 0x5fe   : > { %9496 = vst [vmem:[#allocation79_spill] sm:$0xff] %v8229_v39  ;;  %9497 = vst [vmem:[#allocation80_spill] sm:$0xff] %v8231_v49  ;;  %v6314_v9 = vpop.eup %6313  ;;  %5388 = vmatpush1.bf16.msra.mxu0 %v8229_v39  ;;  %v3561_v5 = vand.u32 4294901760, %v3466_v56  ;;  %v3563_v54 = vand.u32 4294901760, %v3465_v36  ;;  %v9506_v39 = vand.u32 4294901760, %v8227_v35  ;;  %v9507_v21 = vand.u32 4294901760, %v8231_v49 }
 0x5ff   : > { %9499 = vst [vmem:[#allocation21_spill] sm:$0xff] %v8235_v45  ;;  %v3819_v42 = vsub.f32 %v8213_v62, %v9501_v16  ;;  %v3335_v13 = vpop.xlane.xlu1 %3334  ;;  %v3468_v47 = vmul.f32 %v6314_v9, %v7815_v17  ;;  %v3467_v23 = vmul.f32 %v6314_v9, %v9502_v40  ;;  %v8251_v43 = vpack.c.bf16 %v3808_v57, %v3796_v41 }
 0x600   : > { %v3814_v20 = vand.u32 4294901760, %v3813_v12  ;;  %6319 = vrcp.f32 %v3335_v13  ;;  %v8253_v16 = vsub.f32 %v3466_v56, %v3561_v5  ;;  %v8255_v6 = vsub.f32 %v3465_v36, %v3563_v54 }
 0x601   : > { %9503 = vst [vmem:[#allocation22_spill] sm:$0xff] %v8251_v43  ;;  %v3825_v18 = vsub.f32 %v8227_v35, %v9506_v39  ;;  %v3565_v24 = vand.u32 4294901760, %v3468_v47  ;;  %v3567_v8 = vand.u32 4294901760, %v3467_v23  ;;  %v3820_v48 = vand.u32 4294901760, %v3819_v42 }
 0x602   : > { %9504 = vst [vmem:[#allocation81_spill] sm:$0xff] %v8253_v16  ;;  %9505 = vst [vmem:[#allocation82_spill] sm:$0xff] %v8255_v6  ;;  %v3831_v17 = vsub.f32 %v8231_v49, %v9507_v21  ;;  %v6316_v9 = vpop.eup %6315  ;;  %v9514_v36 = vand.u32 4294901760, %v8253_v16 }
 0x603   : > { %v3826_v41 = vand.u32 4294901760, %v3825_v18  ;;  %v3338_v12 = vpop.xlane.xlu0 %3337  ;;  %v8267_v13 = vpack.c.bf16 %v3565_v24, %v3561_v5  ;;  %v8269_v39 = vsub.f32 %v3468_v47, %v3565_v24  ;;  %v8271_v40 = vpack.c.bf16 %v3567_v8, %v3563_v54  ;;  %v9512_v18 = vld [vmem:[#allocation23_spill] sm:$0xff] }
 0x604   : > { %v8273_v42 = vsub.f32 %v3467_v23, %v3567_v8  ;;  %6321 = vrcp.f32 %v3338_v12  ;;  %v3470_v21 = vmul.f32 %v6316_v9, %v7823_v1  ;;  %v3469_v35 = vmul.f32 %v6316_v9, %v9512_v18 }
 0x605   : > { %9508 = vst [vmem:[#allocation83_spill] sm:$0xff] %v8267_v13  ;;  %9509 = vst [vmem:[#allocation84_spill] sm:$0xff] %v8269_v39  ;;  %v8277_v57 = vpack.c.bf16 %v3826_v41, %v3814_v20  ;;  %5390 = vmatprep.subr.bf16.mxu0 %v8267_v13  ;;  %v3832_v56 = vand.u32 4294901760, %v3831_v17  ;;  %v3837_v5 = vsub.f32 %v8253_v16, %v9514_v36  ;;  %v9515_v54 = vand.u32 4294901760, %v8255_v6  ;;  %v9516_v36 = vld [vmem:[#allocation24_spill] sm:$0xff] }
 0x606   : > { %9510 = vst [vmem:[#allocation85_spill] sm:$0xff] %v8271_v40  ;;  %9511 = vst [vmem:[#allocation86_spill] sm:$0xff] %v8273_v42  ;;  %v6318_v47 = vpop.eup %6317  ;;  %5392 = vmatpush1.bf16.msra.mxu0 %v8271_v40  ;;  %v3569_v1 = vand.u32 4294901760, %v3470_v21  ;;  %v3571_v23 = vand.u32 4294901760, %v3469_v35  ;;  %v9518_v40 = vand.u32 4294901760, %v8269_v39  ;;  %v9519_v16 = vand.u32 4294901760, %v8273_v42 }
 0x607   : > { %9513 = vst [vmem:[#allocation23_spill] sm:$0xff] %v8277_v57  ;;  %v3843_v8 = vsub.f32 %v8255_v6, %v9515_v54  ;;  %v3341_v9 = vpop.xlane.xlu1 %3340  ;;  %v3472_v41 = vmul.f32 %v6318_v47, %v7831_v0  ;;  %v3471_v12 = vmul.f32 %v6318_v47, %v9516_v36  ;;  %v8293_v18 = vpack.c.bf16 %v3832_v56, %v3820_v48 }
 0x608   : > { %v3838_v24 = vand.u32 4294901760, %v3837_v5  ;;  %6323 = vrcp.f32 %v3341_v9  ;;  %v8295_v54 = vsub.f32 %v3470_v21, %v3569_v1  ;;  %v8297_v13 = vsub.f32 %v3469_v35, %v3571_v23 }
 0x609   : > { %9517 = vst [vmem:[#allocation24_spill] sm:$0xff] %v8293_v18  ;;  %v3849_v20 = vsub.f32 %v8269_v39, %v9518_v40  ;;  %v3573_v62 = vand.u32 4294901760, %v3472_v41  ;;  %v3575_v49 = vand.u32 4294901760, %v3471_v12  ;;  %v3844_v17 = vand.u32 4294901760, %v3843_v8 }
 0x60a   : > { %v3855_v0 = vsub.f32 %v8273_v42, %v9519_v16  ;;  %v6320_v47 = vpop.eup %6319  ;;  %v9524_v35 = vand.u32 4294901760, %v8295_v54 }
 0x60b   : > { %v3850_v48 = vand.u32 4294901760, %v3849_v20  ;;  %v3344_v5 = vpop.xlane.xlu0 %3343  ;;  %v8309_v9 = vpack.c.bf16 %v3573_v62, %v3569_v1  ;;  %v8311_v40 = vsub.f32 %v3472_v41, %v3573_v62  ;;  %v8313_v36 = vpack.c.bf16 %v3575_v49, %v3571_v23  ;;  %v9522_v20 = vld [vmem:[#allocation25_spill] sm:$0xff] }
 0x60c   : > { %v8315_v8 = vsub.f32 %v3471_v12, %v3575_v49  ;;  %6325 = vrcp.f32 %v3344_v5  ;;  %v3474_v16 = vmul.f32 %v6320_v47, %v7839_v19  ;;  %v3473_v39 = vmul.f32 %v6320_v47, %v9522_v20 }
 0x60d   : > { %9520 = vst [vmem:[#allocation87_spill] sm:$0xff] %v8309_v9  ;;  %9521 = vst [vmem:[#allocation88_spill] sm:$0xff] %v8313_v36  ;;  %v8319_v56 = vpack.c.bf16 %v3850_v48, %v3838_v24  ;;  %5394 = vmatprep.subr.bf16.mxu0 %v8309_v9  ;;  %v3856_v21 = vand.u32 4294901760, %v3855_v0  ;;  %v3861_v1 = vsub.f32 %v8295_v54, %v9524_v35  ;;  %v9525_v23 = vand.u32 4294901760, %v8297_v13 }
 0x60e   : > { %v6322_v41 = vpop.eup %6321  ;;  %5396 = vmatpush1.bf16.msra.mxu0 %v8313_v36  ;;  %v3577_v19 = vand.u32 4294901760, %v3474_v16  ;;  %v3579_v12 = vand.u32 4294901760, %v3473_v39  ;;  %v9527_v36 = vand.u32 4294901760, %v8311_v40  ;;  %v9528_v42 = vand.u32 4294901760, %v8315_v8 }
 0x60f   : > { %9523 = vst [vmem:[#allocation25_spill] sm:$0xff] %v8319_v56  ;;  %v3867_v49 = vsub.f32 %v8297_v13, %v9525_v23  ;;  %v3347_v47 = vpop.xlane.xlu1 %3346  ;;  %v3476_v48 = vmul.f32 %v6322_v41, %v7847_v27  ;;  %v3475_v35 = vmul.f32 %v6322_v41, %v7845_v2  ;;  %v8335_v5 = vpack.c.bf16 %v3856_v21, %v3844_v17 }
 0x610   : > { %v3862_v20 = vand.u32 4294901760, %v3861_v1  ;;  %6327 = vrcp.f32 %v3347_v47  ;;  %v8337_v23 = vsub.f32 %v3474_v16, %v3577_v19  ;;  %v8339_v62 = vsub.f32 %v3473_v39, %v3579_v12 }
 0x611   : > { %9526 = vst [vmem:[#allocation89_spill] sm:$0xff] %v8335_v5  ;;  %v3873_v24 = vsub.f32 %v8311_v40, %v9527_v36  ;;  %v3581_v9 = vand.u32 4294901760, %v3476_v48  ;;  %v3583_v6 = vand.u32 4294901760, %v3475_v35  ;;  %v3868_v0 = vand.u32 4294901760, %v3867_v49 }
 0x612   : > { %v3879_v27 = vsub.f32 %v8315_v8, %v9528_v42  ;;  %v6324_v2 = vpop.eup %6323  ;;  %v9532_v39 = vand.u32 4294901760, %v8337_v23 }
 0x613   : > { %v3874_v17 = vand.u32 4294901760, %v3873_v24  ;;  %v3350_v1 = vpop.xlane.xlu0 %3349  ;;  %v8351_v41 = vpack.c.bf16 %v3581_v9, %v3577_v19  ;;  %v8353_v36 = vsub.f32 %v3476_v48, %v3581_v9  ;;  %v8355_v47 = vpack.c.bf16 %v3583_v6, %v3579_v12 }
 0x614   : > { %v8357_v49 = vsub.f32 %v3475_v35, %v3583_v6  ;;  %6329 = vrcp.f32 %v3350_v1  ;;  %v3478_v42 = vmul.f32 %v6324_v2, %v7855_v34  ;;  %v3477_v24 = vmul.f32 %v6324_v2, %v7853_v61 }
 0x615   : > { %9529 = vst [vmem:[#allocation90_spill] sm:$0xff] %v8351_v41  ;;  %9530 = vst [vmem:[#allocation91_spill] sm:$0xff] %v8355_v47  ;;  %v8361_v21 = vpack.c.bf16 %v3874_v17, %v3862_v20  ;;  %5398 = vmatprep.subr.bf16.mxu0 %v8351_v41  ;;  %v3880_v16 = vand.u32 4294901760, %v3879_v27  ;;  %v3885_v19 = vsub.f32 %v8337_v23, %v9532_v39  ;;  %v9533_v12 = vand.u32 4294901760, %v8339_v62 }
 0x616   : > { %v6326_v48 = vpop.eup %6325  ;;  %5400 = vmatpush1.bf16.msra.mxu0 %v8355_v47  ;;  %v3585_v34 = vand.u32 4294901760, %v3478_v42  ;;  %v3587_v61 = vand.u32 4294901760, %v3477_v24  ;;  %v9535_v47 = vand.u32 4294901760, %v8353_v36  ;;  %v9536_v10 = vand.u32 4294901760, %v8357_v49 }
 0x617   : > { %9531 = vst [vmem:[#allocation92_spill] sm:$0xff] %v8361_v21  ;;  %v3891_v6 = vsub.f32 %v8339_v62, %v9533_v12  ;;  %v3353_v27 = vpop.xlane.xlu1 %3352  ;;  %v3480_v2 = vmul.f32 %v6326_v48, %v7863_v50  ;;  %v3479_v17 = vmul.f32 %v6326_v48, %v7861_v25  ;;  %v8377_v39 = vpack.c.bf16 %v3880_v16, %v3868_v0 }
 0x618   : > { %v3886_v1 = vand.u32 4294901760, %v3885_v19  ;;  %6331 = vrcp.f32 %v3353_v27  ;;  %v8379_v12 = vsub.f32 %v3478_v42, %v3585_v34  ;;  %v8381_v9 = vsub.f32 %v3477_v24, %v3587_v61 }
 0x619   : > { %9534 = vst [vmem:[#allocation93_spill] sm:$0xff] %v8377_v39  ;;  %v3897_v35 = vsub.f32 %v8353_v36, %v9535_v47  ;;  %v3589_v41 = vand.u32 4294901760, %v3480_v2  ;;  %v3591_v58 = vand.u32 4294901760, %v3479_v17  ;;  %v3892_v20 = vand.u32 4294901760, %v3891_v6 }
 0x61a   : > { %v3903_v50 = vsub.f32 %v8357_v49, %v9536_v10  ;;  %v6328_v25 = vpop.eup %6327  ;;  %v9539_v10 = vld [vmem:[#allocation27_spill] sm:$0xff]  ;;  %v9542_v24 = vand.u32 4294901760, %v8379_v12 }
 0x61b   : > { %v3898_v0 = vand.u32 4294901760, %v3897_v35  ;;  %v3356_v19 = vpop.xlane.xlu0 %3355  ;;  %v8393_v48 = vpack.c.bf16 %v3589_v41, %v3585_v34  ;;  %v8395_v47 = vsub.f32 %v3480_v2, %v3589_v41  ;;  %v8397_v27 = vpack.c.bf16 %v3591_v58, %v3587_v61  ;;  %v9540_v35 = vld [vmem:[#allocation26_spill] sm:$0xff] }
 0x61c   : > { %v8399_v6 = vsub.f32 %v3479_v17, %v3591_v58  ;;  %6333 = vrcp.f32 %v3356_v19  ;;  %v3482_v29 = vmul.f32 %v6328_v25, %v9539_v10  ;;  %v3481_v37 = vmul.f32 %v6328_v25, %v9540_v35  ;;  %v9544_v19 = vld [vmem:[#allocation29_spill] sm:$0xff] }
 0x61d   : > { %9537 = vst [vmem:[#allocation94_spill] sm:$0xff] %v8393_v48  ;;  %9538 = vst [vmem:[#allocation95_spill] sm:$0xff] %v8397_v27  ;;  %v8403_v16 = vpack.c.bf16 %v3898_v0, %v3886_v1  ;;  %5402 = vmatprep.subr.bf16.mxu0 %v8393_v48  ;;  %v3904_v42 = vand.u32 4294901760, %v3903_v50  ;;  %v3909_v34 = vsub.f32 %v8379_v12, %v9542_v24  ;;  %v9543_v61 = vand.u32 4294901760, %v8381_v9  ;;  %v9545_v24 = vld [vmem:[#allocation28_spill] sm:$0xff] }
 0x61e   : > { %v6330_v2 = vpop.eup %6329  ;;  %5404 = vmatpush1.bf16.msra.mxu0 %v8397_v27  ;;  %v3593_v17 = vand.u32 4294901760, %v3482_v29  ;;  %v3595_v25 = vand.u32 4294901760, %v3481_v37  ;;  %v9547_v27 = vand.u32 4294901760, %v8395_v47  ;;  %v9548_v50 = vand.u32 4294901760, %v8399_v6 }
 0x61f   : > { %9541 = vst [vmem:[#allocation27_spill] sm:$0xff] %v8403_v16  ;;  %v3915_v58 = vsub.f32 %v8381_v9, %v9543_v61  ;;  %v3359_v0 = vpop.xlane.xlu1 %3358  ;;  %v3484_v10 = vmul.f32 %v6330_v2, %v9544_v19  ;;  %v3483_v35 = vmul.f32 %v6330_v2, %v9545_v24  ;;  %v8419_v41 = vpack.c.bf16 %v3904_v42, %v3892_v20 }
 0x620   : > { %6335 = vrcp.f32 %v3359_v0  ;;  %v8421_v48 = vsub.f32 %v3482_v29, %v3593_v17  ;;  %v8423_v61 = vsub.f32 %v3481_v37, %v3595_v25  ;;  %v3921_v15 = vsub.f32 %v8395_v47, %v9547_v27 }
 0x621   : > { %9546 = vst [vmem:[#allocation26_spill] sm:$0xff] %v8419_v41  ;;  %v3597_v1 = vand.u32 4294901760, %v3484_v10  ;;  %v3599_v44 = vand.u32 4294901760, %v3483_v35  ;;  %v3910_v60 = vand.u32 4294901760, %v3909_v34  ;;  %v3927_v19 = vsub.f32 %v8399_v6, %v9548_v50 }
 0x622   : > { %v6332_v32 = vpop.eup %6331  ;;  %v3922_v2 = vand.u32 4294901760, %v3921_v15  ;;  %v3916_v20 = vand.u32 4294901760, %v3915_v58  ;;  %v9554_v37 = vand.u32 4294901760, %v8421_v48 }
 0x623   : > { %v3362_v29 = vpop.xlane.xlu0 %3361  ;;  %v8434_v0 = vpack.c.bf16 %v3597_v1, %v3593_v17  ;;  %v8436_v24 = vsub.f32 %v3484_v10, %v3597_v1  ;;  %v8438_v27 = vpack.c.bf16 %v3599_v44, %v3595_v25  ;;  %v8440_v34 = vsub.f32 %v3483_v35, %v3599_v44  ;;  %v9555_v35 = vld [vmem:[#allocation33_spill] sm:$0xff] }
 0x624   : > { %6337 = vrcp.f32 %v3362_v29  ;;  %v3486_v50 = vmul.f32 %v6332_v32, %v9551_v33  ;;  %v3485_v15 = vmul.f32 %v6332_v32, %v9552_v38  ;;  %v8444_v58 = vpack.c.bf16 %v3922_v2, %v3910_v60  ;;  %v9556_v2 = vld [vmem:[#allocation32_spill] sm:$0xff] }
 0x625   : > { %9549 = vst [vmem:[#allocation29_spill] sm:$0xff] %v8434_v0  ;;  %9550 = vst [vmem:[#allocation28_spill] sm:$0xff] %v8438_v27  ;;  %5406 = vmatprep.subr.bf16.mxu0 %v8434_v0  ;;  %v3928_v42 = vand.u32 4294901760, %v3927_v19  ;;  %v3933_v17 = vsub.f32 %v8421_v48, %v9554_v37  ;;  %v9559_v60 = vand.u32 4294901760, %v8423_v61 }
 0x626   : > { %9553 = vst [vmem:[#allocation31_spill] sm:$0xff] %v8444_v58  ;;  %v6334_v44 = vpop.eup %6333  ;;  %5408 = vmatpush1.bf16.msra.mxu0 %v8438_v27  ;;  %v3601_v10 = vand.u32 4294901760, %v3486_v50  ;;  %v3603_v33 = vand.u32 4294901760, %v3485_v15  ;;  %v9558_v27 = vand.u32 4294901760, %v8436_v24  ;;  %v9564_v58 = vld [vmem:[#allocation7_spill] sm:$0xff] }
 0x627   : > { %v3365_v32 = vpop.xlane.xlu1 %3364  ;;  %v3488_v19 = vmul.f32 %v6334_v44, %v9555_v35  ;;  %v3487_v29 = vmul.f32 %v6334_v44, %v9556_v2  ;;  %v8458_v37 = vpack.c.bf16 %v3928_v42, %v3916_v20  ;;  %v3939_v26 = vsub.f32 %v8423_v61, %v9559_v60 }
 0x628   : > { %6339 = vrcp.f32 %v3365_v32  ;;  %v8460_v1 = vsub.f32 %v3486_v50, %v3601_v10  ;;  %v8462_v25 = vsub.f32 %v3485_v15, %v3603_v33  ;;  %v3945_v0 = vsub.f32 %v8436_v24, %v9558_v27  ;;  %v9566_v32 = vld [vmem:[#allocation34_spill] sm:$0xff] }
 0x629   : > { %9557 = vst [vmem:[#allocation30_spill] sm:$0xff] %v8458_v37  ;;  %v3605_v38 = vand.u32 4294901760, %v3488_v19  ;;  %v3607_v4 = vand.u32 4294901760, %v3487_v29  ;;  %v9560_v35 = vand.u32 4294901760, %v8440_v34  ;;  %v3934_v44 = vand.u32 4294901760, %v3933_v17  ;;  %v9563_v37 = vld [vmem:[#allocation6_spill] sm:$0xff] }
 0x62a   : > { %v6336_v42 = vpop.eup %6335  ;;  %v3946_v50 = vand.u32 4294901760, %v3945_v0  ;;  %v9565_v0 = vld [vmem:[#allocation35_spill] sm:$0xff] }
 0x62b   : > { %v3951_v20 = vsub.f32 %v8440_v34, %v9560_v35  ;;  %v236_v2 = vpop.permute.xlu1 %235  ;;  %v3368_v27 = vpop.xlane.xlu0 %3367  ;;  %v8476_v14 = vpack.c.bf16 %v3605_v38, %v3601_v10  ;;  %v8478_v22 = vsub.f32 %v3488_v19, %v3605_v38  ;;  %v8480_v52 = vpack.c.bf16 %v3607_v4, %v3603_v33 }
 0x62c   : > { %v8482_v60 = vsub.f32 %v3487_v29, %v3607_v4  ;;  %v5743_v35 = vadd.f32 %v9563_v37, %v236_v2  ;;  %v5744_v17 = vadd.f32 %v9564_v58, %v236_v2  ;;  %6341 = vrcp.f32 %v3368_v27  ;;  %v9569_v37 = vld [vmem:[#allocation37_spill] sm:$0xff]  ;;  %v9570_v27 = vld [vmem:[#allocation36_spill] sm:$0xff] }
 0x62d   : > { %9561 = vst [vmem:[#allocation33_spill] sm:$0xff] %v8476_v14  ;;  %9562 = vst [vmem:[#allocation32_spill] sm:$0xff] %v8480_v52  ;;  %v3490_v15 = vmul.f32 %v6336_v42, %v9565_v0  ;;  %5410 = vmatprep.subr.bf16.mxu0 %v8476_v14  ;;  %v3489_v41 = vmul.f32 %v6336_v42, %v9566_v32  ;;  %v8489_v16 = vpack.c.bf16 %v3946_v50, %v3934_v44 }
 0x62e   : > { %v3940_v10 = vand.u32 4294901760, %v3939_v26  ;;  %v3952_v38 = vand.u32 4294901760, %v3951_v20  ;;  %v6338_v19 = vpop.eup %6337  ;;  %v8491_v33 = vand.u32 4294901760, %v5744_v17  ;;  %v8493_v4 = vand.u32 4294901760, %v5743_v35  ;;  %5412 = vmatpush1.bf16.msra.mxu0 %v8480_v52 }
 0x62f   : > { %9567 = vst [vmem:[#allocation6_spill] sm:$0xff] %v8489_v16  ;;  %v9220_v58 = vand.u32 4294901760, %v8478_v22  ;;  %v3492_v2 = vmul.f32 %v6338_v19, %v9569_v37  ;;  %v3491_v0 = vmul.f32 %v6338_v19, %v9570_v27  ;;  %v3609_v20 = vand.u32 4294901760, %v3490_v15  ;;  %v9577_v16 = vld [vmem:[#allocation39_spill] sm:$0xff] }
 0x630   : > { %9568 = vst [vmem:[#allocation7_spill] sm:$0xff] %v8493_v4  ;;  %v8500_v42 = vpack.c.bf16 %v3952_v38, %v3940_v10  ;;  %v8503_v26 = vsub.f32 %v5744_v17, %v8491_v33  ;;  %v9573_v44 = vand.u32 4294901760, %v8460_v1  ;;  %v3611_v52 = vand.u32 4294901760, %v3489_v41 }
 0x631   : > { %v3613_v32 = vand.u32 4294901760, %v3492_v2  ;;  %v3615_v14 = vand.u32 4294901760, %v3491_v0  ;;  %v3969_v29 = vsub.f32 %v8478_v22, %v9220_v58  ;;  %v8512_v19 = vsub.f32 %v5743_v35, %v8493_v4  ;;  %v9578_v35 = vld [vmem:[#allocation38_spill] sm:$0xff] }
 0x632   : > { %9571 = vst [vmem:[#allocation35_spill] sm:$0xff] %v8500_v42  ;;  %9572 = vst [vmem:[#allocation34_spill] sm:$0xff] %v8503_v26  ;;  %v3957_v50 = vsub.f32 %v8460_v1, %v9573_v44  ;;  %v6340_v37 = vpop.eup %6339  ;;  %v9223_v10 = vand.u32 4294901760, %v8503_v26  ;;  %v9574_v17 = vand.u32 4294901760, %v8462_v25  ;;  %v9228_v27 = vand.u32 4294901760, %v8482_v60 }
 0x633   : > { %v8519_v44 = vpack.c.bf16 %v3613_v32, %v3609_v20  ;;  %v8521_v42 = vpack.c.bf16 %v3615_v14, %v3611_v52  ;;  %v3494_v39 = vmul.f32 %v6340_v37, %v9577_v16  ;;  %v3493_v4 = vmul.f32 %v6340_v37, %v9578_v35  ;;  %v9580_v16 = vld [vmem:[#allocation40_spill] sm:$0xff] }
 0x634   : > { %v3963_v38 = vsub.f32 %v8462_v25, %v9574_v17  ;;  %v3628_v58 = vsub.f32 %v8503_v26, %v9223_v10  ;;  %v3958_v21 = vand.u32 4294901760, %v3957_v50  ;;  %v3970_v5 = vand.u32 4294901760, %v3969_v29  ;;  %v9579_v10 = vld [vmem:[#allocation41_spill] sm:$0xff] }
 0x635   : > { %9575 = vst [vmem:[#allocation37_spill] sm:$0xff] %v8519_v44  ;;  %9576 = vst [vmem:[#allocation36_spill] sm:$0xff] %v8521_v42  ;;  %5414 = vmatprep.subr.bf16.mxu0 %v8519_v44  ;;  %v3975_v17 = vsub.f32 %v8482_v60, %v9228_v27  ;;  %v9231_v18 = vand.u32 4294901760, %v8512_v19  ;;  %v3617_v29 = vand.u32 4294901760, %v3494_v39  ;;  %v3619_v35 = vand.u32 4294901760, %v3493_v4 }
 0x636   : > { %v6342_v56 = vpop.eup %6341  ;;  %5416 = vmatpush1.bf16.msra.mxu0 %v8521_v42  ;;  %v3629_v57 = vand.u32 4294901760, %v3628_v58  ;;  %v3964_v43 = vand.u32 4294901760, %v3963_v38  ;;  %v8536_v44 = vpack.c.bf16 %v3970_v5, %v3958_v21  ;;  %v8558_v21 = vsub.f32 %v3490_v15, %v3609_v20 }
 0x637   : > { %v3496_v26 = vmul.f32 %v6342_v56, %v9579_v10  ;;  %v3495_v45 = vmul.f32 %v6342_v56, %v9580_v16  ;;  %v3976_v37 = vand.u32 4294901760, %v3975_v17  ;;  %v3634_v42 = vsub.f32 %v8512_v19, %v9231_v18 }
 0x638   : > { %3630 = vmatprep.mubr.f32.mxu0 %v3629_v57  ;;  %v8547_v10 = vsub.f32 %v3492_v2, %v3613_v32  ;;  %v8549_v56 = vsub.f32 %v3491_v0, %v3615_v14  ;;  %v8560_v17 = vsub.f32 %v3489_v41, %v3611_v52  ;;  %v8562_v16 = vsub.f32 %v3494_v39, %v3617_v29 }
 0x639   : > { %v3621_v50 = vand.u32 4294901760, %v3496_v26  ;;  %v3623_v11 = vand.u32 4294901760, %v3495_v45  ;;  %v8538_v27 = vpack.c.bf16 %v3976_v37, %v3964_v43  ;;  %v3635_v2 = vand.u32 4294901760, %v3634_v42 }
 0x63a   : > { %v8565_v14 = vsub.f32 %v3493_v4, %v3619_v35  ;;  %v3992_v41 = vand.u32 4294901760, %v8547_v10  ;;  %v3986_v4 = vand.u32 4294901760, %v8560_v17  ;;  %v3998_v0 = vand.u32 4294901760, %v8549_v56 }
 0x63b   : > { %v8543_v58 = vpack.c.bf16 %v3621_v50, %v3617_v29  ;;  %v8545_v38 = vpack.c.bf16 %v3623_v11, %v3619_v35  ;;  %v8551_v5 = vsub.f32 %v3496_v26, %v3621_v50  ;;  %v8554_v57 = vsub.f32 %v3495_v45, %v3623_v11 }
 0x63c   : > { %v4010_v20 = vand.u32 4294901760, %v8565_v14  ;;  %v9584_v32 = vand.u32 4294901760, %v8311_v40  ;;  %v9586_v29 = vand.u32 4294901760, %v8297_v13  ;;  %v9587_v50 = vand.u32 4294901760, %v8315_v8 }
 0x63d   : > { %9581 = vst [vmem:[#allocation39_spill] sm:$0xff] %v8543_v58  ;;  %9582 = vst [vmem:[#allocation38_spill] sm:$0xff] %v8545_v38  ;;  %5418 = vmatprep.subr.bf16.mxu0 %v8543_v58  ;;  %v4016_v42 = vand.u32 4294901760, %v8551_v5  ;;  %v4022_v26 = vand.u32 4294901760, %v8554_v57  ;;  %v9592_v39 = vand.u32 4294901760, %v8339_v62  ;;  %v9593_v52 = vand.u32 4294901760, %v8357_v49 }
 0x63e   : > { %5420 = vmatpush1.bf16.msra.mxu0 %v8545_v38  ;;  %v8600_v35 = vpack.c.bf16 %v9587_v50, %v9586_v29  ;;  %v9596_v15 = vand.u32 4294901760, %v8395_v47  ;;  %v9599_v50 = vand.u32 4294901760, %v8399_v6 }
 0x63f   : > { %5422 = vmatprep.subr.bf16.mxu0 %v7985_v46  ;;  %v3980_v46 = vand.u32 4294901760, %v8558_v21 }
 0x640   : > { %9588 = vst [vmem:[#allocation40_spill] sm:$0xff] %v8600_v35 }
 0x641   : > { %3636 = vmatmul.mubr.f32.vlgmr.msra.gmra.mrb[68].mxu0 %v3635_v2  ;;  %v9590_v2 = vand.u32 4294901760, %v8353_v36 }
 0x642   : > { %5424 = vmatpush1.bf16.msra.mxu0 %v7988_v30  ;;  %4027 = vmatprep.mubr.f32.mxu0 %v8491_v33  ;;  %v4004_v30 = vand.u32 4294901760, %v8562_v16 }
 0x643   : > { %5426 = vmatprep.subr.bf16.mxu0 %v8025_v3  ;;  %v9583_v3 = vand.u32 4294901760, %v8295_v54 }
 0x645   : > { %v8594_v37 = vpack.c.bf16 %v9584_v32, %v9583_v3  ;;  %v8613_v3 = vpack.c.bf16 %v9593_v52, %v9592_v39  ;;  %v9595_v32 = vand.u32 4294901760, %v8379_v12  ;;  %v9604_v52 = vand.u32 4294901760, %v8423_v61 }
 0x646   : > { %5428 = vmatpush1.bf16.msra.mxu0 %v8041_v31  ;;  %v9589_v31 = vand.u32 4294901760, %v8337_v23  ;;  %v9605_v39 = vand.u32 4294901760, %v8440_v34 }
 0x647   : > { %9585 = vst [vmem:[#allocation41_spill] sm:$0xff] %v8594_v37  ;;  %5430 = vmatprep.subr.bf16.mxu0 %v8067_v55  ;;  %9594 = vst [vmem:[#allocation97_spill] sm:$0xff] %v8613_v3  ;;  %v8619_v29 = vpack.c.bf16 %v9596_v15, %v9595_v32  ;;  %v9598_v55 = vand.u32 4294901760, %v8381_v9  ;;  %v9607_v15 = vand.u32 4294901760, %v8460_v1  ;;  %v9608_v32 = vand.u32 4294901760, %v8478_v22  ;;  %v9680_v37 = vld [vmem:[#allocation76_spill] sm:$0xff] }
 0x648   : > { %v8607_v18 = vpack.c.bf16 %v9590_v2, %v9589_v31  ;;  %v9601_v31 = vand.u32 4294901760, %v8421_v48  ;;  %v9602_v2 = vand.u32 4294901760, %v8436_v24  ;;  %v8637_v43 = vpack.c.bf16 %v9605_v39, %v9604_v52  ;;  %v9617_v39 = vld [vmem:[#allocation74_spill] sm:$0xff] }
 0x649   : > { %9597 = vst [vmem:[#allocation98_spill] sm:$0xff] %v8619_v29  ;;  %v8625_v45 = vpack.c.bf16 %v9599_v50, %v9598_v55  ;;  %v8643_v29 = vpack.c.bf16 %v9608_v32, %v9607_v15  ;;  %v9610_v55 = vand.u32 4294901760, %v8462_v25  ;;  %v9611_v50 = vand.u32 4294901760, %v8482_v60  ;;  %v9618_v15 = vld [vmem:[#allocation21_spill] sm:$0xff]  ;;  %v9619_v32 = vld [vmem:[#allocation22_spill] sm:$0xff] }
 0x64a   : > { %9591 = vst [vmem:[#allocation96_spill] sm:$0xff] %v8607_v18  ;;  %v8631_v11 = vpack.c.bf16 %v9602_v2, %v9601_v31  ;;  %9606 = vst [vmem:[#allocation101_spill] sm:$0xff] %v8637_v43  ;;  %v8651_v31 = vpack.c.bf16 %v3992_v41, %v3980_v46  ;;  %v8653_v2 = vpack.c.bf16 %v3998_v0, %v3986_v4  ;;  %5432 = vmatpush1.bf16.msra.mxu0 %v8083_v51  ;;  %v9622_v51 = vld [vmem:[#allocation25_spill] sm:$0xff]  ;;  %v9677_v18 = vld [vmem:[#allocation75_spill] sm:$0xff] }
 0x64b   : > { %9600 = vst [vmem:[#allocation99_spill] sm:$0xff] %v8625_v45  ;;  %9609 = vst [vmem:[#allocation102_spill] sm:$0xff] %v8643_v29  ;;  %v8649_v45 = vpack.c.bf16 %v9611_v50, %v9610_v55  ;;  %v8657_v52 = vpack.c.bf16 %v4022_v26, %v4010_v20  ;;  %5434 = vmatprep.subr.bf16.mxu0 %v8109_v63  ;;  %v9620_v55 = vld [vmem:[#allocation23_spill] sm:$0xff]  ;;  %v9621_v50 = vld [vmem:[#allocation24_spill] sm:$0xff] }
 0x64c   : > { %9603 = vst [vmem:[#allocation100_spill] sm:$0xff] %v8631_v11  ;;  %9613 = vst [vmem:[#allocation104_spill] sm:$0xff] %v8651_v31  ;;  %v8655_v11 = vpack.c.bf16 %v4016_v42, %v4004_v30  ;;  %v9623_v63 = vld [vmem:[#allocation89_spill] sm:$0xff] }
 0x64d   : > { %9612 = vst [vmem:[#allocation103_spill] sm:$0xff] %v8649_v45  ;;  %9614 = vst [vmem:[#allocation105_spill] sm:$0xff] %v8653_v2  ;;  %v9668_v2 = vld [vmem:[#allocation63_spill] sm:$0xff]  ;;  %v9671_v45 = vld [vmem:[#allocation68_spill] sm:$0xff] }
 0x64e   : > { %9615 = vst [vmem:[#allocation106_spill] sm:$0xff] %v8655_v11  ;;  %9616 = vst [vmem:[#allocation107_spill] sm:$0xff] %v8657_v52  ;;  %5436 = vmatpush1.bf16.msra.mxu0 %v8125_v59  ;;  %v9624_v59 = vld [vmem:[#allocation92_spill] sm:$0xff]  ;;  %v9674_v43 = vld [vmem:[#allocation69_spill] sm:$0xff] }
 0x64f   : > { %5438 = vmatprep.subr.bf16.mxu0 %v8151_v7  ;;  %v9625_v7 = vld [vmem:[#allocation93_spill] sm:$0xff] }
 0x652   : > { %5440 = vmatpush1.bf16.msra.mxu0 %v8167_v53  ;;  %v9626_v53 = vld [vmem:[#allocation27_spill] sm:$0xff] }
 0x653   : > { %5442 = vmatprep.subr.bf16.mxu0 %v8193_v28  ;;  %v9627_v28 = vld [vmem:[#allocation26_spill] sm:$0xff] }
 0x656   : > { %5444 = vmatpush1.bf16.msra.mxu0 %v9617_v39  ;;  %v9628_v39 = vld [vmem:[#allocation31_spill] sm:$0xff] }
 0x657   : > { %5446 = vmatprep.subr.bf16.mxu0 %v9618_v15  ;;  %v3993_v15 = vsub.f32 %v8547_v10, %v3992_v41  ;;  %v4005_v41 = vsub.f32 %v8562_v16, %v4004_v30  ;;  %v9632_v30 = vld [vmem:[#allocation45_spill] sm:$0xff] }
 0x65a   : > { %5448 = vmatpush1.bf16.msra.mxu0 %v9619_v32  ;;  %v9629_v32 = vld [vmem:[#allocation30_spill] sm:$0xff] }
 0x65b   : > { %5450 = vmatprep.subr.bf16.mxu0 %v9620_v55  ;;  %v9630_v55 = vld [vmem:[#allocation6_spill] sm:$0xff] }
 0x65e   : > { %5452 = vmatpush1.bf16.msra.mxu0 %v9621_v50  ;;  %v3981_v50 = vsub.f32 %v8558_v21, %v3980_v46 }
 0x65f   : > { %5454 = vmatprep.subr.bf16.mxu0 %v9622_v51  ;;  %v3999_v51 = vsub.f32 %v8549_v56, %v3998_v0  ;;  %v4011_v0 = vsub.f32 %v8565_v14, %v4010_v20  ;;  %v9639_v20 = vld [vmem:[#allocation34_spill] sm:$0xff] }
 0x662   : > { %5456 = vmatpush1.bf16.msra.mxu0 %v9623_v63  ;;  %v3994_v63 = vand.u32 4294901760, %v3993_v15 }
 0x663   : > { %5458 = vmatprep.subr.bf16.mxu0 %v9624_v59  ;;  %v4017_v59 = vsub.f32 %v8551_v5, %v4016_v42  ;;  %v4006_v42 = vand.u32 4294901760, %v4005_v41  ;;  %v9641_v41 = vld [vmem:[#allocation48_spill] sm:$0xff] }
 0x665   : > { %v4018_v52 = vand.u32 4294901760, %v4017_v59  ;;  %v9637_v59 = vld [vmem:[#allocation43_spill] sm:$0xff] }
 0x666   : > { %5460 = vmatpush1.bf16.msra.mxu0 %v9625_v7  ;;  %v9631_v7 = vld [vmem:[#allocation35_spill] sm:$0xff] }
 0x667   : > { %5462 = vmatprep.subr.bf16.mxu0 %v9626_v53  ;;  %v3987_v53 = vsub.f32 %v8560_v17, %v3986_v4  ;;  %v5481_v4 = vpack.c.bf16 %v4018_v52, %v4006_v42 }
 0x669   : > { %v3988_v46 = vand.u32 4294901760, %v3987_v53 }
 0x66a   : > { %5464 = vmatpush1.bf16.msra.mxu0 %v9627_v28  ;;  %v3982_v28 = vand.u32 4294901760, %v3981_v50 }
 0x66b   : > { %5466 = vmatprep.subr.bf16.mxu0 %v9628_v39  ;;  %v4000_v39 = vand.u32 4294901760, %v3999_v51  ;;  %v9633_v51 = vld [vmem:[#allocation42_spill] sm:$0xff] }
 0x66d   : > { %v5479_v15 = vpack.c.bf16 %v4000_v39, %v3988_v46  ;;  %v9643_v39 = vld [vmem:[#allocation55_spill] sm:$0xff] }
 0x66e   : > { %5468 = vmatpush1.bf16.msra.mxu0 %v9629_v32  ;;  %v4023_v32 = vsub.f32 %v8554_v57, %v4022_v26  ;;  %v9634_v26 = vpack.c.bf16 %v9632_v30, %v9633_v51  ;;  %v9646_v46 = vld [vmem:[#allocation11_spill] sm:$0xff] }
 0x66f   : > { %5470 = vmatprep.subr.bf16.mxu0 %v9630_v55  ;;  %v5477_v55 = vpack.c.bf16 %v3994_v63, %v3982_v28  ;;  %v9635_v63 = vld [vmem:[#allocation7_spill] sm:$0xff]  ;;  %v9640_v28 = vld [vmem:[#allocation53_spill] sm:$0xff] }
 0x670   : > { %v9642_v52 = vpack.c.bf16 %v9640_v28, %v9641_v41  ;;  %v9655_v51 = vld [vmem:[#allocation19_spill] sm:$0xff]  ;;  %v9661_v41 = vld [vmem:[#allocation61_spill] sm:$0xff] }
 0x672   : > { %5472 = vmatpush1.bf16.msra.mxu0 %v9631_v7  ;;  %v4024_v7 = vand.u32 4294901760, %v4023_v32  ;;  %v9644_v32 = vld [vmem:[#allocation49_spill] sm:$0xff] }
 0x673   : > { %5474 = vmatprep.subr.bf16.mxu0 %v8536_v44  ;;  %v4012_v44 = vand.u32 4294901760, %v4011_v0  ;;  %v9647_v0 = vld [vmem:[#allocation56_spill] sm:$0xff] }
 0x674   : > { %v9648_v42 = vpack.c.bf16 %v9646_v46, %v9647_v0 }
 0x675   : > { %v5483_v50 = vpack.c.bf16 %v4024_v7, %v4012_v44  ;;  %v9650_v7 = vld [vmem:[#allocation10_spill] sm:$0xff]  ;;  %v9652_v44 = vld [vmem:[#allocation17_spill] sm:$0xff] }
 0x676   : > { %5476 = vmatpush1.bf16.msra.mxu0 %v8538_v27  ;;  %v9636_v27 = vld [vmem:[#allocation47_spill] sm:$0xff] }
 0x677   : > { %5478 = vmatprep.subr.bf16.mxu0 %v5477_v55  ;;  %v9638_v53 = vpack.c.bf16 %v9636_v27, %v9637_v59  ;;  %v9645_v55 = vpack.c.bf16 %v9643_v39, %v9644_v32  ;;  %v9658_v59 = vld [vmem:[#allocation59_spill] sm:$0xff] }
 0x67a   : > { %5480 = vmatpush1.bf16.msra.mxu0 %v5479_v15  ;;  %v9649_v15 = vld [vmem:[#allocation13_spill] sm:$0xff] }
 0x67b   : > { %5482 = vmatprep.subr.bf16.mxu0 %v5481_v4  ;;  %v9651_v4 = vpack.c.bf16 %v9649_v15, %v9650_v7 }
 0x67e   : > { %5484 = vmatpush1.bf16.msra.mxu0 %v5483_v50  ;;  %v9653_v50 = vld [vmem:[#allocation14_spill] sm:$0xff] }
 0x67f   : > { %5486 = vmatprep.subr.bf16.mxu0 %v9634_v26  ;;  %v9654_v30 = vpack.c.bf16 %v9652_v44, %v9653_v50  ;;  %v9656_v26 = vld [vmem:[#allocation15_spill] sm:$0xff] }
 0x680   : > { %v9657_v27 = vpack.c.bf16 %v9655_v51, %v9656_v26 }
 0x681   : > { %4029 = vmatmul.mubr.f32.vlgmr.msra.gmra.mrb[68].mxu0 %v9635_v63  ;;  %v9665_v63 = vld [vmem:[#allocation62_spill] sm:$0xff] }
 0x682   : > { %5488 = vmatpush1.bf16.msra.mxu0 %v9638_v53  ;;  %4229 = vmatprep.mubr.f32.mxu0 %v9639_v20  ;;  %v9659_v53 = vld [vmem:[#allocation20_spill] sm:$0xff] }
 0x683   : > { %5490 = vmatprep.subr.bf16.mxu0 %v9642_v52  ;;  %v9660_v28 = vpack.c.bf16 %v9658_v59, %v9659_v53  ;;  %v9662_v52 = vld [vmem:[#allocation57_spill] sm:$0xff] }
 0x686   : > { %5492 = vmatpush1.bf16.msra.mxu0 %v9645_v55  ;;  %v9663_v55 = vpack.c.bf16 %v9661_v41, %v9662_v52 }
 0x687   : > { %5494 = vmatprep.subr.bf16.mxu0 %v9648_v42  ;;  %v9664_v42 = vld [vmem:[#allocation65_spill] sm:$0xff] }
 0x688   : > { %v9666_v11 = vpack.c.bf16 %v9664_v42, %v9665_v63  ;;  %v9683_v63 = vld [vmem:[#allocation81_spill] sm:$0xff] }
 0x68a   : > { %5496 = vmatpush1.bf16.msra.mxu0 %v9651_v4  ;;  %v9667_v4 = vld [vmem:[#allocation67_spill] sm:$0xff] }
 0x68b   : > { %5498 = vmatprep.subr.bf16.mxu0 %v9654_v30  ;;  %v9669_v31 = vpack.c.bf16 %v9667_v4, %v9668_v2  ;;  %v9670_v30 = vld [vmem:[#allocation71_spill] sm:$0xff]  ;;  %v9686_v2 = vld [vmem:[#allocation82_spill] sm:$0xff] }
 0x68c   : > { %v9672_v29 = vpack.c.bf16 %v9670_v30, %v9671_v45 }
 0x68e   : > { %5500 = vmatpush1.bf16.msra.mxu0 %v9657_v27  ;;  %v9673_v27 = vld [vmem:[#allocation73_spill] sm:$0xff] }
 0x68f   : > { %5502 = vmatprep.subr.bf16.mxu0 %v9660_v28  ;;  %v9675_v3 = vpack.c.bf16 %v9673_v27, %v9674_v43  ;;  %v9676_v28 = vld [vmem:[#allocation78_spill] sm:$0xff] }
 0x690   : > { %v9678_v35 = vpack.c.bf16 %v9676_v28, %v9677_v18 }
 0x692   : > { %5504 = vmatpush1.bf16.msra.mxu0 %v9663_v55  ;;  %v9679_v55 = vld [vmem:[#allocation80_spill] sm:$0xff] }
 0x693   : > { %5506 = vmatprep.subr.bf16.mxu0 %v9666_v11  ;;  %v9681_v42 = vpack.c.bf16 %v9679_v55, %v9680_v37  ;;  %v9682_v11 = vld [vmem:[#allocation84_spill] sm:$0xff] }
 0x694   : > { %v9684_v4 = vpack.c.bf16 %v9682_v11, %v9683_v63 }
 0x696   : > { %5508 = vmatpush1.bf16.msra.mxu0 %v9669_v31  ;;  %v9685_v31 = vld [vmem:[#allocation86_spill] sm:$0xff] }
 0x697   : > { %5510 = vmatprep.subr.bf16.mxu0 %v9672_v29  ;;  %v9687_v30 = vpack.c.bf16 %v9685_v31, %v9686_v2  ;;  %v9688_v29 = vpack.c.bf16 %v8311_v40, %v8295_v54  ;;  %v9693_v54 = vpack.c.bf16 %v8399_v6, %v8381_v9  ;;  %v9695_v40 = vpack.c.bf16 %v8440_v34, %v8423_v61  ;;  %v9702_v9 = vld [vmem:[#allocation44_spill] sm:$0xff]  ;;  %v9706_v6 = vld [vmem:[#allocation54_spill] sm:$0xff]  ;;  %v9707_v61 = vld [vmem:[#allocation9_spill] sm:$0xff] }
 0x698   : > { %v9709_v34 = vld [vmem:[#allocation16_spill] sm:$0xff] }
 0x69a   : > { %5512 = vmatpush1.bf16.msra.mxu0 %v9675_v3  ;;  %v9689_v3 = vpack.c.bf16 %v8315_v8, %v8297_v13  ;;  %v9694_v13 = vpack.c.bf16 %v8436_v24, %v8421_v48  ;;  %v9696_v8 = vpack.c.bf16 %v8478_v22, %v8460_v1  ;;  %v9701_v22 = vpack.c.bf16 %v8554_v57, %v8565_v14  ;;  %v9708_v24 = vld [vmem:[#allocation12_spill] sm:$0xff]  ;;  %v9710_v1 = vld [vmem:[#allocation18_spill] sm:$0xff]  ;;  %v9720_v14 = vld [vmem:[#allocation85_spill] sm:$0xff] }
 0x69b   : > { %5514 = vmatprep.subr.bf16.mxu0 %v9678_v35  ;;  %v9690_v35 = vpack.c.bf16 %v8353_v36, %v8337_v23  ;;  %v9698_v23 = vpack.c.bf16 %v8547_v10, %v8558_v21  ;;  %v9699_v36 = vpack.c.bf16 %v8549_v56, %v8560_v17  ;;  %v9704_v48 = vand.u32 4294901760, %v9639_v20  ;;  %v9713_v10 = vld [vmem:[#allocation64_spill] sm:$0xff]  ;;  %v9714_v56 = vld [vmem:[#allocation66_spill] sm:$0xff]  ;;  %v9717_v21 = vld [vmem:[#allocation77_spill] sm:$0xff] }
 0x69c   : > { %v9716_v57 = vld [vmem:[#allocation72_spill] sm:$0xff]  ;;  %v9718_v17 = vld [vmem:[#allocation79_spill] sm:$0xff] }
 0x69d   : > { %v9721_v20 = vld [vmem:[#allocation87_spill] sm:$0xff] }
 0x69e   : > { %5516 = vmatpush1.bf16.msra.mxu0 %v9681_v42  ;;  %v9691_v42 = vpack.c.bf16 %v8357_v49, %v8339_v62  ;;  %v9697_v62 = vpack.c.bf16 %v8482_v60, %v8462_v25  ;;  %v9700_v49 = vpack.c.bf16 %v8551_v5, %v8562_v16  ;;  %v9711_v25 = vld [vmem:[#allocation58_spill] sm:$0xff]  ;;  %v9712_v60 = vld [vmem:[#allocation60_spill] sm:$0xff]  ;;  %v9719_v16 = vld [vmem:[#allocation83_spill] sm:$0xff] }
 0x69f   : > { %5518 = vmatprep.subr.bf16.mxu0 %v9684_v4  ;;  %v9692_v4 = vpack.c.bf16 %v8395_v47, %v8379_v12  ;;  %v9703_v12 = vld [vmem:[#allocation46_spill] sm:$0xff]  ;;  %v9705_v47 = vld [vmem:[#allocation52_spill] sm:$0xff] }
 0x6a0   : > { %v9715_v5 = vld [vmem:[#allocation70_spill] sm:$0xff] }
 0x6a2   : > { %5520 = vmatpush1.bf16.msra.mxu0 %v9687_v30  ;;  %v9722_v30 = vld [vmem:[#allocation88_spill] sm:$0xff] }
 0x6a3   : > { %5522 = vmatprep.subr.bf16.mxu0 %v9688_v29  ;;  %v9723_v29 = vld [vmem:[#allocation90_spill] sm:$0xff] }
 0x6a6   : > { %5524 = vmatpush1.bf16.msra.mxu0 %v9689_v3  ;;  %v9724_v3 = vld [vmem:[#allocation91_spill] sm:$0xff] }
 0x6a7   : > { %5526 = vmatprep.subr.bf16.mxu0 %v9690_v35  ;;  %v9725_v35 = vld [vmem:[#allocation94_spill] sm:$0xff] }
 0x6aa   : > { %5528 = vmatpush1.bf16.msra.mxu0 %v9691_v42  ;;  %v9726_v42 = vld [vmem:[#allocation95_spill] sm:$0xff] }
 0x6ab   : > { %5530 = vmatprep.subr.bf16.mxu0 %v9692_v4  ;;  %v9727_v4 = vld [vmem:[#allocation29_spill] sm:$0xff] }
 0x6ae   : > { %5532 = vmatpush1.bf16.msra.mxu0 %v9693_v54  ;;  %v9728_v54 = vld [vmem:[#allocation28_spill] sm:$0xff] }
 0x6af   : > { %5534 = vmatprep.subr.bf16.mxu0 %v9694_v13  ;;  %v9729_v13 = vld [vmem:[#allocation33_spill] sm:$0xff] }
 0x6b2   : > { %5536 = vmatpush1.bf16.msra.mxu0 %v9695_v40  ;;  %v9730_v40 = vld [vmem:[#allocation32_spill] sm:$0xff] }
 0x6b3   : > { %5538 = vmatprep.subr.bf16.mxu0 %v9696_v8  ;;  %v9731_v8 = vld [vmem:[#allocation37_spill] sm:$0xff] }
 0x6b6   : > { %5540 = vmatpush1.bf16.msra.mxu0 %v9697_v62  ;;  %v9732_v62 = vld [vmem:[#allocation36_spill] sm:$0xff] }
 0x6b7   : > { %5542 = vmatprep.subr.bf16.mxu0 %v9698_v23  ;;  %v9733_v23 = vld [vmem:[#allocation50_spill] sm:$0xff] }
 0x6ba   : > { %5544 = vmatpush1.bf16.msra.mxu0 %v9699_v36  ;;  %v9734_v36 = vand.u32 4294901760, %v8512_v19 }
 0x6bb   : > { %5546 = vmatprep.subr.bf16.mxu0 %v9700_v49  ;;  %v9735_v49 = vld [vmem:[#allocation51_spill] sm:$0xff] }
 0x6be   : > { %5548 = vmatpush1.bf16.msra.mxu0 %v9701_v22  ;;  %v9736_v22 = vld [vmem:[#allocation8_spill] sm:$0xff] }
 0x6bf   : > { %5550 = vmatprep.subr.bf16.mxu0 %v9702_v9 }
 0x6c1   : > { %4232 = vmatmul.mubr.f32.vlgmr.msra.gmra.mrb[68].mxu0 %v8512_v19  ;;  %v9741_v19 = vand.u32 4294901760, %v9650_v7 }
 0x6c2   : > { %5552 = vmatpush1.bf16.msra.mxu0 %v9703_v12  ;;  %4369 = vmatprep.mubr.f32.mxu0 %v9704_v48  ;;  %v9737_v48 = vand.u32 4294901760, %v9644_v32 }
 0x6c3   : > { %5554 = vmatprep.subr.bf16.mxu0 %v9705_v47 }
 0x6c6   : > { %5556 = vmatpush1.bf16.msra.mxu0 %v9706_v6 }
 0x6c7   : > { %5558 = vmatprep.subr.bf16.mxu0 %v9707_v61 }
 0x6ca   : > { %5560 = vmatpush1.bf16.msra.mxu0 %v9708_v24 }
 0x6cb   : > { %5562 = vmatprep.subr.bf16.mxu0 %v9709_v34 }
 0x6ce   : > { %5564 = vmatpush1.bf16.msra.mxu0 %v9710_v1 }
 0x6cf   : > { %5566 = vmatprep.subr.bf16.mxu0 %v9711_v25 }
 0x6d2   : > { %5568 = vmatpush1.bf16.msra.mxu0 %v9712_v60 }
 0x6d3   : > { %5570 = vmatprep.subr.bf16.mxu0 %v9713_v10 }
 0x6d6   : > { %5572 = vmatpush1.bf16.msra.mxu0 %v9714_v56 }
 0x6d7   : > { %5574 = vmatprep.subr.bf16.mxu0 %v9715_v5 }
 0x6da   : > { %5576 = vmatpush1.bf16.msra.mxu0 %v9716_v57 }
 0x6db   : > { %5578 = vmatprep.subr.bf16.mxu0 %v9717_v21 }
 0x6de   : > { %5580 = vmatpush1.bf16.msra.mxu0 %v9718_v17 }
 0x6df   : > { %5582 = vmatprep.subr.bf16.mxu0 %v9719_v16 }
 0x6e2   : > { %5584 = vmatpush1.bf16.msra.mxu0 %v9720_v14 }
 0x6e3   : > { %5586 = vmatprep.subr.bf16.mxu0 %v9721_v20 }
 0x6e6   : > { %5588 = vmatpush1.bf16.msra.mxu0 %v9722_v30 }
 0x6e7   : > { %5590 = vmatprep.subr.bf16.mxu0 %v9723_v29 }
 0x6ea   : > { %5592 = vmatpush1.bf16.msra.mxu0 %v9724_v3 }
 0x6eb   : > { %5594 = vmatprep.subr.bf16.mxu0 %v9725_v35 }
 0x6ee   : > { %5596 = vmatpush1.bf16.msra.mxu0 %v9726_v42 }
 0x6ef   : > { %5598 = vmatprep.subr.bf16.mxu0 %v9727_v4 }
 0x6f2   : > { %5600 = vmatpush1.bf16.msra.mxu0 %v9728_v54 }
 0x6f3   : > { %5602 = vmatprep.subr.bf16.mxu0 %v9729_v13 }
 0x6f6   : > { %5604 = vmatpush1.bf16.msra.mxu0 %v9730_v40 }
 0x6f7   : > { %5606 = vmatprep.subr.bf16.mxu0 %v9731_v8  ;;  %v9738_v8 = vand.u32 4294901760, %v9643_v39  ;;  %v9745_v39 = vand.u32 4294901760, %v9656_v26 }
 0x6fa   : > { %5608 = vmatpush1.bf16.msra.mxu0 %v9732_v62  ;;  %v5619_v62 = vpack.c.bf16 %v9738_v8, %v9737_v48 }
 0x6fb   : > { %5610 = vmatprep.subr.bf16.mxu0 %v8543_v58  ;;  %v9739_v58 = vand.u32 4294901760, %v9647_v0  ;;  %v9746_v0 = vand.u32 4294901760, %v9655_v51  ;;  %v9755_v51 = vld [vmem:[#allocation63_spill] sm:$0xff] }
 0x6fe   : > { %5612 = vmatpush1.bf16.msra.mxu0 %v8545_v38  ;;  %v9740_v38 = vand.u32 4294901760, %v9646_v46  ;;  %v5627_v46 = vpack.c.bf16 %v9746_v0, %v9745_v39  ;;  %v9764_v0 = vand.u32 4294901760, %v9677_v18  ;;  %v9771_v18 = vand.u32 4294901760, %v9685_v31  ;;  %v9781_v31 = vld [vmem:[#allocation103_spill] sm:$0xff] }
 0x6ff   : > { %5614 = vmatprep.subr.bf16.mxu0 %v9733_v23  ;;  %v9742_v23 = vand.u32 4294901760, %v9649_v15  ;;  %v9749_v15 = vand.u32 4294901760, %v9662_v52 }
 0x700   : > { %v5621_v40 = vpack.c.bf16 %v9740_v38, %v9739_v58  ;;  %v9747_v58 = vand.u32 4294901760, %v9659_v53  ;;  %v9748_v38 = vand.u32 4294901760, %v9658_v59  ;;  %v9757_v53 = vld [vmem:[#allocation67_spill] sm:$0xff] }
 0x701   : > { %4373 = vmatmul.mubr.f32.vlgmr.msra.gmra.mrb[68].mxu0 %v9734_v36  ;;  %v5623_v36 = vpack.c.bf16 %v9742_v23, %v9741_v19  ;;  %v9756_v19 = vand.u32 4294901760, %v9755_v51  ;;  %v9758_v23 = vand.u32 4294901760, %v9757_v53  ;;  %v9784_v51 = vld [vmem:[#allocation106_spill] sm:$0xff]  ;;  %v9786_v53 = vld [vmem:[#allocation7_spill] sm:$0xff] }
 0x702   : > { %5616 = vmatpush1.bf16.msra.mxu0 %v9735_v49  ;;  %4636 = vmatprep.mubr.f32.mxu0 %v8491_v33  ;;  %v9743_v49 = vand.u32 4294901760, %v9653_v50  ;;  %v5629_v7 = vpack.c.bf16 %v9748_v38, %v9747_v58  ;;  %v9750_v50 = vand.u32 4294901760, %v9661_v41  ;;  %v9762_v41 = vand.u32 4294901760, %v9674_v43 }
 0x703   : > { %5618 = vmatprep.subr.bf16.mxu0 %v9736_v22  ;;  %v9744_v22 = vand.u32 4294901760, %v9652_v44  ;;  %v5635_v59 = vpack.c.bf16 %v9758_v23, %v9756_v19  ;;  %v9766_v38 = vand.u32 4294901760, %v9680_v37  ;;  %v9774_v37 = vld [vmem:[#allocation96_spill] sm:$0xff]  ;;  %v9785_v19 = vld [vmem:[#allocation107_spill] sm:$0xff] }
 0x704   : > { %v5631_v44 = vpack.c.bf16 %v9750_v50, %v9749_v15  ;;  %v9768_v15 = vand.u32 4294901760, %v9683_v63  ;;  %v9769_v50 = vand.u32 4294901760, %v9682_v11  ;;  %v9776_v63 = vld [vmem:[#allocation98_spill] sm:$0xff]  ;;  %v9777_v11 = vld [vmem:[#allocation99_spill] sm:$0xff] }
 0x705   : > { %v5625_v32 = vpack.c.bf16 %v9744_v22, %v9743_v49  ;;  %v9760_v49 = vld [vmem:[#allocation71_spill] sm:$0xff] }
 0x706   : > { %5620 = vmatpush1.bf16.msra.mxu0 %v5619_v62  ;;  %v9753_v62 = vld [vmem:[#allocation65_spill] sm:$0xff]  ;;  %v9761_v22 = vand.u32 4294901760, %v9760_v49  ;;  %v5645_v43 = vpack.c.bf16 %v9769_v50, %v9768_v15 }
 0x707   : > { %5622 = vmatprep.subr.bf16.mxu0 %v5621_v40  ;;  %v9751_v40 = vld [vmem:[#allocation62_spill] sm:$0xff]  ;;  %v9754_v48 = vand.u32 4294901760, %v9753_v62  ;;  %v9779_v62 = vld [vmem:[#allocation101_spill] sm:$0xff] }
 0x708   : > { %v9752_v8 = vand.u32 4294901760, %v9751_v40  ;;  %v9773_v40 = vld [vmem:[#allocation40_spill] sm:$0xff] }
 0x70a   : > { %5624 = vmatpush1.bf16.msra.mxu0 %v5623_v36  ;;  %v5633_v26 = vpack.c.bf16 %v9754_v48, %v9752_v8  ;;  %v9759_v36 = vand.u32 4294901760, %v9671_v45  ;;  %v9767_v45 = vand.u32 4294901760, %v9679_v55  ;;  %v9775_v55 = vld [vmem:[#allocation97_spill] sm:$0xff]  ;;  %v9778_v8 = vld [vmem:[#allocation100_spill] sm:$0xff] }
 0x70b   : > { %5626 = vmatprep.subr.bf16.mxu0 %v5625_v32  ;;  %v9763_v32 = vand.u32 4294901760, %v9673_v27  ;;  %v9770_v27 = vand.u32 4294901760, %v9686_v2  ;;  %v9780_v2 = vld [vmem:[#allocation102_spill] sm:$0xff]  ;;  %v9782_v48 = vld [vmem:[#allocation104_spill] sm:$0xff] }
 0x70c   : > { %v5637_v52 = vpack.c.bf16 %v9761_v22, %v9759_v36  ;;  %v6343_v22 = vld [vmem:[%s6508_s15] sm:$0xff]  ;;  %s6344_s15 = scalar_lea.vmem %s8959_s10, 128 }
 0x70d   : > { %v5639_v39 = vpack.c.bf16 %v9763_v32, %v9762_v41  ;;  %v9793_v41 = vld [vmem:[#allocation5_spill] sm:$0xff]  ;;  %p6345_p11 = scmp.ne.s32.totalorder %s8959_s10, %s6344_s15  ;;  %p6352_p1 = scmp.lt.s32.totalorder %s6350_s17, %s6344_s15 }
 0x70e   : > { %5628 = vmatpush1.bf16.msra.mxu0 %v5627_v46  ;;  %v9765_v46 = vand.u32 4294901760, %v9676_v28  ;;  %v5647_v28 = vpack.c.bf16 %v9771_v18, %v9770_v27 }
 0x70f   : > { %5630 = vmatprep.subr.bf16.mxu0 %v5629_v7  ;;  %v5643_v7 = vpack.c.bf16 %v9767_v45, %v9766_v38  ;;  %p6346_p12 = pnand %p6345_p11, %p6479_p5  ;;  %p6353_p2 = por %p6352_p1, %p6351_p0 }
 0x710   : > { %v5641_v58 = vpack.c.bf16 %v9765_v46, %v9764_v0 }
 0x711   : > { %p6347_p13 = pneg %p6346_p12 }
 0x712   : > { %5632 = vmatpush1.bf16.msra.mxu0 %v5631_v44  ;;  %v9772_v44 = vld [vmem:[#allocation41_spill] sm:$0xff] }
 0x713   : > { %5634 = vmatprep.subr.bf16.mxu0 %v5633_v26  ;;  %v9783_v26 = vld [vmem:[#allocation105_spill] sm:$0xff]  ;;  %p6354_p3 = pnand %p6353_p2, %p6347_p13 }
 0x716   : > { %5636 = vmatpush1.bf16.msra.mxu0 %v5635_v59 }
 0x717   : > { %5638 = vmatprep.subr.bf16.mxu0 %v5637_v52 }
 0x71a   : > { %5640 = vmatpush1.bf16.msra.mxu0 %v5639_v39 }
 0x71b   : > { %5642 = vmatprep.subr.bf16.mxu0 %v5641_v58 }
 0x71e   : > { %5644 = vmatpush1.bf16.msra.mxu0 %v5643_v7 }
 0x71f   : > { %5646 = vmatprep.subr.bf16.mxu0 %v5645_v43 }
 0x722   : > { %5648 = vmatpush1.bf16.msra.mxu0 %v5647_v28 }
 0x723   : > { %5650 = vmatprep.subr.bf16.mxu0 %v9772_v44 }
 0x726   : > { %5652 = vmatpush1.bf16.msra.mxu0 %v9773_v40 }
 0x727   : > { %5654 = vmatprep.subr.bf16.mxu0 %v9774_v37 }
 0x72a   : > { %5656 = vmatpush1.bf16.msra.mxu0 %v9775_v55 }
 0x72b   : > { %5658 = vmatprep.subr.bf16.mxu0 %v9776_v63 }
 0x72e   : > { %5660 = vmatpush1.bf16.msra.mxu0 %v9777_v11 }
 0x72f   : > { %5662 = vmatprep.subr.bf16.mxu0 %v9778_v8 }
 0x732   : > { %5664 = vmatpush1.bf16.msra.mxu0 %v9779_v62 }
 0x733   : > { %5666 = vmatprep.subr.bf16.mxu0 %v9780_v2 }
 0x736   : > { %5668 = vmatpush1.bf16.msra.mxu0 %v9781_v31 }
 0x737   : > { %5670 = vmatprep.subr.bf16.mxu0 %v9782_v48 }
 0x73a   : > { %5672 = vmatpush1.bf16.msra.mxu0 %v9783_v26 }
 0x73b   : > { %5674 = vmatprep.subr.bf16.mxu0 %v9784_v51 }
 0x73e   : > { %5676 = vmatpush1.bf16.msra.mxu0 %v9785_v19 }
 0x73f   : > { %5678 = vmatprep.subr.bf16.mxu0 %v9702_v9  ;;  %v9788_v9 = vld [vmem:[#allocation37_spill] sm:$0xff] }
 0x741   : > { %4638 = vmatmul.mubr.f32.vlgmr.msra.gmra.mrb[68].mxu0 %v9786_v53 }
 0x742   : > { %5680 = vmatpush1.bf16.msra.mxu0 %v9703_v12  ;;  %4773 = vmatprep.mubr.f32.mxu0 %v8491_v33  ;;  %v9787_v33 = vld [vmem:[#allocation32_spill] sm:$0xff] }
 0x743   : > { %5682 = vmatprep.subr.bf16.mxu0 %v9705_v47  ;;  %v9789_v12 = vld [vmem:[#allocation36_spill] sm:$0xff]  ;;  %v9790_v47 = vld [vmem:[#allocation39_spill] sm:$0xff] }
 0x746   : > { %5684 = vmatpush1.bf16.msra.mxu0 %v9706_v6  ;;  %v9791_v6 = vld [vmem:[#allocation38_spill] sm:$0xff] }
 0x747   : > { %5686 = vmatprep.subr.bf16.mxu0 %v9707_v61  ;;  %v9792_v61 = vmov 0.0  }
 0x74a   : > { %5688 = vmatpush1.bf16.msra.mxu0 %v9708_v24  ;;  %v766_v24 = vld [vmem:[%s9002_s3] sm:$0xf] }
 0x74b   : > { %5690 = vmatprep.subr.bf16.mxu0 %v9709_v34  ;;  %v4788_v34 = vsel %vm240_vm0, %v766_v24, 0 }
 0x74e   : > { %5692 = vmatpush1.bf16.msra.mxu0 %v9710_v1  ;;  %v4863_v1 = vand.u32 4294901760, %v4788_v34 }
 0x74f   : > { %5694 = vmatprep.subr.bf16.mxu0 %v9711_v25 }
 0x750   : > { %v4864_v25 = vsub.f32 %v4788_v34, %v4863_v1 }
 0x752   : > { %5696 = vmatpush1.bf16.msra.mxu0 %v9712_v60  ;;  %v4865_v60 = vand.u32 4294901760, %v4864_v25 }
 0x753   : > { %5698 = vmatprep.subr.bf16.mxu0 %v9713_v10 }
 0x754   : > { %v4866_v10 = vsub.f32 %v4864_v25, %v4865_v60 }
 0x756   : > { %5700 = vmatpush1.bf16.msra.mxu0 %v9714_v56 }
 0x757   : > { %5702 = vmatprep.subr.bf16.mxu0 %v9715_v5 }
 0x75a   : > { %5704 = vmatpush1.bf16.msra.mxu0 %v9716_v57 }
 0x75b   : > { %5706 = vmatprep.subr.bf16.mxu0 %v9717_v21 }
 0x75e   : > { %5708 = vmatpush1.bf16.msra.mxu0 %v9718_v17 }
 0x75f   : > { %5710 = vmatprep.subr.bf16.mxu0 %v9719_v16 }
 0x762   : > { %5712 = vmatpush1.bf16.msra.mxu0 %v9720_v14  ;;  %v4867_v14 = vand.u32 4294901760, %v4866_v10 }
 0x763   : > { %5714 = vmatprep.subr.bf16.mxu0 %v9721_v20 }
 0x766   : > { %5716 = vmatpush1.bf16.msra.mxu0 %v9722_v30 }
 0x767   : > { %5718 = vmatprep.subr.bf16.mxu0 %v9723_v29 }
 0x76a   : > { %5720 = vmatpush1.bf16.msra.mxu0 %v9724_v3 }
 0x76b   : > { %5722 = vmatprep.subr.bf16.mxu0 %v9725_v35 }
 0x76e   : > { %5724 = vmatpush1.bf16.msra.mxu0 %v9726_v42 }
 0x76f   : > { %5726 = vmatprep.subr.bf16.mxu0 %v9727_v4 }
 0x772   : > { %5728 = vmatpush1.bf16.msra.mxu0 %v9728_v54 }
 0x773   : > { %5730 = vmatprep.subr.bf16.mxu0 %v9729_v13  ;;  %v4785_v13 = vpop.permute.xlu0 %4784 }
 0x776   : > { %5732 = vmatpush1.bf16.msra.mxu0 %v9787_v33 }
 0x777   : > { %5734 = vmatprep.subr.bf16.mxu0 %v9788_v9 }
 0x77a   : > { %5736 = vmatpush1.bf16.msra.mxu0 %v9789_v12 }
 0x77b   : > { %5738 = vmatprep.subr.bf16.mxu0 %v9790_v47 }
 0x77e   : > { %5740 = vmatpush1.bf16.msra.mxu0 %v9791_v6 }
 0x781   : > { %4775 = vmatmul.mubr.f32.vlgmr.msra.gmra.mrb[68].mxu0 %v9786_v53 }
 0x782   : > { %4862 = vmatprep.mubr.f32.mxu0 %v9792_v61 }
 0x854   : > { %v4776_v56 = vpop.f32.mrb[68].mxu0 }
 0x855   : > { %v4791_v5 = vsel %vm247_vm1, %v4776_v56, 0  ;;  %v4778_v57 = vpop.f32.mrb[69].mxu0 }
 0x856   : > { %v4798_v21 = vand.u32 4294901760, %v4791_v5  ;;  %v4794_v17 = vsel %vm247_vm1, %v4778_v57, 0 }
 0x857   : > { %v4796_v16 = vand.u32 4294901760, %v4794_v17 }
 0x858   : > { %v4881_v20 = vsub.f32 %v4791_v5, %v4798_v21 }
 0x859   : > { %v4875_v30 = vsub.f32 %v4794_v17, %v4796_v16  ;;  %4797 = vmatprep.subr.mxu0 %v4796_v16 }
 0x85a   : > { %v4882_v29 = vand.u32 4294901760, %v4881_v20  ;;  %4799 = vmatpush1.msra.mxu0 %v4798_v21 }
 0x85b   : > { %v4876_v3 = vand.u32 4294901760, %v4875_v30  ;;  %4868 = vmatmul.mubr.f32.vlgmr.msra.gmra.mrb[70].mxu0 %v4867_v14 }
 0x85c   : > { %v4883_v35 = vsub.f32 %v4881_v20, %v4882_v29  ;;  %4948 = vmatprep.mubr.f32.mxu0 %v9792_v61 }
 0x85d   : > { %v4877_v42 = vsub.f32 %v4875_v30, %v4876_v3 }
 0x85e   : > { %v4884_v54 = vand.u32 4294901760, %v4883_v35 }
 0x85f   : > { %v4878_v4 = vand.u32 4294901760, %v4877_v42 }
 0x861   : > { %4879 = vmatprep.subr.mxu0 %v4878_v4 }
 0x862   : > { %4885 = vmatpush1.msra.mxu0 %v4884_v54 }
 0x863   : > { %4950 = vmatmul.mubr.f32.vlgmr.msra.gmra.mrb[70].mxu0 %v4863_v1  ;;  %4958 = vmatprep.subr.mxu0 %v4875_v30 }
 0x864   : > { %4961 = vmatpush1.msra.mxu0 %v4881_v20  ;;  %5024 = vmatprep.mubr.f32.mxu0 %v9792_v61 }
 0x865   : > { %5034 = vmatprep.subr.mxu0 %v4796_v16 }
 0x86b   : > { %5027 = vmatmul.mubr.f32.vlgmr.msra.gmra.mrb[70].mxu0 %v4864_v25 }
 0x86c   : > { %5036 = vmatpush1.msra.mxu0 %v4798_v21  ;;  %5099 = vmatprep.mubr.f32.mxu0 %v9792_v61 }
 0x86d   : > { %5112 = vmatprep.subr.mxu0 %v4876_v3 }
 0x873   : > { %5103 = vmatmul.mubr.f32.vlgmr.msra.gmra.mrb[70].mxu0 %v4865_v60 }
 0x874   : > { %5116 = vmatpush1.msra.mxu0 %v4882_v29  ;;  %5179 = vmatprep.mubr.f32.mxu0 %v9792_v61 }
 0x875   : > { %5188 = vmatprep.subr.mxu0 %v4796_v16 }
 0x87b   : > { %5181 = vmatmul.mubr.f32.vlgmr.msra.gmra.mrb[70].mxu0 %v4863_v1 }
 0x87c   : > { %5190 = vmatpush1.msra.mxu0 %v4798_v21  ;;  %5253 = vmatprep.mubr.f32.mxu0 %v9792_v61 }
 0x883   : > { %5255 = vmatmul.mubr.f32.vlgmr.msra.gmra.mrb[70].mxu0 %v4863_v1 }
 0x956   : > { %v5256_v23 = vpop.f32.mrb[70].mxu0 }
 0x957   : > { %v5809_v59 = vadd.f32 %v5256_v23, %v4785_v13  ;;  %v5258_v36 = vpop.f32.mrb[71].mxu0 }
 0x958   : > { %v5810_v49 = vadd.f32 %v5258_v36, %v4785_v13 }
 0x959   : > { %v5262_v52 = vadd.f32 %v6343_v22, %v5809_v59 }
 0x95a   : > { %v5263_v32 = vadd.f32 %v5810_v49, %v9793_v41 }
 0x95c   : > { %v5266_v39 = vcombine.low %v5262_v52, %v5263_v32 }
 0x95e   : > { %5268 = vst [vmem:[%s217_s9] sm:$0xff] %v5266_v39 }
 0x95f   : > { %6357 = shalt.err (!%p6354_p3)
}
 0x960   : > { %s6358_s23 = scalar_lea.hbm %s8957_s13, 128  ;;  %s6362_s30 = scalar_lea.hbm %s9004_s5, 256 }
 0x961   : > { %p6359_p4 = scmp.ne.s32.totalorder %s8957_s13, %s6358_s23  ;;  %p6363_p9 = scmp.lt.u32.totalorder %s8957_s13, %s9004_s5 }
 0x962   : > { %p6364_p10 = scmp.lt.u32.totalorder %s6362_s30, %s6358_s23  ;;  %p6366_p12 = scmp.lt.u32.totalorder %s6358_s23, %s8957_s13 }
 0x963   : > { %p6360_p7 = pnand %p6359_p4, %p6479_p5 }
 0x964   : > { %p6365_p11 = por %p6364_p10, %p6363_p9 }
 0x965   : > { %p6361_p8 = pneg %p6360_p7 }
 0x966   : > { %p6367_p13 = por %p6366_p12, %p6365_p11 }
 0x968   : > { %p6368_p0 = pnand %p6367_p13, %p6361_p8 }
 0x96a   : > { %6371 = shalt.err (!%p6368_p0)
}
 0x96b   : > { %6107 = dma.vmem_to_hbm [thread:$0]  (%p6479_p5), %s8959_s10, 128, %s8957_s13, %s5270_s14  }
 0x96c PF: > { %p6113_p1 = scmp.ge.s32.totalorder %s6406_s21, 2  ;;  %s5296_s8 = sand.u32 1, %s6394_s18  }
 0x96d   : > { %s5297_s9 = scalar_lea.sflag [#allocation3], %s5296_s8 }
 0x96e   : > { %p6110_p2 = pnand %p6113_p1, %p6483_p6 }
 0x970   : > { %6389 = dma.done.wait (!%p6110_p2), %s5297_s9, 128  }
 0x971   : > { %6391 = vsyncadd (!%p6110_p2), %s5297_s9, 4294967168  ;;  %p15_p3 = scmp.ge.s32.totalorder %s6466_s24, 4   ;;  %s9794_s18 = smov %s6398_s19 }
 0x972   : > { %s9795_s19 = smov %s6402_s20  ;;  %s9796_s20 = smov %s6477_s27 }
 0x973   : > { %s9797_s21 = smov %s6466_s24  ;;  %17 = sbr.rel (!%p15_p3) target bundleno = 3 (0x3), region = 75 }
 0x97a   :  { %5302 = vsyncpa [#allocation3], 1 }
 0x97b   :  { %5304 = vsyncpa [#allocation3 + $0x1], 1 }

</bundles_post_ra>
